<compile_context>
chip_gen: v7x
topology: tpu7x:2x2x1
jax: 0.10.0
libtpu: 0.0.40
codegen_flags: <defaults>
</compile_context>

<pallas_src>
import jax
import jax.numpy as jnp
import numpy as np
from jax.experimental import pallas as pl
from jax.experimental.pallas import tpu as pltpu

# ---- small, module-consistent shapes -------------------------------------
B = 2            # batch
S = 8            # tokenized_length (sequence)
H = 32           # hidden size
NUM_HEADS = 4
HEAD_DIM = H // NUM_HEADS
INTER = 64       # MLP intermediate size
DEPTH = 8        # self.depth
EPS = 1e-6
ROPE_THETA = 10000.0


# ---------------------------------------------------------------------------
# Pallas kernel: one grid step = one batch element; all DEPTH layers run in
# an in-kernel static loop over VMEM-resident stacked weights.
# ---------------------------------------------------------------------------
def fused_stack_kernel(x_ref, cs_ref, wqkv_ref, wo_ref, wgu_ref, wd_ref, o_ref):
    cos = cs_ref[:, :H]          # (S, H) f32, tiled over heads
    sin = cs_ref[:, H:]          # (S, H)
    x = x_ref[0]                 # (S, H) f32 residual stream

    def rms_norm(v):
        # gain is folded into the following projection's weights host-side
        var = jnp.mean(v * v, axis=-1, keepdims=True)
        return v * jax.lax.rsqrt(var + EPS)

    for dd in range(DEPTH):      # static unrolled depth loop
        wqkv = wqkv_ref[dd]      # (H, 5H)  bf16: [q | k | v | q@rot | k@rot]
        wo = wo_ref[dd]          # (H, H)   bf16
        wgu = wgu_ref[dd]        # (H, 2I)  bf16: [gate | up]
        wd = wd_ref[dd]          # (I, H)   bf16

        # ---- self-attention block ----
        h = rms_norm(x).astype(jnp.bfloat16)
        qkv = jnp.dot(h, wqkv, preferred_element_type=jnp.float32)   # (S, 5H)
        q = qkv[:, 0:H]
        k = qkv[:, H:2 * H]
        v = qkv[:, 2 * H:3 * H]
        qr = qkv[:, 3 * H:4 * H]          # rotate_half(q), precomputed in W
        kr = qkv[:, 4 * H:5 * H]          # rotate_half(k)

        # RoPE (1/sqrt(Dh) already folded into the q / q_rot weight columns)
        q = q * cos + qr * sin
        k = k * cos + kr * sin
        qb = q.astype(jnp.bfloat16)
        kb = k.astype(jnp.bfloat16)
        vb = v.astype(jnp.bfloat16)

        # per-head score matmuls, single softmax chain for all heads
        sc = []
        for hh in range(NUM_HEADS):
            lo = hh * HEAD_DIM
            sc.append(jnp.dot(qb[:, lo:lo + HEAD_DIM], kb[:, lo:lo + HEAD_DIM].T,
                              preferred_element_type=jnp.float32))
        scores = jnp.concatenate(sc, axis=0)            # (NUM_HEADS*S, S)
        m = jnp.max(scores, axis=-1, keepdims=True)
        e = jnp.exp(scores - m)
        p = e * pl.reciprocal(jnp.sum(e, axis=-1, keepdims=True), approx=True)
        pb = p.astype(jnp.bfloat16)

        ctx = []
        for hh in range(NUM_HEADS):
            lo = hh * HEAD_DIM
            ctx.append(jnp.dot(pb[hh * S:(hh + 1) * S, :], vb[:, lo:lo + HEAD_DIM],
                               preferred_element_type=jnp.float32))
        ctx = jnp.concatenate(ctx, axis=-1)             # (S, H) f32
        x = x + jnp.dot(ctx.astype(jnp.bfloat16), wo,
                        preferred_element_type=jnp.float32)

        # ---- MLP block (SwiGLU), gate/up fused into one lane-dense matmul ----
        h2 = rms_norm(x).astype(jnp.bfloat16)
        gu = jnp.dot(h2, wgu, preferred_element_type=jnp.float32)    # (S, 2I)
        g = gu[:, :INTER]
        u = gu[:, INTER:]
        act = (g * jax.nn.sigmoid(g)) * u
        x = x + jnp.dot(act.astype(jnp.bfloat16), wd,
                        preferred_element_type=jnp.float32)

    o_ref[0] = x.astype(o_ref.dtype)


# ---------------------------------------------------------------------------
# Single pallas_call, grid=(B,); weights are grid-invariant VMEM residents.
# ---------------------------------------------------------------------------
@jax.jit
def abbreviated_model_forward(x, cs, wqkv, wo, wgu, wd):
    # TODO(synk): matches the HF eager path with attention_mask=None (full,
    # non-causal attention), exactly as the reference calls the layers.
    return pl.pallas_call(
        fused_stack_kernel,
        out_shape=jax.ShapeDtypeStruct(x.shape, x.dtype),
        grid=(B,),
        in_specs=[
            pl.BlockSpec((1, S, H), lambda b: (b, 0, 0)),              # x
            pl.BlockSpec((S, 2 * H), lambda b: (0, 0)),                # cos|sin
            pl.BlockSpec((DEPTH, H, 5 * H), lambda b: (0, 0, 0)),      # q|k|v|qr|kr
            pl.BlockSpec((DEPTH, H, H), lambda b: (0, 0, 0)),          # Wo
            pl.BlockSpec((DEPTH, H, 2 * INTER), lambda b: (0, 0, 0)),  # gate|up
            pl.BlockSpec((DEPTH, INTER, H), lambda b: (0, 0, 0)),      # Wdown
        ],
        out_specs=pl.BlockSpec((1, S, H), lambda b: (b, 0, 0)),
        compiler_params=pltpu.CompilerParams(
            dimension_semantics=("parallel",)),
    )(x, cs, wqkv, wo, wgu, wd)


# ---------------------------------------------------------------------------
# Glue (plain JAX / numpy): rotary tables, rotate_half matrix, fused params.
# ---------------------------------------------------------------------------
def rotary_tables():
    # position_ids = [0..S) for every batch element -> batch-invariant tables.
    inv_freq = 1.0 / (ROPE_THETA ** (
        jnp.arange(0, HEAD_DIM, 2, dtype=jnp.float32) / HEAD_DIM))
    pos = jnp.arange(S, dtype=jnp.float32)
    freqs = pos[:, None] * inv_freq[None, :]               # (S, Dh/2)
    emb = jnp.concatenate([freqs, freqs], axis=-1)         # (S, Dh)
    cos_f = jnp.tile(jnp.cos(emb), (1, NUM_HEADS))         # (S, H)
    sin_f = jnp.tile(jnp.sin(emb), (1, NUM_HEADS))         # (S, H)
    return jnp.concatenate([cos_f, sin_f], axis=-1)        # (S, 2H)


def rotate_half_matrix():
    half = HEAD_DIM // 2
    r = np.zeros((HEAD_DIM, HEAD_DIM), dtype=np.float32)
    # (x @ r) == rotate_half(x) == concat(-x[half:], x[:half]) per head
    for j in range(half):
        r[j + half, j] = -1.0
    for j in range(half, HEAD_DIM):
        r[j - half, j] = 1.0
    full = np.zeros((H, H), dtype=np.float32)
    for hh in range(NUM_HEADS):
        lo = hh * HEAD_DIM
        full[lo:lo + HEAD_DIM, lo:lo + HEAD_DIM] = r
    return jnp.asarray(full)


def init_stacked_params(key):
    """All layers' weights stacked on a leading DEPTH axis, pre-fused
    (q|k|v|q@rot|k@rot and gate|up), with RMSNorm gains and 1/sqrt(Dh)
    folded in, pre-transposed to (in_features, out_features), cast to bf16."""
    wscale = 0.05
    rot = rotate_half_matrix()
    qscale = 1.0 / np.sqrt(HEAD_DIM)
    wqkv_l, wo_l, wgu_l, wd_l = [], [], [], []
    for lk in jax.random.split(key, DEPTH):
        ks = jax.random.split(lk, 7)
        wq = wscale * jax.random.normal(ks[0], (H, H), jnp.float32)
        wk = wscale * jax.random.normal(ks[1], (H, H), jnp.float32)
        wv = wscale * jax.random.normal(ks[2], (H, H), jnp.float32)
        wo = wscale * jax.random.normal(ks[3], (H, H), jnp.float32)
        wg = wscale * jax.random.normal(ks[4], (H, INTER), jnp.float32)
        wu = wscale * jax.random.normal(ks[5], (H, INTER), jnp.float32)
        wd = wscale * jax.random.normal(ks[6], (INTER, H), jnp.float32)
        n1 = jnp.ones((H,), jnp.float32)   # input_layernorm gain (HF init = 1)
        n2 = jnp.ones((H,), jnp.float32)   # post_attn_layernorm gain
        wq_n = n1[:, None] * wq
        wk_n = n1[:, None] * wk
        wv_n = n1[:, None] * wv
        wqkv = jnp.concatenate(
            [wq_n * qscale, wk_n, wv_n,
             (wq_n @ rot) * qscale, wk_n @ rot], axis=-1)        # (H, 5H)
        wgu = jnp.concatenate([n2[:, None] * wg, n2[:, None] * wu], axis=-1)
        wqkv_l.append(wqkv)
        wo_l.append(wo)
        wgu_l.append(wgu)
        wd_l.append(wd)
    stack_bf16 = lambda ts: jnp.stack(ts).astype(jnp.bfloat16)
    return (stack_bf16(wqkv_l), stack_bf16(wo_l),
            stack_bf16(wgu_l), stack_bf16(wd_l))


if __name__ == "__main__":
    key = jax.random.PRNGKey(0)
    key, xk, pk = jax.random.split(key, 3)

    # "input_ids" in the reference module are actually hidden states fed
    # straight into the decoder layers.
    x = jax.random.normal(xk, (B, S, H), dtype=jnp.float32)

    cs = rotary_tables()
    wqkv, wo, wgu, wd = init_stacked_params(pk)

    out = abbreviated_model_forward(x, cs, wqkv, wo, wgu, wd)
    jax.block_until_ready(out)
    assert out.shape == (B, S, H)
    print("KERNEL_OK")
</pallas_src>

<mosaic_0001>
module attributes {stable_mosaic.version = 11 : i64} {
  func.func @fused_stack_kernel(%arg0: i32, %arg1: memref<1x8x32xf32, #tpu.memory_space<vmem>>, %arg2: memref<8x64xf32, #tpu.memory_space<vmem>>, %arg3: memref<8x32x160xbf16, #tpu.memory_space<vmem>>, %arg4: memref<8x32x32xbf16, #tpu.memory_space<vmem>>, %arg5: memref<8x32x128xbf16, #tpu.memory_space<vmem>>, %arg6: memref<8x64x32xbf16, #tpu.memory_space<vmem>>, %arg7: memref<1x8x32xf32, #tpu.memory_space<vmem>>) attributes {dimension_semantics = [#tpu.dimension_semantics<parallel>], iteration_bounds = array<i64: 2>, scalar_prefetch = 0 : i64, scratch_operands = 0 : i64, tpu.core_type = #tpu.core_type<tc>, window_params = [{transform_indices = @transform_0, window_bounds = array<i64: 1, 8, 32>}, {pipeline_mode = #tpu.pipeline_mode<synchronous>, transform_indices = @transform_1, window_bounds = array<i64: 8, 64>}, {pipeline_mode = #tpu.pipeline_mode<synchronous>, transform_indices = @transform_2, window_bounds = array<i64: 8, 32, 160>}, {pipeline_mode = #tpu.pipeline_mode<synchronous>, transform_indices = @transform_3, window_bounds = array<i64: 8, 32, 32>}, {pipeline_mode = #tpu.pipeline_mode<synchronous>, transform_indices = @transform_4, window_bounds = array<i64: 8, 32, 128>}, {pipeline_mode = #tpu.pipeline_mode<synchronous>, transform_indices = @transform_5, window_bounds = array<i64: 8, 64, 32>}, {transform_indices = @transform_6, window_bounds = array<i64: 1, 8, 32>}]} {
    %c0 = arith.constant 0 : index
    %c0_0 = arith.constant 0 : index
    %0 = vector.load %arg2[%c0, %c0_0] : memref<8x64xf32, #tpu.memory_space<vmem>>, vector<8x32xf32>
    %c0_1 = arith.constant 0 : index
    %c32 = arith.constant 32 : index
    %1 = vector.load %arg2[%c0_1, %c32] : memref<8x64xf32, #tpu.memory_space<vmem>>, vector<8x32xf32>
    %c0_2 = arith.constant 0 : index
    %c0_3 = arith.constant 0 : index
    %c0_4 = arith.constant 0 : index
    %2 = vector.load %arg1[%c0_2, %c0_3, %c0_4] : memref<1x8x32xf32, #tpu.memory_space<vmem>>, vector<1x8x32xf32>
    %3 = vector.shape_cast %2 : vector<1x8x32xf32> to vector<8x32xf32>
    %c0_5 = arith.constant 0 : index
    %c0_6 = arith.constant 0 : index
    %c0_7 = arith.constant 0 : index
    %4 = vector.load %arg3[%c0_5, %c0_6, %c0_7] : memref<8x32x160xbf16, #tpu.memory_space<vmem>>, vector<1x32x160xbf16>
    %5 = vector.shape_cast %4 : vector<1x32x160xbf16> to vector<32x160xbf16>
    %c0_8 = arith.constant 0 : index
    %c0_9 = arith.constant 0 : index
    %c0_10 = arith.constant 0 : index
    %6 = vector.load %arg4[%c0_8, %c0_9, %c0_10] : memref<8x32x32xbf16, #tpu.memory_space<vmem>>, vector<1x32x32xbf16>
    %7 = vector.shape_cast %6 : vector<1x32x32xbf16> to vector<32x32xbf16>
    %c0_11 = arith.constant 0 : index
    %c0_12 = arith.constant 0 : index
    %c0_13 = arith.constant 0 : index
    %8 = vector.load %arg5[%c0_11, %c0_12, %c0_13] : memref<8x32x128xbf16, #tpu.memory_space<vmem>>, vector<1x32x128xbf16>
    %9 = vector.shape_cast %8 : vector<1x32x128xbf16> to vector<32x128xbf16>
    %c0_14 = arith.constant 0 : index
    %c0_15 = arith.constant 0 : index
    %c0_16 = arith.constant 0 : index
    %10 = vector.load %arg6[%c0_14, %c0_15, %c0_16] : memref<8x64x32xbf16, #tpu.memory_space<vmem>>, vector<1x64x32xbf16>
    %11 = vector.shape_cast %10 : vector<1x64x32xbf16> to vector<64x32xbf16>
    %12 = arith.mulf %3, %3 : vector<8x32xf32>
    %cst = arith.constant dense<0.000000e+00> : vector<8xf32>
    %13 = vector.multi_reduction <add>, %12, %cst [1] : vector<8x32xf32> to vector<8xf32>
    %14 = vector.shape_cast %13 : vector<8xf32> to vector<8x1xf32>
    %cst_17 = arith.constant 3.200000e+01 : f32
    %15 = vector.broadcast %cst_17 : f32 to vector<8x1xf32>
    %16 = arith.divf %14, %15 : vector<8x1xf32>
    %cst_18 = arith.constant 9.99999997E-7 : f32
    %17 = vector.broadcast %cst_18 : f32 to vector<8x1xf32>
    %18 = arith.addf %16, %17 : vector<8x1xf32>
    %19 = math.rsqrt %18 : vector<8x1xf32>
    %20 = vector.broadcast %19 : vector<8x1xf32> to vector<8x32xf32>
    %21 = arith.mulf %3, %20 : vector<8x32xf32>
    %22 = arith.truncf %21 : vector<8x32xf32> to vector<8x32xbf16>
    %cst_19 = arith.constant dense<0.000000e+00> : vector<8x160xf32>
    %23 = tpu.matmul %22, %5, %cst_19 {dimension_numbers = #tpu.dot_dimension_numbers<[1], [0], [0], [1], [0, 0, 1, 1], [], []>} : vector<8x32xbf16>, vector<32x160xbf16>, vector<8x160xf32> -> vector<8x160xf32>
    %24 = vector.extract_strided_slice %23 {offsets = [0, 0], sizes = [8, 32], strides = [1, 1]} : vector<8x160xf32> to vector<8x32xf32>
    %25 = vector.extract_strided_slice %23 {offsets = [0, 32], sizes = [8, 32], strides = [1, 1]} : vector<8x160xf32> to vector<8x32xf32>
    %26 = vector.extract_strided_slice %23 {offsets = [0, 64], sizes = [8, 32], strides = [1, 1]} : vector<8x160xf32> to vector<8x32xf32>
    %27 = vector.extract_strided_slice %23 {offsets = [0, 96], sizes = [8, 32], strides = [1, 1]} : vector<8x160xf32> to vector<8x32xf32>
    %28 = vector.extract_strided_slice %23 {offsets = [0, 128], sizes = [8, 32], strides = [1, 1]} : vector<8x160xf32> to vector<8x32xf32>
    %29 = arith.mulf %24, %0 : vector<8x32xf32>
    %30 = arith.mulf %27, %1 : vector<8x32xf32>
    %31 = arith.addf %29, %30 : vector<8x32xf32>
    %32 = arith.mulf %25, %0 : vector<8x32xf32>
    %33 = arith.mulf %28, %1 : vector<8x32xf32>
    %34 = arith.addf %32, %33 : vector<8x32xf32>
    %35 = arith.truncf %31 : vector<8x32xf32> to vector<8x32xbf16>
    %36 = arith.truncf %34 : vector<8x32xf32> to vector<8x32xbf16>
    %37 = arith.truncf %26 : vector<8x32xf32> to vector<8x32xbf16>
    %38 = vector.extract_strided_slice %35 {offsets = [0, 0], sizes = [8, 8], strides = [1, 1]} : vector<8x32xbf16> to vector<8x8xbf16>
    %39 = vector.extract_strided_slice %36 {offsets = [0, 0], sizes = [8, 8], strides = [1, 1]} : vector<8x32xbf16> to vector<8x8xbf16>
    %40 = tpu.transpose %39, [1, 0] : vector<8x8xbf16> -> vector<8x8xbf16>
    %cst_20 = arith.constant dense<0.000000e+00> : vector<8x8xf32>
    %41 = tpu.matmul %38, %40, %cst_20 {dimension_numbers = #tpu.dot_dimension_numbers<[1], [0], [0], [1], [0, 0, 1, 1], [], []>} : vector<8x8xbf16>, vector<8x8xbf16>, vector<8x8xf32> -> vector<8x8xf32>
    %42 = vector.extract_strided_slice %35 {offsets = [0, 8], sizes = [8, 8], strides = [1, 1]} : vector<8x32xbf16> to vector<8x8xbf16>
    %43 = vector.extract_strided_slice %36 {offsets = [0, 8], sizes = [8, 8], strides = [1, 1]} : vector<8x32xbf16> to vector<8x8xbf16>
    %44 = tpu.transpose %43, [1, 0] : vector<8x8xbf16> -> vector<8x8xbf16>
    %cst_21 = arith.constant dense<0.000000e+00> : vector<8x8xf32>
    %45 = tpu.matmul %42, %44, %cst_21 {dimension_numbers = #tpu.dot_dimension_numbers<[1], [0], [0], [1], [0, 0, 1, 1], [], []>} : vector<8x8xbf16>, vector<8x8xbf16>, vector<8x8xf32> -> vector<8x8xf32>
    %46 = vector.extract_strided_slice %35 {offsets = [0, 16], sizes = [8, 8], strides = [1, 1]} : vector<8x32xbf16> to vector<8x8xbf16>
    %47 = vector.extract_strided_slice %36 {offsets = [0, 16], sizes = [8, 8], strides = [1, 1]} : vector<8x32xbf16> to vector<8x8xbf16>
    %48 = tpu.transpose %47, [1, 0] : vector<8x8xbf16> -> vector<8x8xbf16>
    %cst_22 = arith.constant dense<0.000000e+00> : vector<8x8xf32>
    %49 = tpu.matmul %46, %48, %cst_22 {dimension_numbers = #tpu.dot_dimension_numbers<[1], [0], [0], [1], [0, 0, 1, 1], [], []>} : vector<8x8xbf16>, vector<8x8xbf16>, vector<8x8xf32> -> vector<8x8xf32>
    %50 = vector.extract_strided_slice %35 {offsets = [0, 24], sizes = [8, 8], strides = [1, 1]} : vector<8x32xbf16> to vector<8x8xbf16>
    %51 = vector.extract_strided_slice %36 {offsets = [0, 24], sizes = [8, 8], strides = [1, 1]} : vector<8x32xbf16> to vector<8x8xbf16>
    %52 = tpu.transpose %51, [1, 0] : vector<8x8xbf16> -> vector<8x8xbf16>
    %cst_23 = arith.constant dense<0.000000e+00> : vector<8x8xf32>
    %53 = tpu.matmul %50, %52, %cst_23 {dimension_numbers = #tpu.dot_dimension_numbers<[1], [0], [0], [1], [0, 0, 1, 1], [], []>} : vector<8x8xbf16>, vector<8x8xbf16>, vector<8x8xf32> -> vector<8x8xf32>
    %54 = tpu.concatenate %41, %45, %49, %53 in 0 : vector<8x8xf32>, vector<8x8xf32>, vector<8x8xf32>, vector<8x8xf32> -> vector<32x8xf32>
    %cst_24 = arith.constant dense<0xFF800000> : vector<32xf32>
    %55 = vector.multi_reduction <maximumf>, %54, %cst_24 [1] : vector<32x8xf32> to vector<32xf32>
    %56 = vector.shape_cast %55 : vector<32xf32> to vector<32x1xf32>
    %57 = vector.broadcast %56 : vector<32x1xf32> to vector<32x8xf32>
    %58 = arith.subf %54, %57 : vector<32x8xf32>
    %59 = math.exp %58 : vector<32x8xf32>
    %cst_25 = arith.constant dense<0.000000e+00> : vector<32xf32>
    %60 = vector.multi_reduction <add>, %59, %cst_25 [1] : vector<32x8xf32> to vector<32xf32>
    %61 = vector.shape_cast %60 : vector<32xf32> to vector<32x1xf32>
    %62 = tpu.reciprocal %61 {approx = true} : vector<32x1xf32> -> vector<32x1xf32>
    %63 = vector.broadcast %62 : vector<32x1xf32> to vector<32x8xf32>
    %64 = arith.mulf %59, %63 : vector<32x8xf32>
    %65 = arith.truncf %64 : vector<32x8xf32> to vector<32x8xbf16>
    %66 = vector.extract_strided_slice %65 {offsets = [0, 0], sizes = [8, 8], strides = [1, 1]} : vector<32x8xbf16> to vector<8x8xbf16>
    %67 = vector.extract_strided_slice %37 {offsets = [0, 0], sizes = [8, 8], strides = [1, 1]} : vector<8x32xbf16> to vector<8x8xbf16>
    %cst_26 = arith.constant dense<0.000000e+00> : vector<8x8xf32>
    %68 = tpu.matmul %66, %67, %cst_26 {dimension_numbers = #tpu.dot_dimension_numbers<[1], [0], [0], [1], [0, 0, 1, 1], [], []>} : vector<8x8xbf16>, vector<8x8xbf16>, vector<8x8xf32> -> vector<8x8xf32>
    %69 = vector.extract_strided_slice %65 {offsets = [8, 0], sizes = [8, 8], strides = [1, 1]} : vector<32x8xbf16> to vector<8x8xbf16>
    %70 = vector.extract_strided_slice %37 {offsets = [0, 8], sizes = [8, 8], strides = [1, 1]} : vector<8x32xbf16> to vector<8x8xbf16>
    %cst_27 = arith.constant dense<0.000000e+00> : vector<8x8xf32>
    %71 = tpu.matmul %69, %70, %cst_27 {dimension_numbers = #tpu.dot_dimension_numbers<[1], [0], [0], [1], [0, 0, 1, 1], [], []>} : vector<8x8xbf16>, vector<8x8xbf16>, vector<8x8xf32> -> vector<8x8xf32>
    %72 = vector.extract_strided_slice %65 {offsets = [16, 0], sizes = [8, 8], strides = [1, 1]} : vector<32x8xbf16> to vector<8x8xbf16>
    %73 = vector.extract_strided_slice %37 {offsets = [0, 16], sizes = [8, 8], strides = [1, 1]} : vector<8x32xbf16> to vector<8x8xbf16>
    %cst_28 = arith.constant dense<0.000000e+00> : vector<8x8xf32>
    %74 = tpu.matmul %72, %73, %cst_28 {dimension_numbers = #tpu.dot_dimension_numbers<[1], [0], [0], [1], [0, 0, 1, 1], [], []>} : vector<8x8xbf16>, vector<8x8xbf16>, vector<8x8xf32> -> vector<8x8xf32>
    %75 = vector.extract_strided_slice %65 {offsets = [24, 0], sizes = [8, 8], strides = [1, 1]} : vector<32x8xbf16> to vector<8x8xbf16>
    %76 = vector.extract_strided_slice %37 {offsets = [0, 24], sizes = [8, 8], strides = [1, 1]} : vector<8x32xbf16> to vector<8x8xbf16>
    %cst_29 = arith.constant dense<0.000000e+00> : vector<8x8xf32>
    %77 = tpu.matmul %75, %76, %cst_29 {dimension_numbers = #tpu.dot_dimension_numbers<[1], [0], [0], [1], [0, 0, 1, 1], [], []>} : vector<8x8xbf16>, vector<8x8xbf16>, vector<8x8xf32> -> vector<8x8xf32>
    %78 = tpu.concatenate %68, %71, %74, %77 in 1 : vector<8x8xf32>, vector<8x8xf32>, vector<8x8xf32>, vector<8x8xf32> -> vector<8x32xf32>
    %79 = arith.truncf %78 : vector<8x32xf32> to vector<8x32xbf16>
    %cst_30 = arith.constant dense<0.000000e+00> : vector<8x32xf32>
    %80 = tpu.matmul %79, %7, %cst_30 {dimension_numbers = #tpu.dot_dimension_numbers<[1], [0], [0], [1], [0, 0, 1, 1], [], []>} : vector<8x32xbf16>, vector<32x32xbf16>, vector<8x32xf32> -> vector<8x32xf32>
    %81 = arith.addf %3, %80 : vector<8x32xf32>
    %82 = arith.mulf %81, %81 : vector<8x32xf32>
    %cst_31 = arith.constant dense<0.000000e+00> : vector<8xf32>
    %83 = vector.multi_reduction <add>, %82, %cst_31 [1] : vector<8x32xf32> to vector<8xf32>
    %84 = vector.shape_cast %83 : vector<8xf32> to vector<8x1xf32>
    %cst_32 = arith.constant 3.200000e+01 : f32
    %85 = vector.broadcast %cst_32 : f32 to vector<8x1xf32>
    %86 = arith.divf %84, %85 : vector<8x1xf32>
    %cst_33 = arith.constant 9.99999997E-7 : f32
    %87 = vector.broadcast %cst_33 : f32 to vector<8x1xf32>
    %88 = arith.addf %86, %87 : vector<8x1xf32>
    %89 = math.rsqrt %88 : vector<8x1xf32>
    %90 = vector.broadcast %89 : vector<8x1xf32> to vector<8x32xf32>
    %91 = arith.mulf %81, %90 : vector<8x32xf32>
    %92 = arith.truncf %91 : vector<8x32xf32> to vector<8x32xbf16>
    %cst_34 = arith.constant dense<0.000000e+00> : vector<8x128xf32>
    %93 = tpu.matmul %92, %9, %cst_34 {dimension_numbers = #tpu.dot_dimension_numbers<[1], [0], [0], [1], [0, 0, 1, 1], [], []>} : vector<8x32xbf16>, vector<32x128xbf16>, vector<8x128xf32> -> vector<8x128xf32>
    %94 = vector.extract_strided_slice %93 {offsets = [0, 0], sizes = [8, 64], strides = [1, 1]} : vector<8x128xf32> to vector<8x64xf32>
    %95 = vector.extract_strided_slice %93 {offsets = [0, 64], sizes = [8, 64], strides = [1, 1]} : vector<8x128xf32> to vector<8x64xf32>
    %96 = arith.negf %94 : vector<8x64xf32>
    %97 = math.exp %96 : vector<8x64xf32>
    %cst_35 = arith.constant 1.000000e+00 : f32
    %98 = vector.broadcast %cst_35 : f32 to vector<8x64xf32>
    %99 = arith.addf %98, %97 : vector<8x64xf32>
    %100 = arith.divf %98, %99 : vector<8x64xf32>
    %101 = arith.mulf %94, %100 : vector<8x64xf32>
    %102 = arith.mulf %101, %95 : vector<8x64xf32>
    %103 = arith.truncf %102 : vector<8x64xf32> to vector<8x64xbf16>
    %cst_36 = arith.constant dense<0.000000e+00> : vector<8x32xf32>
    %104 = tpu.matmul %103, %11, %cst_36 {dimension_numbers = #tpu.dot_dimension_numbers<[1], [0], [0], [1], [0, 0, 1, 1], [], []>} : vector<8x64xbf16>, vector<64x32xbf16>, vector<8x32xf32> -> vector<8x32xf32>
    %105 = arith.addf %81, %104 : vector<8x32xf32>
    %c1 = arith.constant 1 : index
    %c0_37 = arith.constant 0 : index
    %c0_38 = arith.constant 0 : index
    %106 = vector.load %arg3[%c1, %c0_37, %c0_38] : memref<8x32x160xbf16, #tpu.memory_space<vmem>>, vector<1x32x160xbf16>
    %107 = vector.shape_cast %106 : vector<1x32x160xbf16> to vector<32x160xbf16>
    %c1_39 = arith.constant 1 : index
    %c0_40 = arith.constant 0 : index
    %c0_41 = arith.constant 0 : index
    %108 = vector.load %arg4[%c1_39, %c0_40, %c0_41] : memref<8x32x32xbf16, #tpu.memory_space<vmem>>, vector<1x32x32xbf16>
    %109 = vector.shape_cast %108 : vector<1x32x32xbf16> to vector<32x32xbf16>
    %c1_42 = arith.constant 1 : index
    %c0_43 = arith.constant 0 : index
    %c0_44 = arith.constant 0 : index
    %110 = vector.load %arg5[%c1_42, %c0_43, %c0_44] : memref<8x32x128xbf16, #tpu.memory_space<vmem>>, vector<1x32x128xbf16>
    %111 = vector.shape_cast %110 : vector<1x32x128xbf16> to vector<32x128xbf16>
    %c1_45 = arith.constant 1 : index
    %c0_46 = arith.constant 0 : index
    %c0_47 = arith.constant 0 : index
    %112 = vector.load %arg6[%c1_45, %c0_46, %c0_47] : memref<8x64x32xbf16, #tpu.memory_space<vmem>>, vector<1x64x32xbf16>
    %113 = vector.shape_cast %112 : vector<1x64x32xbf16> to vector<64x32xbf16>
    %114 = arith.mulf %105, %105 : vector<8x32xf32>
    %cst_48 = arith.constant dense<0.000000e+00> : vector<8xf32>
    %115 = vector.multi_reduction <add>, %114, %cst_48 [1] : vector<8x32xf32> to vector<8xf32>
    %116 = vector.shape_cast %115 : vector<8xf32> to vector<8x1xf32>
    %cst_49 = arith.constant 3.200000e+01 : f32
    %117 = vector.broadcast %cst_49 : f32 to vector<8x1xf32>
    %118 = arith.divf %116, %117 : vector<8x1xf32>
    %cst_50 = arith.constant 9.99999997E-7 : f32
    %119 = vector.broadcast %cst_50 : f32 to vector<8x1xf32>
    %120 = arith.addf %118, %119 : vector<8x1xf32>
    %121 = math.rsqrt %120 : vector<8x1xf32>
    %122 = vector.broadcast %121 : vector<8x1xf32> to vector<8x32xf32>
    %123 = arith.mulf %105, %122 : vector<8x32xf32>
    %124 = arith.truncf %123 : vector<8x32xf32> to vector<8x32xbf16>
    %cst_51 = arith.constant dense<0.000000e+00> : vector<8x160xf32>
    %125 = tpu.matmul %124, %107, %cst_51 {dimension_numbers = #tpu.dot_dimension_numbers<[1], [0], [0], [1], [0, 0, 1, 1], [], []>} : vector<8x32xbf16>, vector<32x160xbf16>, vector<8x160xf32> -> vector<8x160xf32>
    %126 = vector.extract_strided_slice %125 {offsets = [0, 0], sizes = [8, 32], strides = [1, 1]} : vector<8x160xf32> to vector<8x32xf32>
    %127 = vector.extract_strided_slice %125 {offsets = [0, 32], sizes = [8, 32], strides = [1, 1]} : vector<8x160xf32> to vector<8x32xf32>
    %128 = vector.extract_strided_slice %125 {offsets = [0, 64], sizes = [8, 32], strides = [1, 1]} : vector<8x160xf32> to vector<8x32xf32>
    %129 = vector.extract_strided_slice %125 {offsets = [0, 96], sizes = [8, 32], strides = [1, 1]} : vector<8x160xf32> to vector<8x32xf32>
    %130 = vector.extract_strided_slice %125 {offsets = [0, 128], sizes = [8, 32], strides = [1, 1]} : vector<8x160xf32> to vector<8x32xf32>
    %131 = arith.mulf %126, %0 : vector<8x32xf32>
    %132 = arith.mulf %129, %1 : vector<8x32xf32>
    %133 = arith.addf %131, %132 : vector<8x32xf32>
    %134 = arith.mulf %127, %0 : vector<8x32xf32>
    %135 = arith.mulf %130, %1 : vector<8x32xf32>
    %136 = arith.addf %134, %135 : vector<8x32xf32>
    %137 = arith.truncf %133 : vector<8x32xf32> to vector<8x32xbf16>
    %138 = arith.truncf %136 : vector<8x32xf32> to vector<8x32xbf16>
    %139 = arith.truncf %128 : vector<8x32xf32> to vector<8x32xbf16>
    %140 = vector.extract_strided_slice %137 {offsets = [0, 0], sizes = [8, 8], strides = [1, 1]} : vector<8x32xbf16> to vector<8x8xbf16>
    %141 = vector.extract_strided_slice %138 {offsets = [0, 0], sizes = [8, 8], strides = [1, 1]} : vector<8x32xbf16> to vector<8x8xbf16>
    %142 = tpu.transpose %141, [1, 0] : vector<8x8xbf16> -> vector<8x8xbf16>
    %cst_52 = arith.constant dense<0.000000e+00> : vector<8x8xf32>
    %143 = tpu.matmul %140, %142, %cst_52 {dimension_numbers = #tpu.dot_dimension_numbers<[1], [0], [0], [1], [0, 0, 1, 1], [], []>} : vector<8x8xbf16>, vector<8x8xbf16>, vector<8x8xf32> -> vector<8x8xf32>
    %144 = vector.extract_strided_slice %137 {offsets = [0, 8], sizes = [8, 8], strides = [1, 1]} : vector<8x32xbf16> to vector<8x8xbf16>
    %145 = vector.extract_strided_slice %138 {offsets = [0, 8], sizes = [8, 8], strides = [1, 1]} : vector<8x32xbf16> to vector<8x8xbf16>
    %146 = tpu.transpose %145, [1, 0] : vector<8x8xbf16> -> vector<8x8xbf16>
    %cst_53 = arith.constant dense<0.000000e+00> : vector<8x8xf32>
    %147 = tpu.matmul %144, %146, %cst_53 {dimension_numbers = #tpu.dot_dimension_numbers<[1], [0], [0], [1], [0, 0, 1, 1], [], []>} : vector<8x8xbf16>, vector<8x8xbf16>, vector<8x8xf32> -> vector<8x8xf32>
    %148 = vector.extract_strided_slice %137 {offsets = [0, 16], sizes = [8, 8], strides = [1, 1]} : vector<8x32xbf16> to vector<8x8xbf16>
    %149 = vector.extract_strided_slice %138 {offsets = [0, 16], sizes = [8, 8], strides = [1, 1]} : vector<8x32xbf16> to vector<8x8xbf16>
    %150 = tpu.transpose %149, [1, 0] : vector<8x8xbf16> -> vector<8x8xbf16>
    %cst_54 = arith.constant dense<0.000000e+00> : vector<8x8xf32>
    %151 = tpu.matmul %148, %150, %cst_54 {dimension_numbers = #tpu.dot_dimension_numbers<[1], [0], [0], [1], [0, 0, 1, 1], [], []>} : vector<8x8xbf16>, vector<8x8xbf16>, vector<8x8xf32> -> vector<8x8xf32>
    %152 = vector.extract_strided_slice %137 {offsets = [0, 24], sizes = [8, 8], strides = [1, 1]} : vector<8x32xbf16> to vector<8x8xbf16>
    %153 = vector.extract_strided_slice %138 {offsets = [0, 24], sizes = [8, 8], strides = [1, 1]} : vector<8x32xbf16> to vector<8x8xbf16>
    %154 = tpu.transpose %153, [1, 0] : vector<8x8xbf16> -> vector<8x8xbf16>
    %cst_55 = arith.constant dense<0.000000e+00> : vector<8x8xf32>
    %155 = tpu.matmul %152, %154, %cst_55 {dimension_numbers = #tpu.dot_dimension_numbers<[1], [0], [0], [1], [0, 0, 1, 1], [], []>} : vector<8x8xbf16>, vector<8x8xbf16>, vector<8x8xf32> -> vector<8x8xf32>
    %156 = tpu.concatenate %143, %147, %151, %155 in 0 : vector<8x8xf32>, vector<8x8xf32>, vector<8x8xf32>, vector<8x8xf32> -> vector<32x8xf32>
    %cst_56 = arith.constant dense<0xFF800000> : vector<32xf32>
    %157 = vector.multi_reduction <maximumf>, %156, %cst_56 [1] : vector<32x8xf32> to vector<32xf32>
    %158 = vector.shape_cast %157 : vector<32xf32> to vector<32x1xf32>
    %159 = vector.broadcast %158 : vector<32x1xf32> to vector<32x8xf32>
    %160 = arith.subf %156, %159 : vector<32x8xf32>
    %161 = math.exp %160 : vector<32x8xf32>
    %cst_57 = arith.constant dense<0.000000e+00> : vector<32xf32>
    %162 = vector.multi_reduction <add>, %161, %cst_57 [1] : vector<32x8xf32> to vector<32xf32>
    %163 = vector.shape_cast %162 : vector<32xf32> to vector<32x1xf32>
    %164 = tpu.reciprocal %163 {approx = true} : vector<32x1xf32> -> vector<32x1xf32>
    %165 = vector.broadcast %164 : vector<32x1xf32> to vector<32x8xf32>
    %166 = arith.mulf %161, %165 : vector<32x8xf32>
    %167 = arith.truncf %166 : vector<32x8xf32> to vector<32x8xbf16>
    %168 = vector.extract_strided_slice %167 {offsets = [0, 0], sizes = [8, 8], strides = [1, 1]} : vector<32x8xbf16> to vector<8x8xbf16>
    %169 = vector.extract_strided_slice %139 {offsets = [0, 0], sizes = [8, 8], strides = [1, 1]} : vector<8x32xbf16> to vector<8x8xbf16>
    %cst_58 = arith.constant dense<0.000000e+00> : vector<8x8xf32>
    %170 = tpu.matmul %168, %169, %cst_58 {dimension_numbers = #tpu.dot_dimension_numbers<[1], [0], [0], [1], [0, 0, 1, 1], [], []>} : vector<8x8xbf16>, vector<8x8xbf16>, vector<8x8xf32> -> vector<8x8xf32>
    %171 = vector.extract_strided_slice %167 {offsets = [8, 0], sizes = [8, 8], strides = [1, 1]} : vector<32x8xbf16> to vector<8x8xbf16>
    %172 = vector.extract_strided_slice %139 {offsets = [0, 8], sizes = [8, 8], strides = [1, 1]} : vector<8x32xbf16> to vector<8x8xbf16>
    %cst_59 = arith.constant dense<0.000000e+00> : vector<8x8xf32>
    %173 = tpu.matmul %171, %172, %cst_59 {dimension_numbers = #tpu.dot_dimension_numbers<[1], [0], [0], [1], [0, 0, 1, 1], [], []>} : vector<8x8xbf16>, vector<8x8xbf16>, vector<8x8xf32> -> vector<8x8xf32>
    %174 = vector.extract_strided_slice %167 {offsets = [16, 0], sizes = [8, 8], strides = [1, 1]} : vector<32x8xbf16> to vector<8x8xbf16>
    %175 = vector.extract_strided_slice %139 {offsets = [0, 16], sizes = [8, 8], strides = [1, 1]} : vector<8x32xbf16> to vector<8x8xbf16>
    %cst_60 = arith.constant dense<0.000000e+00> : vector<8x8xf32>
    %176 = tpu.matmul %174, %175, %cst_60 {dimension_numbers = #tpu.dot_dimension_numbers<[1], [0], [0], [1], [0, 0, 1, 1], [], []>} : vector<8x8xbf16>, vector<8x8xbf16>, vector<8x8xf32> -> vector<8x8xf32>
    %177 = vector.extract_strided_slice %167 {offsets = [24, 0], sizes = [8, 8], strides = [1, 1]} : vector<32x8xbf16> to vector<8x8xbf16>
    %178 = vector.extract_strided_slice %139 {offsets = [0, 24], sizes = [8, 8], strides = [1, 1]} : vector<8x32xbf16> to vector<8x8xbf16>
    %cst_61 = arith.constant dense<0.000000e+00> : vector<8x8xf32>
    %179 = tpu.matmul %177, %178, %cst_61 {dimension_numbers = #tpu.dot_dimension_numbers<[1], [0], [0], [1], [0, 0, 1, 1], [], []>} : vector<8x8xbf16>, vector<8x8xbf16>, vector<8x8xf32> -> vector<8x8xf32>
    %180 = tpu.concatenate %170, %173, %176, %179 in 1 : vector<8x8xf32>, vector<8x8xf32>, vector<8x8xf32>, vector<8x8xf32> -> vector<8x32xf32>
    %181 = arith.truncf %180 : vector<8x32xf32> to vector<8x32xbf16>
    %cst_62 = arith.constant dense<0.000000e+00> : vector<8x32xf32>
    %182 = tpu.matmul %181, %109, %cst_62 {dimension_numbers = #tpu.dot_dimension_numbers<[1], [0], [0], [1], [0, 0, 1, 1], [], []>} : vector<8x32xbf16>, vector<32x32xbf16>, vector<8x32xf32> -> vector<8x32xf32>
    %183 = arith.addf %105, %182 : vector<8x32xf32>
    %184 = arith.mulf %183, %183 : vector<8x32xf32>
    %cst_63 = arith.constant dense<0.000000e+00> : vector<8xf32>
    %185 = vector.multi_reduction <add>, %184, %cst_63 [1] : vector<8x32xf32> to vector<8xf32>
    %186 = vector.shape_cast %185 : vector<8xf32> to vector<8x1xf32>
    %cst_64 = arith.constant 3.200000e+01 : f32
    %187 = vector.broadcast %cst_64 : f32 to vector<8x1xf32>
    %188 = arith.divf %186, %187 : vector<8x1xf32>
    %cst_65 = arith.constant 9.99999997E-7 : f32
    %189 = vector.broadcast %cst_65 : f32 to vector<8x1xf32>
    %190 = arith.addf %188, %189 : vector<8x1xf32>
    %191 = math.rsqrt %190 : vector<8x1xf32>
    %192 = vector.broadcast %191 : vector<8x1xf32> to vector<8x32xf32>
    %193 = arith.mulf %183, %192 : vector<8x32xf32>
    %194 = arith.truncf %193 : vector<8x32xf32> to vector<8x32xbf16>
    %cst_66 = arith.constant dense<0.000000e+00> : vector<8x128xf32>
    %195 = tpu.matmul %194, %111, %cst_66 {dimension_numbers = #tpu.dot_dimension_numbers<[1], [0], [0], [1], [0, 0, 1, 1], [], []>} : vector<8x32xbf16>, vector<32x128xbf16>, vector<8x128xf32> -> vector<8x128xf32>
    %196 = vector.extract_strided_slice %195 {offsets = [0, 0], sizes = [8, 64], strides = [1, 1]} : vector<8x128xf32> to vector<8x64xf32>
    %197 = vector.extract_strided_slice %195 {offsets = [0, 64], sizes = [8, 64], strides = [1, 1]} : vector<8x128xf32> to vector<8x64xf32>
    %198 = arith.negf %196 : vector<8x64xf32>
    %199 = math.exp %198 : vector<8x64xf32>
    %cst_67 = arith.constant 1.000000e+00 : f32
    %200 = vector.broadcast %cst_67 : f32 to vector<8x64xf32>
    %201 = arith.addf %200, %199 : vector<8x64xf32>
    %202 = arith.divf %200, %201 : vector<8x64xf32>
    %203 = arith.mulf %196, %202 : vector<8x64xf32>
    %204 = arith.mulf %203, %197 : vector<8x64xf32>
    %205 = arith.truncf %204 : vector<8x64xf32> to vector<8x64xbf16>
    %cst_68 = arith.constant dense<0.000000e+00> : vector<8x32xf32>
    %206 = tpu.matmul %205, %113, %cst_68 {dimension_numbers = #tpu.dot_dimension_numbers<[1], [0], [0], [1], [0, 0, 1, 1], [], []>} : vector<8x64xbf16>, vector<64x32xbf16>, vector<8x32xf32> -> vector<8x32xf32>
    %207 = arith.addf %183, %206 : vector<8x32xf32>
    %c2 = arith.constant 2 : index
    %c0_69 = arith.constant 0 : index
    %c0_70 = arith.constant 0 : index
    %208 = vector.load %arg3[%c2, %c0_69, %c0_70] : memref<8x32x160xbf16, #tpu.memory_space<vmem>>, vector<1x32x160xbf16>
    %209 = vector.shape_cast %208 : vector<1x32x160xbf16> to vector<32x160xbf16>
    %c2_71 = arith.constant 2 : index
    %c0_72 = arith.constant 0 : index
    %c0_73 = arith.constant 0 : index
    %210 = vector.load %arg4[%c2_71, %c0_72, %c0_73] : memref<8x32x32xbf16, #tpu.memory_space<vmem>>, vector<1x32x32xbf16>
    %211 = vector.shape_cast %210 : vector<1x32x32xbf16> to vector<32x32xbf16>
    %c2_74 = arith.constant 2 : index
    %c0_75 = arith.constant 0 : index
    %c0_76 = arith.constant 0 : index
    %212 = vector.load %arg5[%c2_74, %c0_75, %c0_76] : memref<8x32x128xbf16, #tpu.memory_space<vmem>>, vector<1x32x128xbf16>
    %213 = vector.shape_cast %212 : vector<1x32x128xbf16> to vector<32x128xbf16>
    %c2_77 = arith.constant 2 : index
    %c0_78 = arith.constant 0 : index
    %c0_79 = arith.constant 0 : index
    %214 = vector.load %arg6[%c2_77, %c0_78, %c0_79] : memref<8x64x32xbf16, #tpu.memory_space<vmem>>, vector<1x64x32xbf16>
    %215 = vector.shape_cast %214 : vector<1x64x32xbf16> to vector<64x32xbf16>
    %216 = arith.mulf %207, %207 : vector<8x32xf32>
    %cst_80 = arith.constant dense<0.000000e+00> : vector<8xf32>
    %217 = vector.multi_reduction <add>, %216, %cst_80 [1] : vector<8x32xf32> to vector<8xf32>
    %218 = vector.shape_cast %217 : vector<8xf32> to vector<8x1xf32>
    %cst_81 = arith.constant 3.200000e+01 : f32
    %219 = vector.broadcast %cst_81 : f32 to vector<8x1xf32>
    %220 = arith.divf %218, %219 : vector<8x1xf32>
    %cst_82 = arith.constant 9.99999997E-7 : f32
    %221 = vector.broadcast %cst_82 : f32 to vector<8x1xf32>
    %222 = arith.addf %220, %221 : vector<8x1xf32>
    %223 = math.rsqrt %222 : vector<8x1xf32>
    %224 = vector.broadcast %223 : vector<8x1xf32> to vector<8x32xf32>
    %225 = arith.mulf %207, %224 : vector<8x32xf32>
    %226 = arith.truncf %225 : vector<8x32xf32> to vector<8x32xbf16>
    %cst_83 = arith.constant dense<0.000000e+00> : vector<8x160xf32>
    %227 = tpu.matmul %226, %209, %cst_83 {dimension_numbers = #tpu.dot_dimension_numbers<[1], [0], [0], [1], [0, 0, 1, 1], [], []>} : vector<8x32xbf16>, vector<32x160xbf16>, vector<8x160xf32> -> vector<8x160xf32>
    %228 = vector.extract_strided_slice %227 {offsets = [0, 0], sizes = [8, 32], strides = [1, 1]} : vector<8x160xf32> to vector<8x32xf32>
    %229 = vector.extract_strided_slice %227 {offsets = [0, 32], sizes = [8, 32], strides = [1, 1]} : vector<8x160xf32> to vector<8x32xf32>
    %230 = vector.extract_strided_slice %227 {offsets = [0, 64], sizes = [8, 32], strides = [1, 1]} : vector<8x160xf32> to vector<8x32xf32>
    %231 = vector.extract_strided_slice %227 {offsets = [0, 96], sizes = [8, 32], strides = [1, 1]} : vector<8x160xf32> to vector<8x32xf32>
    %232 = vector.extract_strided_slice %227 {offsets = [0, 128], sizes = [8, 32], strides = [1, 1]} : vector<8x160xf32> to vector<8x32xf32>
    %233 = arith.mulf %228, %0 : vector<8x32xf32>
    %234 = arith.mulf %231, %1 : vector<8x32xf32>
    %235 = arith.addf %233, %234 : vector<8x32xf32>
    %236 = arith.mulf %229, %0 : vector<8x32xf32>
    %237 = arith.mulf %232, %1 : vector<8x32xf32>
    %238 = arith.addf %236, %237 : vector<8x32xf32>
    %239 = arith.truncf %235 : vector<8x32xf32> to vector<8x32xbf16>
    %240 = arith.truncf %238 : vector<8x32xf32> to vector<8x32xbf16>
    %241 = arith.truncf %230 : vector<8x32xf32> to vector<8x32xbf16>
    %242 = vector.extract_strided_slice %239 {offsets = [0, 0], sizes = [8, 8], strides = [1, 1]} : vector<8x32xbf16> to vector<8x8xbf16>
    %243 = vector.extract_strided_slice %240 {offsets = [0, 0], sizes = [8, 8], strides = [1, 1]} : vector<8x32xbf16> to vector<8x8xbf16>
    %244 = tpu.transpose %243, [1, 0] : vector<8x8xbf16> -> vector<8x8xbf16>
    %cst_84 = arith.constant dense<0.000000e+00> : vector<8x8xf32>
    %245 = tpu.matmul %242, %244, %cst_84 {dimension_numbers = #tpu.dot_dimension_numbers<[1], [0], [0], [1], [0, 0, 1, 1], [], []>} : vector<8x8xbf16>, vector<8x8xbf16>, vector<8x8xf32> -> vector<8x8xf32>
    %246 = vector.extract_strided_slice %239 {offsets = [0, 8], sizes = [8, 8], strides = [1, 1]} : vector<8x32xbf16> to vector<8x8xbf16>
    %247 = vector.extract_strided_slice %240 {offsets = [0, 8], sizes = [8, 8], strides = [1, 1]} : vector<8x32xbf16> to vector<8x8xbf16>
    %248 = tpu.transpose %247, [1, 0] : vector<8x8xbf16> -> vector<8x8xbf16>
    %cst_85 = arith.constant dense<0.000000e+00> : vector<8x8xf32>
    %249 = tpu.matmul %246, %248, %cst_85 {dimension_numbers = #tpu.dot_dimension_numbers<[1], [0], [0], [1], [0, 0, 1, 1], [], []>} : vector<8x8xbf16>, vector<8x8xbf16>, vector<8x8xf32> -> vector<8x8xf32>
    %250 = vector.extract_strided_slice %239 {offsets = [0, 16], sizes = [8, 8], strides = [1, 1]} : vector<8x32xbf16> to vector<8x8xbf16>
    %251 = vector.extract_strided_slice %240 {offsets = [0, 16], sizes = [8, 8], strides = [1, 1]} : vector<8x32xbf16> to vector<8x8xbf16>
    %252 = tpu.transpose %251, [1, 0] : vector<8x8xbf16> -> vector<8x8xbf16>
    %cst_86 = arith.constant dense<0.000000e+00> : vector<8x8xf32>
    %253 = tpu.matmul %250, %252, %cst_86 {dimension_numbers = #tpu.dot_dimension_numbers<[1], [0], [0], [1], [0, 0, 1, 1], [], []>} : vector<8x8xbf16>, vector<8x8xbf16>, vector<8x8xf32> -> vector<8x8xf32>
    %254 = vector.extract_strided_slice %239 {offsets = [0, 24], sizes = [8, 8], strides = [1, 1]} : vector<8x32xbf16> to vector<8x8xbf16>
    %255 = vector.extract_strided_slice %240 {offsets = [0, 24], sizes = [8, 8], strides = [1, 1]} : vector<8x32xbf16> to vector<8x8xbf16>
    %256 = tpu.transpose %255, [1, 0] : vector<8x8xbf16> -> vector<8x8xbf16>
    %cst_87 = arith.constant dense<0.000000e+00> : vector<8x8xf32>
    %257 = tpu.matmul %254, %256, %cst_87 {dimension_numbers = #tpu.dot_dimension_numbers<[1], [0], [0], [1], [0, 0, 1, 1], [], []>} : vector<8x8xbf16>, vector<8x8xbf16>, vector<8x8xf32> -> vector<8x8xf32>
    %258 = tpu.concatenate %245, %249, %253, %257 in 0 : vector<8x8xf32>, vector<8x8xf32>, vector<8x8xf32>, vector<8x8xf32> -> vector<32x8xf32>
    %cst_88 = arith.constant dense<0xFF800000> : vector<32xf32>
    %259 = vector.multi_reduction <maximumf>, %258, %cst_88 [1] : vector<32x8xf32> to vector<32xf32>
    %260 = vector.shape_cast %259 : vector<32xf32> to vector<32x1xf32>
    %261 = vector.broadcast %260 : vector<32x1xf32> to vector<32x8xf32>
    %262 = arith.subf %258, %261 : vector<32x8xf32>
    %263 = math.exp %262 : vector<32x8xf32>
    %cst_89 = arith.constant dense<0.000000e+00> : vector<32xf32>
    %264 = vector.multi_reduction <add>, %263, %cst_89 [1] : vector<32x8xf32> to vector<32xf32>
    %265 = vector.shape_cast %264 : vector<32xf32> to vector<32x1xf32>
    %266 = tpu.reciprocal %265 {approx = true} : vector<32x1xf32> -> vector<32x1xf32>
    %267 = vector.broadcast %266 : vector<32x1xf32> to vector<32x8xf32>
    %268 = arith.mulf %263, %267 : vector<32x8xf32>
    %269 = arith.truncf %268 : vector<32x8xf32> to vector<32x8xbf16>
    %270 = vector.extract_strided_slice %269 {offsets = [0, 0], sizes = [8, 8], strides = [1, 1]} : vector<32x8xbf16> to vector<8x8xbf16>
    %271 = vector.extract_strided_slice %241 {offsets = [0, 0], sizes = [8, 8], strides = [1, 1]} : vector<8x32xbf16> to vector<8x8xbf16>
    %cst_90 = arith.constant dense<0.000000e+00> : vector<8x8xf32>
    %272 = tpu.matmul %270, %271, %cst_90 {dimension_numbers = #tpu.dot_dimension_numbers<[1], [0], [0], [1], [0, 0, 1, 1], [], []>} : vector<8x8xbf16>, vector<8x8xbf16>, vector<8x8xf32> -> vector<8x8xf32>
    %273 = vector.extract_strided_slice %269 {offsets = [8, 0], sizes = [8, 8], strides = [1, 1]} : vector<32x8xbf16> to vector<8x8xbf16>
    %274 = vector.extract_strided_slice %241 {offsets = [0, 8], sizes = [8, 8], strides = [1, 1]} : vector<8x32xbf16> to vector<8x8xbf16>
    %cst_91 = arith.constant dense<0.000000e+00> : vector<8x8xf32>
    %275 = tpu.matmul %273, %274, %cst_91 {dimension_numbers = #tpu.dot_dimension_numbers<[1], [0], [0], [1], [0, 0, 1, 1], [], []>} : vector<8x8xbf16>, vector<8x8xbf16>, vector<8x8xf32> -> vector<8x8xf32>
    %276 = vector.extract_strided_slice %269 {offsets = [16, 0], sizes = [8, 8], strides = [1, 1]} : vector<32x8xbf16> to vector<8x8xbf16>
    %277 = vector.extract_strided_slice %241 {offsets = [0, 16], sizes = [8, 8], strides = [1, 1]} : vector<8x32xbf16> to vector<8x8xbf16>
    %cst_92 = arith.constant dense<0.000000e+00> : vector<8x8xf32>
    %278 = tpu.matmul %276, %277, %cst_92 {dimension_numbers = #tpu.dot_dimension_numbers<[1], [0], [0], [1], [0, 0, 1, 1], [], []>} : vector<8x8xbf16>, vector<8x8xbf16>, vector<8x8xf32> -> vector<8x8xf32>
    %279 = vector.extract_strided_slice %269 {offsets = [24, 0], sizes = [8, 8], strides = [1, 1]} : vector<32x8xbf16> to vector<8x8xbf16>
    %280 = vector.extract_strided_slice %241 {offsets = [0, 24], sizes = [8, 8], strides = [1, 1]} : vector<8x32xbf16> to vector<8x8xbf16>
    %cst_93 = arith.constant dense<0.000000e+00> : vector<8x8xf32>
    %281 = tpu.matmul %279, %280, %cst_93 {dimension_numbers = #tpu.dot_dimension_numbers<[1], [0], [0], [1], [0, 0, 1, 1], [], []>} : vector<8x8xbf16>, vector<8x8xbf16>, vector<8x8xf32> -> vector<8x8xf32>
    %282 = tpu.concatenate %272, %275, %278, %281 in 1 : vector<8x8xf32>, vector<8x8xf32>, vector<8x8xf32>, vector<8x8xf32> -> vector<8x32xf32>
    %283 = arith.truncf %282 : vector<8x32xf32> to vector<8x32xbf16>
    %cst_94 = arith.constant dense<0.000000e+00> : vector<8x32xf32>
    %284 = tpu.matmul %283, %211, %cst_94 {dimension_numbers = #tpu.dot_dimension_numbers<[1], [0], [0], [1], [0, 0, 1, 1], [], []>} : vector<8x32xbf16>, vector<32x32xbf16>, vector<8x32xf32> -> vector<8x32xf32>
    %285 = arith.addf %207, %284 : vector<8x32xf32>
    %286 = arith.mulf %285, %285 : vector<8x32xf32>
    %cst_95 = arith.constant dense<0.000000e+00> : vector<8xf32>
    %287 = vector.multi_reduction <add>, %286, %cst_95 [1] : vector<8x32xf32> to vector<8xf32>
    %288 = vector.shape_cast %287 : vector<8xf32> to vector<8x1xf32>
    %cst_96 = arith.constant 3.200000e+01 : f32
    %289 = vector.broadcast %cst_96 : f32 to vector<8x1xf32>
    %290 = arith.divf %288, %289 : vector<8x1xf32>
    %cst_97 = arith.constant 9.99999997E-7 : f32
    %291 = vector.broadcast %cst_97 : f32 to vector<8x1xf32>
    %292 = arith.addf %290, %291 : vector<8x1xf32>
    %293 = math.rsqrt %292 : vector<8x1xf32>
    %294 = vector.broadcast %293 : vector<8x1xf32> to vector<8x32xf32>
    %295 = arith.mulf %285, %294 : vector<8x32xf32>
    %296 = arith.truncf %295 : vector<8x32xf32> to vector<8x32xbf16>
    %cst_98 = arith.constant dense<0.000000e+00> : vector<8x128xf32>
    %297 = tpu.matmul %296, %213, %cst_98 {dimension_numbers = #tpu.dot_dimension_numbers<[1], [0], [0], [1], [0, 0, 1, 1], [], []>} : vector<8x32xbf16>, vector<32x128xbf16>, vector<8x128xf32> -> vector<8x128xf32>
    %298 = vector.extract_strided_slice %297 {offsets = [0, 0], sizes = [8, 64], strides = [1, 1]} : vector<8x128xf32> to vector<8x64xf32>
    %299 = vector.extract_strided_slice %297 {offsets = [0, 64], sizes = [8, 64], strides = [1, 1]} : vector<8x128xf32> to vector<8x64xf32>
    %300 = arith.negf %298 : vector<8x64xf32>
    %301 = math.exp %300 : vector<8x64xf32>
    %cst_99 = arith.constant 1.000000e+00 : f32
    %302 = vector.broadcast %cst_99 : f32 to vector<8x64xf32>
    %303 = arith.addf %302, %301 : vector<8x64xf32>
    %304 = arith.divf %302, %303 : vector<8x64xf32>
    %305 = arith.mulf %298, %304 : vector<8x64xf32>
    %306 = arith.mulf %305, %299 : vector<8x64xf32>
    %307 = arith.truncf %306 : vector<8x64xf32> to vector<8x64xbf16>
    %cst_100 = arith.constant dense<0.000000e+00> : vector<8x32xf32>
    %308 = tpu.matmul %307, %215, %cst_100 {dimension_numbers = #tpu.dot_dimension_numbers<[1], [0], [0], [1], [0, 0, 1, 1], [], []>} : vector<8x64xbf16>, vector<64x32xbf16>, vector<8x32xf32> -> vector<8x32xf32>
    %309 = arith.addf %285, %308 : vector<8x32xf32>
    %c3 = arith.constant 3 : index
    %c0_101 = arith.constant 0 : index
    %c0_102 = arith.constant 0 : index
    %310 = vector.load %arg3[%c3, %c0_101, %c0_102] : memref<8x32x160xbf16, #tpu.memory_space<vmem>>, vector<1x32x160xbf16>
    %311 = vector.shape_cast %310 : vector<1x32x160xbf16> to vector<32x160xbf16>
    %c3_103 = arith.constant 3 : index
    %c0_104 = arith.constant 0 : index
    %c0_105 = arith.constant 0 : index
    %312 = vector.load %arg4[%c3_103, %c0_104, %c0_105] : memref<8x32x32xbf16, #tpu.memory_space<vmem>>, vector<1x32x32xbf16>
    %313 = vector.shape_cast %312 : vector<1x32x32xbf16> to vector<32x32xbf16>
    %c3_106 = arith.constant 3 : index
    %c0_107 = arith.constant 0 : index
    %c0_108 = arith.constant 0 : index
    %314 = vector.load %arg5[%c3_106, %c0_107, %c0_108] : memref<8x32x128xbf16, #tpu.memory_space<vmem>>, vector<1x32x128xbf16>
    %315 = vector.shape_cast %314 : vector<1x32x128xbf16> to vector<32x128xbf16>
    %c3_109 = arith.constant 3 : index
    %c0_110 = arith.constant 0 : index
    %c0_111 = arith.constant 0 : index
    %316 = vector.load %arg6[%c3_109, %c0_110, %c0_111] : memref<8x64x32xbf16, #tpu.memory_space<vmem>>, vector<1x64x32xbf16>
    %317 = vector.shape_cast %316 : vector<1x64x32xbf16> to vector<64x32xbf16>
    %318 = arith.mulf %309, %309 : vector<8x32xf32>
    %cst_112 = arith.constant dense<0.000000e+00> : vector<8xf32>
    %319 = vector.multi_reduction <add>, %318, %cst_112 [1] : vector<8x32xf32> to vector<8xf32>
    %320 = vector.shape_cast %319 : vector<8xf32> to vector<8x1xf32>
    %cst_113 = arith.constant 3.200000e+01 : f32
    %321 = vector.broadcast %cst_113 : f32 to vector<8x1xf32>
    %322 = arith.divf %320, %321 : vector<8x1xf32>
    %cst_114 = arith.constant 9.99999997E-7 : f32
    %323 = vector.broadcast %cst_114 : f32 to vector<8x1xf32>
    %324 = arith.addf %322, %323 : vector<8x1xf32>
    %325 = math.rsqrt %324 : vector<8x1xf32>
    %326 = vector.broadcast %325 : vector<8x1xf32> to vector<8x32xf32>
    %327 = arith.mulf %309, %326 : vector<8x32xf32>
    %328 = arith.truncf %327 : vector<8x32xf32> to vector<8x32xbf16>
    %cst_115 = arith.constant dense<0.000000e+00> : vector<8x160xf32>
    %329 = tpu.matmul %328, %311, %cst_115 {dimension_numbers = #tpu.dot_dimension_numbers<[1], [0], [0], [1], [0, 0, 1, 1], [], []>} : vector<8x32xbf16>, vector<32x160xbf16>, vector<8x160xf32> -> vector<8x160xf32>
    %330 = vector.extract_strided_slice %329 {offsets = [0, 0], sizes = [8, 32], strides = [1, 1]} : vector<8x160xf32> to vector<8x32xf32>
    %331 = vector.extract_strided_slice %329 {offsets = [0, 32], sizes = [8, 32], strides = [1, 1]} : vector<8x160xf32> to vector<8x32xf32>
    %332 = vector.extract_strided_slice %329 {offsets = [0, 64], sizes = [8, 32], strides = [1, 1]} : vector<8x160xf32> to vector<8x32xf32>
    %333 = vector.extract_strided_slice %329 {offsets = [0, 96], sizes = [8, 32], strides = [1, 1]} : vector<8x160xf32> to vector<8x32xf32>
    %334 = vector.extract_strided_slice %329 {offsets = [0, 128], sizes = [8, 32], strides = [1, 1]} : vector<8x160xf32> to vector<8x32xf32>
    %335 = arith.mulf %330, %0 : vector<8x32xf32>
    %336 = arith.mulf %333, %1 : vector<8x32xf32>
    %337 = arith.addf %335, %336 : vector<8x32xf32>
    %338 = arith.mulf %331, %0 : vector<8x32xf32>
    %339 = arith.mulf %334, %1 : vector<8x32xf32>
    %340 = arith.addf %338, %339 : vector<8x32xf32>
    %341 = arith.truncf %337 : vector<8x32xf32> to vector<8x32xbf16>
    %342 = arith.truncf %340 : vector<8x32xf32> to vector<8x32xbf16>
    %343 = arith.truncf %332 : vector<8x32xf32> to vector<8x32xbf16>
    %344 = vector.extract_strided_slice %341 {offsets = [0, 0], sizes = [8, 8], strides = [1, 1]} : vector<8x32xbf16> to vector<8x8xbf16>
    %345 = vector.extract_strided_slice %342 {offsets = [0, 0], sizes = [8, 8], strides = [1, 1]} : vector<8x32xbf16> to vector<8x8xbf16>
    %346 = tpu.transpose %345, [1, 0] : vector<8x8xbf16> -> vector<8x8xbf16>
    %cst_116 = arith.constant dense<0.000000e+00> : vector<8x8xf32>
    %347 = tpu.matmul %344, %346, %cst_116 {dimension_numbers = #tpu.dot_dimension_numbers<[1], [0], [0], [1], [0, 0, 1, 1], [], []>} : vector<8x8xbf16>, vector<8x8xbf16>, vector<8x8xf32> -> vector<8x8xf32>
    %348 = vector.extract_strided_slice %341 {offsets = [0, 8], sizes = [8, 8], strides = [1, 1]} : vector<8x32xbf16> to vector<8x8xbf16>
    %349 = vector.extract_strided_slice %342 {offsets = [0, 8], sizes = [8, 8], strides = [1, 1]} : vector<8x32xbf16> to vector<8x8xbf16>
    %350 = tpu.transpose %349, [1, 0] : vector<8x8xbf16> -> vector<8x8xbf16>
    %cst_117 = arith.constant dense<0.000000e+00> : vector<8x8xf32>
    %351 = tpu.matmul %348, %350, %cst_117 {dimension_numbers = #tpu.dot_dimension_numbers<[1], [0], [0], [1], [0, 0, 1, 1], [], []>} : vector<8x8xbf16>, vector<8x8xbf16>, vector<8x8xf32> -> vector<8x8xf32>
    %352 = vector.extract_strided_slice %341 {offsets = [0, 16], sizes = [8, 8], strides = [1, 1]} : vector<8x32xbf16> to vector<8x8xbf16>
    %353 = vector.extract_strided_slice %342 {offsets = [0, 16], sizes = [8, 8], strides = [1, 1]} : vector<8x32xbf16> to vector<8x8xbf16>
    %354 = tpu.transpose %353, [1, 0] : vector<8x8xbf16> -> vector<8x8xbf16>
    %cst_118 = arith.constant dense<0.000000e+00> : vector<8x8xf32>
    %355 = tpu.matmul %352, %354, %cst_118 {dimension_numbers = #tpu.dot_dimension_numbers<[1], [0], [0], [1], [0, 0, 1, 1], [], []>} : vector<8x8xbf16>, vector<8x8xbf16>, vector<8x8xf32> -> vector<8x8xf32>
    %356 = vector.extract_strided_slice %341 {offsets = [0, 24], sizes = [8, 8], strides = [1, 1]} : vector<8x32xbf16> to vector<8x8xbf16>
    %357 = vector.extract_strided_slice %342 {offsets = [0, 24], sizes = [8, 8], strides = [1, 1]} : vector<8x32xbf16> to vector<8x8xbf16>
    %358 = tpu.transpose %357, [1, 0] : vector<8x8xbf16> -> vector<8x8xbf16>
    %cst_119 = arith.constant dense<0.000000e+00> : vector<8x8xf32>
    %359 = tpu.matmul %356, %358, %cst_119 {dimension_numbers = #tpu.dot_dimension_numbers<[1], [0], [0], [1], [0, 0, 1, 1], [], []>} : vector<8x8xbf16>, vector<8x8xbf16>, vector<8x8xf32> -> vector<8x8xf32>
    %360 = tpu.concatenate %347, %351, %355, %359 in 0 : vector<8x8xf32>, vector<8x8xf32>, vector<8x8xf32>, vector<8x8xf32> -> vector<32x8xf32>
    %cst_120 = arith.constant dense<0xFF800000> : vector<32xf32>
    %361 = vector.multi_reduction <maximumf>, %360, %cst_120 [1] : vector<32x8xf32> to vector<32xf32>
    %362 = vector.shape_cast %361 : vector<32xf32> to vector<32x1xf32>
    %363 = vector.broadcast %362 : vector<32x1xf32> to vector<32x8xf32>
    %364 = arith.subf %360, %363 : vector<32x8xf32>
    %365 = math.exp %364 : vector<32x8xf32>
    %cst_121 = arith.constant dense<0.000000e+00> : vector<32xf32>
    %366 = vector.multi_reduction <add>, %365, %cst_121 [1] : vector<32x8xf32> to vector<32xf32>
    %367 = vector.shape_cast %366 : vector<32xf32> to vector<32x1xf32>
    %368 = tpu.reciprocal %367 {approx = true} : vector<32x1xf32> -> vector<32x1xf32>
    %369 = vector.broadcast %368 : vector<32x1xf32> to vector<32x8xf32>
    %370 = arith.mulf %365, %369 : vector<32x8xf32>
    %371 = arith.truncf %370 : vector<32x8xf32> to vector<32x8xbf16>
    %372 = vector.extract_strided_slice %371 {offsets = [0, 0], sizes = [8, 8], strides = [1, 1]} : vector<32x8xbf16> to vector<8x8xbf16>
    %373 = vector.extract_strided_slice %343 {offsets = [0, 0], sizes = [8, 8], strides = [1, 1]} : vector<8x32xbf16> to vector<8x8xbf16>
    %cst_122 = arith.constant dense<0.000000e+00> : vector<8x8xf32>
    %374 = tpu.matmul %372, %373, %cst_122 {dimension_numbers = #tpu.dot_dimension_numbers<[1], [0], [0], [1], [0, 0, 1, 1], [], []>} : vector<8x8xbf16>, vector<8x8xbf16>, vector<8x8xf32> -> vector<8x8xf32>
    %375 = vector.extract_strided_slice %371 {offsets = [8, 0], sizes = [8, 8], strides = [1, 1]} : vector<32x8xbf16> to vector<8x8xbf16>
    %376 = vector.extract_strided_slice %343 {offsets = [0, 8], sizes = [8, 8], strides = [1, 1]} : vector<8x32xbf16> to vector<8x8xbf16>
    %cst_123 = arith.constant dense<0.000000e+00> : vector<8x8xf32>
    %377 = tpu.matmul %375, %376, %cst_123 {dimension_numbers = #tpu.dot_dimension_numbers<[1], [0], [0], [1], [0, 0, 1, 1], [], []>} : vector<8x8xbf16>, vector<8x8xbf16>, vector<8x8xf32> -> vector<8x8xf32>
    %378 = vector.extract_strided_slice %371 {offsets = [16, 0], sizes = [8, 8], strides = [1, 1]} : vector<32x8xbf16> to vector<8x8xbf16>
    %379 = vector.extract_strided_slice %343 {offsets = [0, 16], sizes = [8, 8], strides = [1, 1]} : vector<8x32xbf16> to vector<8x8xbf16>
    %cst_124 = arith.constant dense<0.000000e+00> : vector<8x8xf32>
    %380 = tpu.matmul %378, %379, %cst_124 {dimension_numbers = #tpu.dot_dimension_numbers<[1], [0], [0], [1], [0, 0, 1, 1], [], []>} : vector<8x8xbf16>, vector<8x8xbf16>, vector<8x8xf32> -> vector<8x8xf32>
    %381 = vector.extract_strided_slice %371 {offsets = [24, 0], sizes = [8, 8], strides = [1, 1]} : vector<32x8xbf16> to vector<8x8xbf16>
    %382 = vector.extract_strided_slice %343 {offsets = [0, 24], sizes = [8, 8], strides = [1, 1]} : vector<8x32xbf16> to vector<8x8xbf16>
    %cst_125 = arith.constant dense<0.000000e+00> : vector<8x8xf32>
    %383 = tpu.matmul %381, %382, %cst_125 {dimension_numbers = #tpu.dot_dimension_numbers<[1], [0], [0], [1], [0, 0, 1, 1], [], []>} : vector<8x8xbf16>, vector<8x8xbf16>, vector<8x8xf32> -> vector<8x8xf32>
    %384 = tpu.concatenate %374, %377, %380, %383 in 1 : vector<8x8xf32>, vector<8x8xf32>, vector<8x8xf32>, vector<8x8xf32> -> vector<8x32xf32>
    %385 = arith.truncf %384 : vector<8x32xf32> to vector<8x32xbf16>
    %cst_126 = arith.constant dense<0.000000e+00> : vector<8x32xf32>
    %386 = tpu.matmul %385, %313, %cst_126 {dimension_numbers = #tpu.dot_dimension_numbers<[1], [0], [0], [1], [0, 0, 1, 1], [], []>} : vector<8x32xbf16>, vector<32x32xbf16>, vector<8x32xf32> -> vector<8x32xf32>
    %387 = arith.addf %309, %386 : vector<8x32xf32>
    %388 = arith.mulf %387, %387 : vector<8x32xf32>
    %cst_127 = arith.constant dense<0.000000e+00> : vector<8xf32>
    %389 = vector.multi_reduction <add>, %388, %cst_127 [1] : vector<8x32xf32> to vector<8xf32>
    %390 = vector.shape_cast %389 : vector<8xf32> to vector<8x1xf32>
    %cst_128 = arith.constant 3.200000e+01 : f32
    %391 = vector.broadcast %cst_128 : f32 to vector<8x1xf32>
    %392 = arith.divf %390, %391 : vector<8x1xf32>
    %cst_129 = arith.constant 9.99999997E-7 : f32
    %393 = vector.broadcast %cst_129 : f32 to vector<8x1xf32>
    %394 = arith.addf %392, %393 : vector<8x1xf32>
    %395 = math.rsqrt %394 : vector<8x1xf32>
    %396 = vector.broadcast %395 : vector<8x1xf32> to vector<8x32xf32>
    %397 = arith.mulf %387, %396 : vector<8x32xf32>
    %398 = arith.truncf %397 : vector<8x32xf32> to vector<8x32xbf16>
    %cst_130 = arith.constant dense<0.000000e+00> : vector<8x128xf32>
    %399 = tpu.matmul %398, %315, %cst_130 {dimension_numbers = #tpu.dot_dimension_numbers<[1], [0], [0], [1], [0, 0, 1, 1], [], []>} : vector<8x32xbf16>, vector<32x128xbf16>, vector<8x128xf32> -> vector<8x128xf32>
    %400 = vector.extract_strided_slice %399 {offsets = [0, 0], sizes = [8, 64], strides = [1, 1]} : vector<8x128xf32> to vector<8x64xf32>
    %401 = vector.extract_strided_slice %399 {offsets = [0, 64], sizes = [8, 64], strides = [1, 1]} : vector<8x128xf32> to vector<8x64xf32>
    %402 = arith.negf %400 : vector<8x64xf32>
    %403 = math.exp %402 : vector<8x64xf32>
    %cst_131 = arith.constant 1.000000e+00 : f32
    %404 = vector.broadcast %cst_131 : f32 to vector<8x64xf32>
    %405 = arith.addf %404, %403 : vector<8x64xf32>
    %406 = arith.divf %404, %405 : vector<8x64xf32>
    %407 = arith.mulf %400, %406 : vector<8x64xf32>
    %408 = arith.mulf %407, %401 : vector<8x64xf32>
    %409 = arith.truncf %408 : vector<8x64xf32> to vector<8x64xbf16>
    %cst_132 = arith.constant dense<0.000000e+00> : vector<8x32xf32>
    %410 = tpu.matmul %409, %317, %cst_132 {dimension_numbers = #tpu.dot_dimension_numbers<[1], [0], [0], [1], [0, 0, 1, 1], [], []>} : vector<8x64xbf16>, vector<64x32xbf16>, vector<8x32xf32> -> vector<8x32xf32>
    %411 = arith.addf %387, %410 : vector<8x32xf32>
    %c4 = arith.constant 4 : index
    %c0_133 = arith.constant 0 : index
    %c0_134 = arith.constant 0 : index
    %412 = vector.load %arg3[%c4, %c0_133, %c0_134] : memref<8x32x160xbf16, #tpu.memory_space<vmem>>, vector<1x32x160xbf16>
    %413 = vector.shape_cast %412 : vector<1x32x160xbf16> to vector<32x160xbf16>
    %c4_135 = arith.constant 4 : index
    %c0_136 = arith.constant 0 : index
    %c0_137 = arith.constant 0 : index
    %414 = vector.load %arg4[%c4_135, %c0_136, %c0_137] : memref<8x32x32xbf16, #tpu.memory_space<vmem>>, vector<1x32x32xbf16>
    %415 = vector.shape_cast %414 : vector<1x32x32xbf16> to vector<32x32xbf16>
    %c4_138 = arith.constant 4 : index
    %c0_139 = arith.constant 0 : index
    %c0_140 = arith.constant 0 : index
    %416 = vector.load %arg5[%c4_138, %c0_139, %c0_140] : memref<8x32x128xbf16, #tpu.memory_space<vmem>>, vector<1x32x128xbf16>
    %417 = vector.shape_cast %416 : vector<1x32x128xbf16> to vector<32x128xbf16>
    %c4_141 = arith.constant 4 : index
    %c0_142 = arith.constant 0 : index
    %c0_143 = arith.constant 0 : index
    %418 = vector.load %arg6[%c4_141, %c0_142, %c0_143] : memref<8x64x32xbf16, #tpu.memory_space<vmem>>, vector<1x64x32xbf16>
    %419 = vector.shape_cast %418 : vector<1x64x32xbf16> to vector<64x32xbf16>
    %420 = arith.mulf %411, %411 : vector<8x32xf32>
    %cst_144 = arith.constant dense<0.000000e+00> : vector<8xf32>
    %421 = vector.multi_reduction <add>, %420, %cst_144 [1] : vector<8x32xf32> to vector<8xf32>
    %422 = vector.shape_cast %421 : vector<8xf32> to vector<8x1xf32>
    %cst_145 = arith.constant 3.200000e+01 : f32
    %423 = vector.broadcast %cst_145 : f32 to vector<8x1xf32>
    %424 = arith.divf %422, %423 : vector<8x1xf32>
    %cst_146 = arith.constant 9.99999997E-7 : f32
    %425 = vector.broadcast %cst_146 : f32 to vector<8x1xf32>
    %426 = arith.addf %424, %425 : vector<8x1xf32>
    %427 = math.rsqrt %426 : vector<8x1xf32>
    %428 = vector.broadcast %427 : vector<8x1xf32> to vector<8x32xf32>
    %429 = arith.mulf %411, %428 : vector<8x32xf32>
    %430 = arith.truncf %429 : vector<8x32xf32> to vector<8x32xbf16>
    %cst_147 = arith.constant dense<0.000000e+00> : vector<8x160xf32>
    %431 = tpu.matmul %430, %413, %cst_147 {dimension_numbers = #tpu.dot_dimension_numbers<[1], [0], [0], [1], [0, 0, 1, 1], [], []>} : vector<8x32xbf16>, vector<32x160xbf16>, vector<8x160xf32> -> vector<8x160xf32>
    %432 = vector.extract_strided_slice %431 {offsets = [0, 0], sizes = [8, 32], strides = [1, 1]} : vector<8x160xf32> to vector<8x32xf32>
    %433 = vector.extract_strided_slice %431 {offsets = [0, 32], sizes = [8, 32], strides = [1, 1]} : vector<8x160xf32> to vector<8x32xf32>
    %434 = vector.extract_strided_slice %431 {offsets = [0, 64], sizes = [8, 32], strides = [1, 1]} : vector<8x160xf32> to vector<8x32xf32>
    %435 = vector.extract_strided_slice %431 {offsets = [0, 96], sizes = [8, 32], strides = [1, 1]} : vector<8x160xf32> to vector<8x32xf32>
    %436 = vector.extract_strided_slice %431 {offsets = [0, 128], sizes = [8, 32], strides = [1, 1]} : vector<8x160xf32> to vector<8x32xf32>
    %437 = arith.mulf %432, %0 : vector<8x32xf32>
    %438 = arith.mulf %435, %1 : vector<8x32xf32>
    %439 = arith.addf %437, %438 : vector<8x32xf32>
    %440 = arith.mulf %433, %0 : vector<8x32xf32>
    %441 = arith.mulf %436, %1 : vector<8x32xf32>
    %442 = arith.addf %440, %441 : vector<8x32xf32>
    %443 = arith.truncf %439 : vector<8x32xf32> to vector<8x32xbf16>
    %444 = arith.truncf %442 : vector<8x32xf32> to vector<8x32xbf16>
    %445 = arith.truncf %434 : vector<8x32xf32> to vector<8x32xbf16>
    %446 = vector.extract_strided_slice %443 {offsets = [0, 0], sizes = [8, 8], strides = [1, 1]} : vector<8x32xbf16> to vector<8x8xbf16>
    %447 = vector.extract_strided_slice %444 {offsets = [0, 0], sizes = [8, 8], strides = [1, 1]} : vector<8x32xbf16> to vector<8x8xbf16>
    %448 = tpu.transpose %447, [1, 0] : vector<8x8xbf16> -> vector<8x8xbf16>
    %cst_148 = arith.constant dense<0.000000e+00> : vector<8x8xf32>
    %449 = tpu.matmul %446, %448, %cst_148 {dimension_numbers = #tpu.dot_dimension_numbers<[1], [0], [0], [1], [0, 0, 1, 1], [], []>} : vector<8x8xbf16>, vector<8x8xbf16>, vector<8x8xf32> -> vector<8x8xf32>
    %450 = vector.extract_strided_slice %443 {offsets = [0, 8], sizes = [8, 8], strides = [1, 1]} : vector<8x32xbf16> to vector<8x8xbf16>
    %451 = vector.extract_strided_slice %444 {offsets = [0, 8], sizes = [8, 8], strides = [1, 1]} : vector<8x32xbf16> to vector<8x8xbf16>
    %452 = tpu.transpose %451, [1, 0] : vector<8x8xbf16> -> vector<8x8xbf16>
    %cst_149 = arith.constant dense<0.000000e+00> : vector<8x8xf32>
    %453 = tpu.matmul %450, %452, %cst_149 {dimension_numbers = #tpu.dot_dimension_numbers<[1], [0], [0], [1], [0, 0, 1, 1], [], []>} : vector<8x8xbf16>, vector<8x8xbf16>, vector<8x8xf32> -> vector<8x8xf32>
    %454 = vector.extract_strided_slice %443 {offsets = [0, 16], sizes = [8, 8], strides = [1, 1]} : vector<8x32xbf16> to vector<8x8xbf16>
    %455 = vector.extract_strided_slice %444 {offsets = [0, 16], sizes = [8, 8], strides = [1, 1]} : vector<8x32xbf16> to vector<8x8xbf16>
    %456 = tpu.transpose %455, [1, 0] : vector<8x8xbf16> -> vector<8x8xbf16>
    %cst_150 = arith.constant dense<0.000000e+00> : vector<8x8xf32>
    %457 = tpu.matmul %454, %456, %cst_150 {dimension_numbers = #tpu.dot_dimension_numbers<[1], [0], [0], [1], [0, 0, 1, 1], [], []>} : vector<8x8xbf16>, vector<8x8xbf16>, vector<8x8xf32> -> vector<8x8xf32>
    %458 = vector.extract_strided_slice %443 {offsets = [0, 24], sizes = [8, 8], strides = [1, 1]} : vector<8x32xbf16> to vector<8x8xbf16>
    %459 = vector.extract_strided_slice %444 {offsets = [0, 24], sizes = [8, 8], strides = [1, 1]} : vector<8x32xbf16> to vector<8x8xbf16>
    %460 = tpu.transpose %459, [1, 0] : vector<8x8xbf16> -> vector<8x8xbf16>
    %cst_151 = arith.constant dense<0.000000e+00> : vector<8x8xf32>
    %461 = tpu.matmul %458, %460, %cst_151 {dimension_numbers = #tpu.dot_dimension_numbers<[1], [0], [0], [1], [0, 0, 1, 1], [], []>} : vector<8x8xbf16>, vector<8x8xbf16>, vector<8x8xf32> -> vector<8x8xf32>
    %462 = tpu.concatenate %449, %453, %457, %461 in 0 : vector<8x8xf32>, vector<8x8xf32>, vector<8x8xf32>, vector<8x8xf32> -> vector<32x8xf32>
    %cst_152 = arith.constant dense<0xFF800000> : vector<32xf32>
    %463 = vector.multi_reduction <maximumf>, %462, %cst_152 [1] : vector<32x8xf32> to vector<32xf32>
    %464 = vector.shape_cast %463 : vector<32xf32> to vector<32x1xf32>
    %465 = vector.broadcast %464 : vector<32x1xf32> to vector<32x8xf32>
    %466 = arith.subf %462, %465 : vector<32x8xf32>
    %467 = math.exp %466 : vector<32x8xf32>
    %cst_153 = arith.constant dense<0.000000e+00> : vector<32xf32>
    %468 = vector.multi_reduction <add>, %467, %cst_153 [1] : vector<32x8xf32> to vector<32xf32>
    %469 = vector.shape_cast %468 : vector<32xf32> to vector<32x1xf32>
    %470 = tpu.reciprocal %469 {approx = true} : vector<32x1xf32> -> vector<32x1xf32>
    %471 = vector.broadcast %470 : vector<32x1xf32> to vector<32x8xf32>
    %472 = arith.mulf %467, %471 : vector<32x8xf32>
    %473 = arith.truncf %472 : vector<32x8xf32> to vector<32x8xbf16>
    %474 = vector.extract_strided_slice %473 {offsets = [0, 0], sizes = [8, 8], strides = [1, 1]} : vector<32x8xbf16> to vector<8x8xbf16>
    %475 = vector.extract_strided_slice %445 {offsets = [0, 0], sizes = [8, 8], strides = [1, 1]} : vector<8x32xbf16> to vector<8x8xbf16>
    %cst_154 = arith.constant dense<0.000000e+00> : vector<8x8xf32>
    %476 = tpu.matmul %474, %475, %cst_154 {dimension_numbers = #tpu.dot_dimension_numbers<[1], [0], [0], [1], [0, 0, 1, 1], [], []>} : vector<8x8xbf16>, vector<8x8xbf16>, vector<8x8xf32> -> vector<8x8xf32>
    %477 = vector.extract_strided_slice %473 {offsets = [8, 0], sizes = [8, 8], strides = [1, 1]} : vector<32x8xbf16> to vector<8x8xbf16>
    %478 = vector.extract_strided_slice %445 {offsets = [0, 8], sizes = [8, 8], strides = [1, 1]} : vector<8x32xbf16> to vector<8x8xbf16>
    %cst_155 = arith.constant dense<0.000000e+00> : vector<8x8xf32>
    %479 = tpu.matmul %477, %478, %cst_155 {dimension_numbers = #tpu.dot_dimension_numbers<[1], [0], [0], [1], [0, 0, 1, 1], [], []>} : vector<8x8xbf16>, vector<8x8xbf16>, vector<8x8xf32> -> vector<8x8xf32>
    %480 = vector.extract_strided_slice %473 {offsets = [16, 0], sizes = [8, 8], strides = [1, 1]} : vector<32x8xbf16> to vector<8x8xbf16>
    %481 = vector.extract_strided_slice %445 {offsets = [0, 16], sizes = [8, 8], strides = [1, 1]} : vector<8x32xbf16> to vector<8x8xbf16>
    %cst_156 = arith.constant dense<0.000000e+00> : vector<8x8xf32>
    %482 = tpu.matmul %480, %481, %cst_156 {dimension_numbers = #tpu.dot_dimension_numbers<[1], [0], [0], [1], [0, 0, 1, 1], [], []>} : vector<8x8xbf16>, vector<8x8xbf16>, vector<8x8xf32> -> vector<8x8xf32>
    %483 = vector.extract_strided_slice %473 {offsets = [24, 0], sizes = [8, 8], strides = [1, 1]} : vector<32x8xbf16> to vector<8x8xbf16>
    %484 = vector.extract_strided_slice %445 {offsets = [0, 24], sizes = [8, 8], strides = [1, 1]} : vector<8x32xbf16> to vector<8x8xbf16>
    %cst_157 = arith.constant dense<0.000000e+00> : vector<8x8xf32>
    %485 = tpu.matmul %483, %484, %cst_157 {dimension_numbers = #tpu.dot_dimension_numbers<[1], [0], [0], [1], [0, 0, 1, 1], [], []>} : vector<8x8xbf16>, vector<8x8xbf16>, vector<8x8xf32> -> vector<8x8xf32>
    %486 = tpu.concatenate %476, %479, %482, %485 in 1 : vector<8x8xf32>, vector<8x8xf32>, vector<8x8xf32>, vector<8x8xf32> -> vector<8x32xf32>
    %487 = arith.truncf %486 : vector<8x32xf32> to vector<8x32xbf16>
    %cst_158 = arith.constant dense<0.000000e+00> : vector<8x32xf32>
    %488 = tpu.matmul %487, %415, %cst_158 {dimension_numbers = #tpu.dot_dimension_numbers<[1], [0], [0], [1], [0, 0, 1, 1], [], []>} : vector<8x32xbf16>, vector<32x32xbf16>, vector<8x32xf32> -> vector<8x32xf32>
    %489 = arith.addf %411, %488 : vector<8x32xf32>
    %490 = arith.mulf %489, %489 : vector<8x32xf32>
    %cst_159 = arith.constant dense<0.000000e+00> : vector<8xf32>
    %491 = vector.multi_reduction <add>, %490, %cst_159 [1] : vector<8x32xf32> to vector<8xf32>
    %492 = vector.shape_cast %491 : vector<8xf32> to vector<8x1xf32>
    %cst_160 = arith.constant 3.200000e+01 : f32
    %493 = vector.broadcast %cst_160 : f32 to vector<8x1xf32>
    %494 = arith.divf %492, %493 : vector<8x1xf32>
    %cst_161 = arith.constant 9.99999997E-7 : f32
    %495 = vector.broadcast %cst_161 : f32 to vector<8x1xf32>
    %496 = arith.addf %494, %495 : vector<8x1xf32>
    %497 = math.rsqrt %496 : vector<8x1xf32>
    %498 = vector.broadcast %497 : vector<8x1xf32> to vector<8x32xf32>
    %499 = arith.mulf %489, %498 : vector<8x32xf32>
    %500 = arith.truncf %499 : vector<8x32xf32> to vector<8x32xbf16>
    %cst_162 = arith.constant dense<0.000000e+00> : vector<8x128xf32>
    %501 = tpu.matmul %500, %417, %cst_162 {dimension_numbers = #tpu.dot_dimension_numbers<[1], [0], [0], [1], [0, 0, 1, 1], [], []>} : vector<8x32xbf16>, vector<32x128xbf16>, vector<8x128xf32> -> vector<8x128xf32>
    %502 = vector.extract_strided_slice %501 {offsets = [0, 0], sizes = [8, 64], strides = [1, 1]} : vector<8x128xf32> to vector<8x64xf32>
    %503 = vector.extract_strided_slice %501 {offsets = [0, 64], sizes = [8, 64], strides = [1, 1]} : vector<8x128xf32> to vector<8x64xf32>
    %504 = arith.negf %502 : vector<8x64xf32>
    %505 = math.exp %504 : vector<8x64xf32>
    %cst_163 = arith.constant 1.000000e+00 : f32
    %506 = vector.broadcast %cst_163 : f32 to vector<8x64xf32>
    %507 = arith.addf %506, %505 : vector<8x64xf32>
    %508 = arith.divf %506, %507 : vector<8x64xf32>
    %509 = arith.mulf %502, %508 : vector<8x64xf32>
    %510 = arith.mulf %509, %503 : vector<8x64xf32>
    %511 = arith.truncf %510 : vector<8x64xf32> to vector<8x64xbf16>
    %cst_164 = arith.constant dense<0.000000e+00> : vector<8x32xf32>
    %512 = tpu.matmul %511, %419, %cst_164 {dimension_numbers = #tpu.dot_dimension_numbers<[1], [0], [0], [1], [0, 0, 1, 1], [], []>} : vector<8x64xbf16>, vector<64x32xbf16>, vector<8x32xf32> -> vector<8x32xf32>
    %513 = arith.addf %489, %512 : vector<8x32xf32>
    %c5 = arith.constant 5 : index
    %c0_165 = arith.constant 0 : index
    %c0_166 = arith.constant 0 : index
    %514 = vector.load %arg3[%c5, %c0_165, %c0_166] : memref<8x32x160xbf16, #tpu.memory_space<vmem>>, vector<1x32x160xbf16>
    %515 = vector.shape_cast %514 : vector<1x32x160xbf16> to vector<32x160xbf16>
    %c5_167 = arith.constant 5 : index
    %c0_168 = arith.constant 0 : index
    %c0_169 = arith.constant 0 : index
    %516 = vector.load %arg4[%c5_167, %c0_168, %c0_169] : memref<8x32x32xbf16, #tpu.memory_space<vmem>>, vector<1x32x32xbf16>
    %517 = vector.shape_cast %516 : vector<1x32x32xbf16> to vector<32x32xbf16>
    %c5_170 = arith.constant 5 : index
    %c0_171 = arith.constant 0 : index
    %c0_172 = arith.constant 0 : index
    %518 = vector.load %arg5[%c5_170, %c0_171, %c0_172] : memref<8x32x128xbf16, #tpu.memory_space<vmem>>, vector<1x32x128xbf16>
    %519 = vector.shape_cast %518 : vector<1x32x128xbf16> to vector<32x128xbf16>
    %c5_173 = arith.constant 5 : index
    %c0_174 = arith.constant 0 : index
    %c0_175 = arith.constant 0 : index
    %520 = vector.load %arg6[%c5_173, %c0_174, %c0_175] : memref<8x64x32xbf16, #tpu.memory_space<vmem>>, vector<1x64x32xbf16>
    %521 = vector.shape_cast %520 : vector<1x64x32xbf16> to vector<64x32xbf16>
    %522 = arith.mulf %513, %513 : vector<8x32xf32>
    %cst_176 = arith.constant dense<0.000000e+00> : vector<8xf32>
    %523 = vector.multi_reduction <add>, %522, %cst_176 [1] : vector<8x32xf32> to vector<8xf32>
    %524 = vector.shape_cast %523 : vector<8xf32> to vector<8x1xf32>
    %cst_177 = arith.constant 3.200000e+01 : f32
    %525 = vector.broadcast %cst_177 : f32 to vector<8x1xf32>
    %526 = arith.divf %524, %525 : vector<8x1xf32>
    %cst_178 = arith.constant 9.99999997E-7 : f32
    %527 = vector.broadcast %cst_178 : f32 to vector<8x1xf32>
    %528 = arith.addf %526, %527 : vector<8x1xf32>
    %529 = math.rsqrt %528 : vector<8x1xf32>
    %530 = vector.broadcast %529 : vector<8x1xf32> to vector<8x32xf32>
    %531 = arith.mulf %513, %530 : vector<8x32xf32>
    %532 = arith.truncf %531 : vector<8x32xf32> to vector<8x32xbf16>
    %cst_179 = arith.constant dense<0.000000e+00> : vector<8x160xf32>
    %533 = tpu.matmul %532, %515, %cst_179 {dimension_numbers = #tpu.dot_dimension_numbers<[1], [0], [0], [1], [0, 0, 1, 1], [], []>} : vector<8x32xbf16>, vector<32x160xbf16>, vector<8x160xf32> -> vector<8x160xf32>
    %534 = vector.extract_strided_slice %533 {offsets = [0, 0], sizes = [8, 32], strides = [1, 1]} : vector<8x160xf32> to vector<8x32xf32>
    %535 = vector.extract_strided_slice %533 {offsets = [0, 32], sizes = [8, 32], strides = [1, 1]} : vector<8x160xf32> to vector<8x32xf32>
    %536 = vector.extract_strided_slice %533 {offsets = [0, 64], sizes = [8, 32], strides = [1, 1]} : vector<8x160xf32> to vector<8x32xf32>
    %537 = vector.extract_strided_slice %533 {offsets = [0, 96], sizes = [8, 32], strides = [1, 1]} : vector<8x160xf32> to vector<8x32xf32>
    %538 = vector.extract_strided_slice %533 {offsets = [0, 128], sizes = [8, 32], strides = [1, 1]} : vector<8x160xf32> to vector<8x32xf32>
    %539 = arith.mulf %534, %0 : vector<8x32xf32>
    %540 = arith.mulf %537, %1 : vector<8x32xf32>
    %541 = arith.addf %539, %540 : vector<8x32xf32>
    %542 = arith.mulf %535, %0 : vector<8x32xf32>
    %543 = arith.mulf %538, %1 : vector<8x32xf32>
    %544 = arith.addf %542, %543 : vector<8x32xf32>
    %545 = arith.truncf %541 : vector<8x32xf32> to vector<8x32xbf16>
    %546 = arith.truncf %544 : vector<8x32xf32> to vector<8x32xbf16>
    %547 = arith.truncf %536 : vector<8x32xf32> to vector<8x32xbf16>
    %548 = vector.extract_strided_slice %545 {offsets = [0, 0], sizes = [8, 8], strides = [1, 1]} : vector<8x32xbf16> to vector<8x8xbf16>
    %549 = vector.extract_strided_slice %546 {offsets = [0, 0], sizes = [8, 8], strides = [1, 1]} : vector<8x32xbf16> to vector<8x8xbf16>
    %550 = tpu.transpose %549, [1, 0] : vector<8x8xbf16> -> vector<8x8xbf16>
    %cst_180 = arith.constant dense<0.000000e+00> : vector<8x8xf32>
    %551 = tpu.matmul %548, %550, %cst_180 {dimension_numbers = #tpu.dot_dimension_numbers<[1], [0], [0], [1], [0, 0, 1, 1], [], []>} : vector<8x8xbf16>, vector<8x8xbf16>, vector<8x8xf32> -> vector<8x8xf32>
    %552 = vector.extract_strided_slice %545 {offsets = [0, 8], sizes = [8, 8], strides = [1, 1]} : vector<8x32xbf16> to vector<8x8xbf16>
    %553 = vector.extract_strided_slice %546 {offsets = [0, 8], sizes = [8, 8], strides = [1, 1]} : vector<8x32xbf16> to vector<8x8xbf16>
    %554 = tpu.transpose %553, [1, 0] : vector<8x8xbf16> -> vector<8x8xbf16>
    %cst_181 = arith.constant dense<0.000000e+00> : vector<8x8xf32>
    %555 = tpu.matmul %552, %554, %cst_181 {dimension_numbers = #tpu.dot_dimension_numbers<[1], [0], [0], [1], [0, 0, 1, 1], [], []>} : vector<8x8xbf16>, vector<8x8xbf16>, vector<8x8xf32> -> vector<8x8xf32>
    %556 = vector.extract_strided_slice %545 {offsets = [0, 16], sizes = [8, 8], strides = [1, 1]} : vector<8x32xbf16> to vector<8x8xbf16>
    %557 = vector.extract_strided_slice %546 {offsets = [0, 16], sizes = [8, 8], strides = [1, 1]} : vector<8x32xbf16> to vector<8x8xbf16>
    %558 = tpu.transpose %557, [1, 0] : vector<8x8xbf16> -> vector<8x8xbf16>
    %cst_182 = arith.constant dense<0.000000e+00> : vector<8x8xf32>
    %559 = tpu.matmul %556, %558, %cst_182 {dimension_numbers = #tpu.dot_dimension_numbers<[1], [0], [0], [1], [0, 0, 1, 1], [], []>} : vector<8x8xbf16>, vector<8x8xbf16>, vector<8x8xf32> -> vector<8x8xf32>
    %560 = vector.extract_strided_slice %545 {offsets = [0, 24], sizes = [8, 8], strides = [1, 1]} : vector<8x32xbf16> to vector<8x8xbf16>
    %561 = vector.extract_strided_slice %546 {offsets = [0, 24], sizes = [8, 8], strides = [1, 1]} : vector<8x32xbf16> to vector<8x8xbf16>
    %562 = tpu.transpose %561, [1, 0] : vector<8x8xbf16> -> vector<8x8xbf16>
    %cst_183 = arith.constant dense<0.000000e+00> : vector<8x8xf32>
    %563 = tpu.matmul %560, %562, %cst_183 {dimension_numbers = #tpu.dot_dimension_numbers<[1], [0], [0], [1], [0, 0, 1, 1], [], []>} : vector<8x8xbf16>, vector<8x8xbf16>, vector<8x8xf32> -> vector<8x8xf32>
    %564 = tpu.concatenate %551, %555, %559, %563 in 0 : vector<8x8xf32>, vector<8x8xf32>, vector<8x8xf32>, vector<8x8xf32> -> vector<32x8xf32>
    %cst_184 = arith.constant dense<0xFF800000> : vector<32xf32>
    %565 = vector.multi_reduction <maximumf>, %564, %cst_184 [1] : vector<32x8xf32> to vector<32xf32>
    %566 = vector.shape_cast %565 : vector<32xf32> to vector<32x1xf32>
    %567 = vector.broadcast %566 : vector<32x1xf32> to vector<32x8xf32>
    %568 = arith.subf %564, %567 : vector<32x8xf32>
    %569 = math.exp %568 : vector<32x8xf32>
    %cst_185 = arith.constant dense<0.000000e+00> : vector<32xf32>
    %570 = vector.multi_reduction <add>, %569, %cst_185 [1] : vector<32x8xf32> to vector<32xf32>
    %571 = vector.shape_cast %570 : vector<32xf32> to vector<32x1xf32>
    %572 = tpu.reciprocal %571 {approx = true} : vector<32x1xf32> -> vector<32x1xf32>
    %573 = vector.broadcast %572 : vector<32x1xf32> to vector<32x8xf32>
    %574 = arith.mulf %569, %573 : vector<32x8xf32>
    %575 = arith.truncf %574 : vector<32x8xf32> to vector<32x8xbf16>
    %576 = vector.extract_strided_slice %575 {offsets = [0, 0], sizes = [8, 8], strides = [1, 1]} : vector<32x8xbf16> to vector<8x8xbf16>
    %577 = vector.extract_strided_slice %547 {offsets = [0, 0], sizes = [8, 8], strides = [1, 1]} : vector<8x32xbf16> to vector<8x8xbf16>
    %cst_186 = arith.constant dense<0.000000e+00> : vector<8x8xf32>
    %578 = tpu.matmul %576, %577, %cst_186 {dimension_numbers = #tpu.dot_dimension_numbers<[1], [0], [0], [1], [0, 0, 1, 1], [], []>} : vector<8x8xbf16>, vector<8x8xbf16>, vector<8x8xf32> -> vector<8x8xf32>
    %579 = vector.extract_strided_slice %575 {offsets = [8, 0], sizes = [8, 8], strides = [1, 1]} : vector<32x8xbf16> to vector<8x8xbf16>
    %580 = vector.extract_strided_slice %547 {offsets = [0, 8], sizes = [8, 8], strides = [1, 1]} : vector<8x32xbf16> to vector<8x8xbf16>
    %cst_187 = arith.constant dense<0.000000e+00> : vector<8x8xf32>
    %581 = tpu.matmul %579, %580, %cst_187 {dimension_numbers = #tpu.dot_dimension_numbers<[1], [0], [0], [1], [0, 0, 1, 1], [], []>} : vector<8x8xbf16>, vector<8x8xbf16>, vector<8x8xf32> -> vector<8x8xf32>
    %582 = vector.extract_strided_slice %575 {offsets = [16, 0], sizes = [8, 8], strides = [1, 1]} : vector<32x8xbf16> to vector<8x8xbf16>
    %583 = vector.extract_strided_slice %547 {offsets = [0, 16], sizes = [8, 8], strides = [1, 1]} : vector<8x32xbf16> to vector<8x8xbf16>
    %cst_188 = arith.constant dense<0.000000e+00> : vector<8x8xf32>
    %584 = tpu.matmul %582, %583, %cst_188 {dimension_numbers = #tpu.dot_dimension_numbers<[1], [0], [0], [1], [0, 0, 1, 1], [], []>} : vector<8x8xbf16>, vector<8x8xbf16>, vector<8x8xf32> -> vector<8x8xf32>
    %585 = vector.extract_strided_slice %575 {offsets = [24, 0], sizes = [8, 8], strides = [1, 1]} : vector<32x8xbf16> to vector<8x8xbf16>
    %586 = vector.extract_strided_slice %547 {offsets = [0, 24], sizes = [8, 8], strides = [1, 1]} : vector<8x32xbf16> to vector<8x8xbf16>
    %cst_189 = arith.constant dense<0.000000e+00> : vector<8x8xf32>
    %587 = tpu.matmul %585, %586, %cst_189 {dimension_numbers = #tpu.dot_dimension_numbers<[1], [0], [0], [1], [0, 0, 1, 1], [], []>} : vector<8x8xbf16>, vector<8x8xbf16>, vector<8x8xf32> -> vector<8x8xf32>
    %588 = tpu.concatenate %578, %581, %584, %587 in 1 : vector<8x8xf32>, vector<8x8xf32>, vector<8x8xf32>, vector<8x8xf32> -> vector<8x32xf32>
    %589 = arith.truncf %588 : vector<8x32xf32> to vector<8x32xbf16>
    %cst_190 = arith.constant dense<0.000000e+00> : vector<8x32xf32>
    %590 = tpu.matmul %589, %517, %cst_190 {dimension_numbers = #tpu.dot_dimension_numbers<[1], [0], [0], [1], [0, 0, 1, 1], [], []>} : vector<8x32xbf16>, vector<32x32xbf16>, vector<8x32xf32> -> vector<8x32xf32>
    %591 = arith.addf %513, %590 : vector<8x32xf32>
    %592 = arith.mulf %591, %591 : vector<8x32xf32>
    %cst_191 = arith.constant dense<0.000000e+00> : vector<8xf32>
    %593 = vector.multi_reduction <add>, %592, %cst_191 [1] : vector<8x32xf32> to vector<8xf32>
    %594 = vector.shape_cast %593 : vector<8xf32> to vector<8x1xf32>
    %cst_192 = arith.constant 3.200000e+01 : f32
    %595 = vector.broadcast %cst_192 : f32 to vector<8x1xf32>
    %596 = arith.divf %594, %595 : vector<8x1xf32>
    %cst_193 = arith.constant 9.99999997E-7 : f32
    %597 = vector.broadcast %cst_193 : f32 to vector<8x1xf32>
    %598 = arith.addf %596, %597 : vector<8x1xf32>
    %599 = math.rsqrt %598 : vector<8x1xf32>
    %600 = vector.broadcast %599 : vector<8x1xf32> to vector<8x32xf32>
    %601 = arith.mulf %591, %600 : vector<8x32xf32>
    %602 = arith.truncf %601 : vector<8x32xf32> to vector<8x32xbf16>
    %cst_194 = arith.constant dense<0.000000e+00> : vector<8x128xf32>
    %603 = tpu.matmul %602, %519, %cst_194 {dimension_numbers = #tpu.dot_dimension_numbers<[1], [0], [0], [1], [0, 0, 1, 1], [], []>} : vector<8x32xbf16>, vector<32x128xbf16>, vector<8x128xf32> -> vector<8x128xf32>
    %604 = vector.extract_strided_slice %603 {offsets = [0, 0], sizes = [8, 64], strides = [1, 1]} : vector<8x128xf32> to vector<8x64xf32>
    %605 = vector.extract_strided_slice %603 {offsets = [0, 64], sizes = [8, 64], strides = [1, 1]} : vector<8x128xf32> to vector<8x64xf32>
    %606 = arith.negf %604 : vector<8x64xf32>
    %607 = math.exp %606 : vector<8x64xf32>
    %cst_195 = arith.constant 1.000000e+00 : f32
    %608 = vector.broadcast %cst_195 : f32 to vector<8x64xf32>
    %609 = arith.addf %608, %607 : vector<8x64xf32>
    %610 = arith.divf %608, %609 : vector<8x64xf32>
    %611 = arith.mulf %604, %610 : vector<8x64xf32>
    %612 = arith.mulf %611, %605 : vector<8x64xf32>
    %613 = arith.truncf %612 : vector<8x64xf32> to vector<8x64xbf16>
    %cst_196 = arith.constant dense<0.000000e+00> : vector<8x32xf32>
    %614 = tpu.matmul %613, %521, %cst_196 {dimension_numbers = #tpu.dot_dimension_numbers<[1], [0], [0], [1], [0, 0, 1, 1], [], []>} : vector<8x64xbf16>, vector<64x32xbf16>, vector<8x32xf32> -> vector<8x32xf32>
    %615 = arith.addf %591, %614 : vector<8x32xf32>
    %c6 = arith.constant 6 : index
    %c0_197 = arith.constant 0 : index
    %c0_198 = arith.constant 0 : index
    %616 = vector.load %arg3[%c6, %c0_197, %c0_198] : memref<8x32x160xbf16, #tpu.memory_space<vmem>>, vector<1x32x160xbf16>
    %617 = vector.shape_cast %616 : vector<1x32x160xbf16> to vector<32x160xbf16>
    %c6_199 = arith.constant 6 : index
    %c0_200 = arith.constant 0 : index
    %c0_201 = arith.constant 0 : index
    %618 = vector.load %arg4[%c6_199, %c0_200, %c0_201] : memref<8x32x32xbf16, #tpu.memory_space<vmem>>, vector<1x32x32xbf16>
    %619 = vector.shape_cast %618 : vector<1x32x32xbf16> to vector<32x32xbf16>
    %c6_202 = arith.constant 6 : index
    %c0_203 = arith.constant 0 : index
    %c0_204 = arith.constant 0 : index
    %620 = vector.load %arg5[%c6_202, %c0_203, %c0_204] : memref<8x32x128xbf16, #tpu.memory_space<vmem>>, vector<1x32x128xbf16>
    %621 = vector.shape_cast %620 : vector<1x32x128xbf16> to vector<32x128xbf16>
    %c6_205 = arith.constant 6 : index
    %c0_206 = arith.constant 0 : index
    %c0_207 = arith.constant 0 : index
    %622 = vector.load %arg6[%c6_205, %c0_206, %c0_207] : memref<8x64x32xbf16, #tpu.memory_space<vmem>>, vector<1x64x32xbf16>
    %623 = vector.shape_cast %622 : vector<1x64x32xbf16> to vector<64x32xbf16>
    %624 = arith.mulf %615, %615 : vector<8x32xf32>
    %cst_208 = arith.constant dense<0.000000e+00> : vector<8xf32>
    %625 = vector.multi_reduction <add>, %624, %cst_208 [1] : vector<8x32xf32> to vector<8xf32>
    %626 = vector.shape_cast %625 : vector<8xf32> to vector<8x1xf32>
    %cst_209 = arith.constant 3.200000e+01 : f32
    %627 = vector.broadcast %cst_209 : f32 to vector<8x1xf32>
    %628 = arith.divf %626, %627 : vector<8x1xf32>
    %cst_210 = arith.constant 9.99999997E-7 : f32
    %629 = vector.broadcast %cst_210 : f32 to vector<8x1xf32>
    %630 = arith.addf %628, %629 : vector<8x1xf32>
    %631 = math.rsqrt %630 : vector<8x1xf32>
    %632 = vector.broadcast %631 : vector<8x1xf32> to vector<8x32xf32>
    %633 = arith.mulf %615, %632 : vector<8x32xf32>
    %634 = arith.truncf %633 : vector<8x32xf32> to vector<8x32xbf16>
    %cst_211 = arith.constant dense<0.000000e+00> : vector<8x160xf32>
    %635 = tpu.matmul %634, %617, %cst_211 {dimension_numbers = #tpu.dot_dimension_numbers<[1], [0], [0], [1], [0, 0, 1, 1], [], []>} : vector<8x32xbf16>, vector<32x160xbf16>, vector<8x160xf32> -> vector<8x160xf32>
    %636 = vector.extract_strided_slice %635 {offsets = [0, 0], sizes = [8, 32], strides = [1, 1]} : vector<8x160xf32> to vector<8x32xf32>
    %637 = vector.extract_strided_slice %635 {offsets = [0, 32], sizes = [8, 32], strides = [1, 1]} : vector<8x160xf32> to vector<8x32xf32>
    %638 = vector.extract_strided_slice %635 {offsets = [0, 64], sizes = [8, 32], strides = [1, 1]} : vector<8x160xf32> to vector<8x32xf32>
    %639 = vector.extract_strided_slice %635 {offsets = [0, 96], sizes = [8, 32], strides = [1, 1]} : vector<8x160xf32> to vector<8x32xf32>
    %640 = vector.extract_strided_slice %635 {offsets = [0, 128], sizes = [8, 32], strides = [1, 1]} : vector<8x160xf32> to vector<8x32xf32>
    %641 = arith.mulf %636, %0 : vector<8x32xf32>
    %642 = arith.mulf %639, %1 : vector<8x32xf32>
    %643 = arith.addf %641, %642 : vector<8x32xf32>
    %644 = arith.mulf %637, %0 : vector<8x32xf32>
    %645 = arith.mulf %640, %1 : vector<8x32xf32>
    %646 = arith.addf %644, %645 : vector<8x32xf32>
    %647 = arith.truncf %643 : vector<8x32xf32> to vector<8x32xbf16>
    %648 = arith.truncf %646 : vector<8x32xf32> to vector<8x32xbf16>
    %649 = arith.truncf %638 : vector<8x32xf32> to vector<8x32xbf16>
    %650 = vector.extract_strided_slice %647 {offsets = [0, 0], sizes = [8, 8], strides = [1, 1]} : vector<8x32xbf16> to vector<8x8xbf16>
    %651 = vector.extract_strided_slice %648 {offsets = [0, 0], sizes = [8, 8], strides = [1, 1]} : vector<8x32xbf16> to vector<8x8xbf16>
    %652 = tpu.transpose %651, [1, 0] : vector<8x8xbf16> -> vector<8x8xbf16>
    %cst_212 = arith.constant dense<0.000000e+00> : vector<8x8xf32>
    %653 = tpu.matmul %650, %652, %cst_212 {dimension_numbers = #tpu.dot_dimension_numbers<[1], [0], [0], [1], [0, 0, 1, 1], [], []>} : vector<8x8xbf16>, vector<8x8xbf16>, vector<8x8xf32> -> vector<8x8xf32>
    %654 = vector.extract_strided_slice %647 {offsets = [0, 8], sizes = [8, 8], strides = [1, 1]} : vector<8x32xbf16> to vector<8x8xbf16>
    %655 = vector.extract_strided_slice %648 {offsets = [0, 8], sizes = [8, 8], strides = [1, 1]} : vector<8x32xbf16> to vector<8x8xbf16>
    %656 = tpu.transpose %655, [1, 0] : vector<8x8xbf16> -> vector<8x8xbf16>
    %cst_213 = arith.constant dense<0.000000e+00> : vector<8x8xf32>
    %657 = tpu.matmul %654, %656, %cst_213 {dimension_numbers = #tpu.dot_dimension_numbers<[1], [0], [0], [1], [0, 0, 1, 1], [], []>} : vector<8x8xbf16>, vector<8x8xbf16>, vector<8x8xf32> -> vector<8x8xf32>
    %658 = vector.extract_strided_slice %647 {offsets = [0, 16], sizes = [8, 8], strides = [1, 1]} : vector<8x32xbf16> to vector<8x8xbf16>
    %659 = vector.extract_strided_slice %648 {offsets = [0, 16], sizes = [8, 8], strides = [1, 1]} : vector<8x32xbf16> to vector<8x8xbf16>
    %660 = tpu.transpose %659, [1, 0] : vector<8x8xbf16> -> vector<8x8xbf16>
    %cst_214 = arith.constant dense<0.000000e+00> : vector<8x8xf32>
    %661 = tpu.matmul %658, %660, %cst_214 {dimension_numbers = #tpu.dot_dimension_numbers<[1], [0], [0], [1], [0, 0, 1, 1], [], []>} : vector<8x8xbf16>, vector<8x8xbf16>, vector<8x8xf32> -> vector<8x8xf32>
    %662 = vector.extract_strided_slice %647 {offsets = [0, 24], sizes = [8, 8], strides = [1, 1]} : vector<8x32xbf16> to vector<8x8xbf16>
    %663 = vector.extract_strided_slice %648 {offsets = [0, 24], sizes = [8, 8], strides = [1, 1]} : vector<8x32xbf16> to vector<8x8xbf16>
    %664 = tpu.transpose %663, [1, 0] : vector<8x8xbf16> -> vector<8x8xbf16>
    %cst_215 = arith.constant dense<0.000000e+00> : vector<8x8xf32>
    %665 = tpu.matmul %662, %664, %cst_215 {dimension_numbers = #tpu.dot_dimension_numbers<[1], [0], [0], [1], [0, 0, 1, 1], [], []>} : vector<8x8xbf16>, vector<8x8xbf16>, vector<8x8xf32> -> vector<8x8xf32>
    %666 = tpu.concatenate %653, %657, %661, %665 in 0 : vector<8x8xf32>, vector<8x8xf32>, vector<8x8xf32>, vector<8x8xf32> -> vector<32x8xf32>
    %cst_216 = arith.constant dense<0xFF800000> : vector<32xf32>
    %667 = vector.multi_reduction <maximumf>, %666, %cst_216 [1] : vector<32x8xf32> to vector<32xf32>
    %668 = vector.shape_cast %667 : vector<32xf32> to vector<32x1xf32>
    %669 = vector.broadcast %668 : vector<32x1xf32> to vector<32x8xf32>
    %670 = arith.subf %666, %669 : vector<32x8xf32>
    %671 = math.exp %670 : vector<32x8xf32>
    %cst_217 = arith.constant dense<0.000000e+00> : vector<32xf32>
    %672 = vector.multi_reduction <add>, %671, %cst_217 [1] : vector<32x8xf32> to vector<32xf32>
    %673 = vector.shape_cast %672 : vector<32xf32> to vector<32x1xf32>
    %674 = tpu.reciprocal %673 {approx = true} : vector<32x1xf32> -> vector<32x1xf32>
    %675 = vector.broadcast %674 : vector<32x1xf32> to vector<32x8xf32>
    %676 = arith.mulf %671, %675 : vector<32x8xf32>
    %677 = arith.truncf %676 : vector<32x8xf32> to vector<32x8xbf16>
    %678 = vector.extract_strided_slice %677 {offsets = [0, 0], sizes = [8, 8], strides = [1, 1]} : vector<32x8xbf16> to vector<8x8xbf16>
    %679 = vector.extract_strided_slice %649 {offsets = [0, 0], sizes = [8, 8], strides = [1, 1]} : vector<8x32xbf16> to vector<8x8xbf16>
    %cst_218 = arith.constant dense<0.000000e+00> : vector<8x8xf32>
    %680 = tpu.matmul %678, %679, %cst_218 {dimension_numbers = #tpu.dot_dimension_numbers<[1], [0], [0], [1], [0, 0, 1, 1], [], []>} : vector<8x8xbf16>, vector<8x8xbf16>, vector<8x8xf32> -> vector<8x8xf32>
    %681 = vector.extract_strided_slice %677 {offsets = [8, 0], sizes = [8, 8], strides = [1, 1]} : vector<32x8xbf16> to vector<8x8xbf16>
    %682 = vector.extract_strided_slice %649 {offsets = [0, 8], sizes = [8, 8], strides = [1, 1]} : vector<8x32xbf16> to vector<8x8xbf16>
    %cst_219 = arith.constant dense<0.000000e+00> : vector<8x8xf32>
    %683 = tpu.matmul %681, %682, %cst_219 {dimension_numbers = #tpu.dot_dimension_numbers<[1], [0], [0], [1], [0, 0, 1, 1], [], []>} : vector<8x8xbf16>, vector<8x8xbf16>, vector<8x8xf32> -> vector<8x8xf32>
    %684 = vector.extract_strided_slice %677 {offsets = [16, 0], sizes = [8, 8], strides = [1, 1]} : vector<32x8xbf16> to vector<8x8xbf16>
    %685 = vector.extract_strided_slice %649 {offsets = [0, 16], sizes = [8, 8], strides = [1, 1]} : vector<8x32xbf16> to vector<8x8xbf16>
    %cst_220 = arith.constant dense<0.000000e+00> : vector<8x8xf32>
    %686 = tpu.matmul %684, %685, %cst_220 {dimension_numbers = #tpu.dot_dimension_numbers<[1], [0], [0], [1], [0, 0, 1, 1], [], []>} : vector<8x8xbf16>, vector<8x8xbf16>, vector<8x8xf32> -> vector<8x8xf32>
    %687 = vector.extract_strided_slice %677 {offsets = [24, 0], sizes = [8, 8], strides = [1, 1]} : vector<32x8xbf16> to vector<8x8xbf16>
    %688 = vector.extract_strided_slice %649 {offsets = [0, 24], sizes = [8, 8], strides = [1, 1]} : vector<8x32xbf16> to vector<8x8xbf16>
    %cst_221 = arith.constant dense<0.000000e+00> : vector<8x8xf32>
    %689 = tpu.matmul %687, %688, %cst_221 {dimension_numbers = #tpu.dot_dimension_numbers<[1], [0], [0], [1], [0, 0, 1, 1], [], []>} : vector<8x8xbf16>, vector<8x8xbf16>, vector<8x8xf32> -> vector<8x8xf32>
    %690 = tpu.concatenate %680, %683, %686, %689 in 1 : vector<8x8xf32>, vector<8x8xf32>, vector<8x8xf32>, vector<8x8xf32> -> vector<8x32xf32>
    %691 = arith.truncf %690 : vector<8x32xf32> to vector<8x32xbf16>
    %cst_222 = arith.constant dense<0.000000e+00> : vector<8x32xf32>
    %692 = tpu.matmul %691, %619, %cst_222 {dimension_numbers = #tpu.dot_dimension_numbers<[1], [0], [0], [1], [0, 0, 1, 1], [], []>} : vector<8x32xbf16>, vector<32x32xbf16>, vector<8x32xf32> -> vector<8x32xf32>
    %693 = arith.addf %615, %692 : vector<8x32xf32>
    %694 = arith.mulf %693, %693 : vector<8x32xf32>
    %cst_223 = arith.constant dense<0.000000e+00> : vector<8xf32>
    %695 = vector.multi_reduction <add>, %694, %cst_223 [1] : vector<8x32xf32> to vector<8xf32>
    %696 = vector.shape_cast %695 : vector<8xf32> to vector<8x1xf32>
    %cst_224 = arith.constant 3.200000e+01 : f32
    %697 = vector.broadcast %cst_224 : f32 to vector<8x1xf32>
    %698 = arith.divf %696, %697 : vector<8x1xf32>
    %cst_225 = arith.constant 9.99999997E-7 : f32
    %699 = vector.broadcast %cst_225 : f32 to vector<8x1xf32>
    %700 = arith.addf %698, %699 : vector<8x1xf32>
    %701 = math.rsqrt %700 : vector<8x1xf32>
    %702 = vector.broadcast %701 : vector<8x1xf32> to vector<8x32xf32>
    %703 = arith.mulf %693, %702 : vector<8x32xf32>
    %704 = arith.truncf %703 : vector<8x32xf32> to vector<8x32xbf16>
    %cst_226 = arith.constant dense<0.000000e+00> : vector<8x128xf32>
    %705 = tpu.matmul %704, %621, %cst_226 {dimension_numbers = #tpu.dot_dimension_numbers<[1], [0], [0], [1], [0, 0, 1, 1], [], []>} : vector<8x32xbf16>, vector<32x128xbf16>, vector<8x128xf32> -> vector<8x128xf32>
    %706 = vector.extract_strided_slice %705 {offsets = [0, 0], sizes = [8, 64], strides = [1, 1]} : vector<8x128xf32> to vector<8x64xf32>
    %707 = vector.extract_strided_slice %705 {offsets = [0, 64], sizes = [8, 64], strides = [1, 1]} : vector<8x128xf32> to vector<8x64xf32>
    %708 = arith.negf %706 : vector<8x64xf32>
    %709 = math.exp %708 : vector<8x64xf32>
    %cst_227 = arith.constant 1.000000e+00 : f32
    %710 = vector.broadcast %cst_227 : f32 to vector<8x64xf32>
    %711 = arith.addf %710, %709 : vector<8x64xf32>
    %712 = arith.divf %710, %711 : vector<8x64xf32>
    %713 = arith.mulf %706, %712 : vector<8x64xf32>
    %714 = arith.mulf %713, %707 : vector<8x64xf32>
    %715 = arith.truncf %714 : vector<8x64xf32> to vector<8x64xbf16>
    %cst_228 = arith.constant dense<0.000000e+00> : vector<8x32xf32>
    %716 = tpu.matmul %715, %623, %cst_228 {dimension_numbers = #tpu.dot_dimension_numbers<[1], [0], [0], [1], [0, 0, 1, 1], [], []>} : vector<8x64xbf16>, vector<64x32xbf16>, vector<8x32xf32> -> vector<8x32xf32>
    %717 = arith.addf %693, %716 : vector<8x32xf32>
    %c7 = arith.constant 7 : index
    %c0_229 = arith.constant 0 : index
    %c0_230 = arith.constant 0 : index
    %718 = vector.load %arg3[%c7, %c0_229, %c0_230] : memref<8x32x160xbf16, #tpu.memory_space<vmem>>, vector<1x32x160xbf16>
    %719 = vector.shape_cast %718 : vector<1x32x160xbf16> to vector<32x160xbf16>
    %c7_231 = arith.constant 7 : index
    %c0_232 = arith.constant 0 : index
    %c0_233 = arith.constant 0 : index
    %720 = vector.load %arg4[%c7_231, %c0_232, %c0_233] : memref<8x32x32xbf16, #tpu.memory_space<vmem>>, vector<1x32x32xbf16>
    %721 = vector.shape_cast %720 : vector<1x32x32xbf16> to vector<32x32xbf16>
    %c7_234 = arith.constant 7 : index
    %c0_235 = arith.constant 0 : index
    %c0_236 = arith.constant 0 : index
    %722 = vector.load %arg5[%c7_234, %c0_235, %c0_236] : memref<8x32x128xbf16, #tpu.memory_space<vmem>>, vector<1x32x128xbf16>
    %723 = vector.shape_cast %722 : vector<1x32x128xbf16> to vector<32x128xbf16>
    %c7_237 = arith.constant 7 : index
    %c0_238 = arith.constant 0 : index
    %c0_239 = arith.constant 0 : index
    %724 = vector.load %arg6[%c7_237, %c0_238, %c0_239] : memref<8x64x32xbf16, #tpu.memory_space<vmem>>, vector<1x64x32xbf16>
    %725 = vector.shape_cast %724 : vector<1x64x32xbf16> to vector<64x32xbf16>
    %726 = arith.mulf %717, %717 : vector<8x32xf32>
    %cst_240 = arith.constant dense<0.000000e+00> : vector<8xf32>
    %727 = vector.multi_reduction <add>, %726, %cst_240 [1] : vector<8x32xf32> to vector<8xf32>
    %728 = vector.shape_cast %727 : vector<8xf32> to vector<8x1xf32>
    %cst_241 = arith.constant 3.200000e+01 : f32
    %729 = vector.broadcast %cst_241 : f32 to vector<8x1xf32>
    %730 = arith.divf %728, %729 : vector<8x1xf32>
    %cst_242 = arith.constant 9.99999997E-7 : f32
    %731 = vector.broadcast %cst_242 : f32 to vector<8x1xf32>
    %732 = arith.addf %730, %731 : vector<8x1xf32>
    %733 = math.rsqrt %732 : vector<8x1xf32>
    %734 = vector.broadcast %733 : vector<8x1xf32> to vector<8x32xf32>
    %735 = arith.mulf %717, %734 : vector<8x32xf32>
    %736 = arith.truncf %735 : vector<8x32xf32> to vector<8x32xbf16>
    %cst_243 = arith.constant dense<0.000000e+00> : vector<8x160xf32>
    %737 = tpu.matmul %736, %719, %cst_243 {dimension_numbers = #tpu.dot_dimension_numbers<[1], [0], [0], [1], [0, 0, 1, 1], [], []>} : vector<8x32xbf16>, vector<32x160xbf16>, vector<8x160xf32> -> vector<8x160xf32>
    %738 = vector.extract_strided_slice %737 {offsets = [0, 0], sizes = [8, 32], strides = [1, 1]} : vector<8x160xf32> to vector<8x32xf32>
    %739 = vector.extract_strided_slice %737 {offsets = [0, 32], sizes = [8, 32], strides = [1, 1]} : vector<8x160xf32> to vector<8x32xf32>
    %740 = vector.extract_strided_slice %737 {offsets = [0, 64], sizes = [8, 32], strides = [1, 1]} : vector<8x160xf32> to vector<8x32xf32>
    %741 = vector.extract_strided_slice %737 {offsets = [0, 96], sizes = [8, 32], strides = [1, 1]} : vector<8x160xf32> to vector<8x32xf32>
    %742 = vector.extract_strided_slice %737 {offsets = [0, 128], sizes = [8, 32], strides = [1, 1]} : vector<8x160xf32> to vector<8x32xf32>
    %743 = arith.mulf %738, %0 : vector<8x32xf32>
    %744 = arith.mulf %741, %1 : vector<8x32xf32>
    %745 = arith.addf %743, %744 : vector<8x32xf32>
    %746 = arith.mulf %739, %0 : vector<8x32xf32>
    %747 = arith.mulf %742, %1 : vector<8x32xf32>
    %748 = arith.addf %746, %747 : vector<8x32xf32>
    %749 = arith.truncf %745 : vector<8x32xf32> to vector<8x32xbf16>
    %750 = arith.truncf %748 : vector<8x32xf32> to vector<8x32xbf16>
    %751 = arith.truncf %740 : vector<8x32xf32> to vector<8x32xbf16>
    %752 = vector.extract_strided_slice %749 {offsets = [0, 0], sizes = [8, 8], strides = [1, 1]} : vector<8x32xbf16> to vector<8x8xbf16>
    %753 = vector.extract_strided_slice %750 {offsets = [0, 0], sizes = [8, 8], strides = [1, 1]} : vector<8x32xbf16> to vector<8x8xbf16>
    %754 = tpu.transpose %753, [1, 0] : vector<8x8xbf16> -> vector<8x8xbf16>
    %cst_244 = arith.constant dense<0.000000e+00> : vector<8x8xf32>
    %755 = tpu.matmul %752, %754, %cst_244 {dimension_numbers = #tpu.dot_dimension_numbers<[1], [0], [0], [1], [0, 0, 1, 1], [], []>} : vector<8x8xbf16>, vector<8x8xbf16>, vector<8x8xf32> -> vector<8x8xf32>
    %756 = vector.extract_strided_slice %749 {offsets = [0, 8], sizes = [8, 8], strides = [1, 1]} : vector<8x32xbf16> to vector<8x8xbf16>
    %757 = vector.extract_strided_slice %750 {offsets = [0, 8], sizes = [8, 8], strides = [1, 1]} : vector<8x32xbf16> to vector<8x8xbf16>
    %758 = tpu.transpose %757, [1, 0] : vector<8x8xbf16> -> vector<8x8xbf16>
    %cst_245 = arith.constant dense<0.000000e+00> : vector<8x8xf32>
    %759 = tpu.matmul %756, %758, %cst_245 {dimension_numbers = #tpu.dot_dimension_numbers<[1], [0], [0], [1], [0, 0, 1, 1], [], []>} : vector<8x8xbf16>, vector<8x8xbf16>, vector<8x8xf32> -> vector<8x8xf32>
    %760 = vector.extract_strided_slice %749 {offsets = [0, 16], sizes = [8, 8], strides = [1, 1]} : vector<8x32xbf16> to vector<8x8xbf16>
    %761 = vector.extract_strided_slice %750 {offsets = [0, 16], sizes = [8, 8], strides = [1, 1]} : vector<8x32xbf16> to vector<8x8xbf16>
    %762 = tpu.transpose %761, [1, 0] : vector<8x8xbf16> -> vector<8x8xbf16>
    %cst_246 = arith.constant dense<0.000000e+00> : vector<8x8xf32>
    %763 = tpu.matmul %760, %762, %cst_246 {dimension_numbers = #tpu.dot_dimension_numbers<[1], [0], [0], [1], [0, 0, 1, 1], [], []>} : vector<8x8xbf16>, vector<8x8xbf16>, vector<8x8xf32> -> vector<8x8xf32>
    %764 = vector.extract_strided_slice %749 {offsets = [0, 24], sizes = [8, 8], strides = [1, 1]} : vector<8x32xbf16> to vector<8x8xbf16>
    %765 = vector.extract_strided_slice %750 {offsets = [0, 24], sizes = [8, 8], strides = [1, 1]} : vector<8x32xbf16> to vector<8x8xbf16>
    %766 = tpu.transpose %765, [1, 0] : vector<8x8xbf16> -> vector<8x8xbf16>
    %cst_247 = arith.constant dense<0.000000e+00> : vector<8x8xf32>
    %767 = tpu.matmul %764, %766, %cst_247 {dimension_numbers = #tpu.dot_dimension_numbers<[1], [0], [0], [1], [0, 0, 1, 1], [], []>} : vector<8x8xbf16>, vector<8x8xbf16>, vector<8x8xf32> -> vector<8x8xf32>
    %768 = tpu.concatenate %755, %759, %763, %767 in 0 : vector<8x8xf32>, vector<8x8xf32>, vector<8x8xf32>, vector<8x8xf32> -> vector<32x8xf32>
    %cst_248 = arith.constant dense<0xFF800000> : vector<32xf32>
    %769 = vector.multi_reduction <maximumf>, %768, %cst_248 [1] : vector<32x8xf32> to vector<32xf32>
    %770 = vector.shape_cast %769 : vector<32xf32> to vector<32x1xf32>
    %771 = vector.broadcast %770 : vector<32x1xf32> to vector<32x8xf32>
    %772 = arith.subf %768, %771 : vector<32x8xf32>
    %773 = math.exp %772 : vector<32x8xf32>
    %cst_249 = arith.constant dense<0.000000e+00> : vector<32xf32>
    %774 = vector.multi_reduction <add>, %773, %cst_249 [1] : vector<32x8xf32> to vector<32xf32>
    %775 = vector.shape_cast %774 : vector<32xf32> to vector<32x1xf32>
    %776 = tpu.reciprocal %775 {approx = true} : vector<32x1xf32> -> vector<32x1xf32>
    %777 = vector.broadcast %776 : vector<32x1xf32> to vector<32x8xf32>
    %778 = arith.mulf %773, %777 : vector<32x8xf32>
    %779 = arith.truncf %778 : vector<32x8xf32> to vector<32x8xbf16>
    %780 = vector.extract_strided_slice %779 {offsets = [0, 0], sizes = [8, 8], strides = [1, 1]} : vector<32x8xbf16> to vector<8x8xbf16>
    %781 = vector.extract_strided_slice %751 {offsets = [0, 0], sizes = [8, 8], strides = [1, 1]} : vector<8x32xbf16> to vector<8x8xbf16>
    %cst_250 = arith.constant dense<0.000000e+00> : vector<8x8xf32>
    %782 = tpu.matmul %780, %781, %cst_250 {dimension_numbers = #tpu.dot_dimension_numbers<[1], [0], [0], [1], [0, 0, 1, 1], [], []>} : vector<8x8xbf16>, vector<8x8xbf16>, vector<8x8xf32> -> vector<8x8xf32>
    %783 = vector.extract_strided_slice %779 {offsets = [8, 0], sizes = [8, 8], strides = [1, 1]} : vector<32x8xbf16> to vector<8x8xbf16>
    %784 = vector.extract_strided_slice %751 {offsets = [0, 8], sizes = [8, 8], strides = [1, 1]} : vector<8x32xbf16> to vector<8x8xbf16>
    %cst_251 = arith.constant dense<0.000000e+00> : vector<8x8xf32>
    %785 = tpu.matmul %783, %784, %cst_251 {dimension_numbers = #tpu.dot_dimension_numbers<[1], [0], [0], [1], [0, 0, 1, 1], [], []>} : vector<8x8xbf16>, vector<8x8xbf16>, vector<8x8xf32> -> vector<8x8xf32>
    %786 = vector.extract_strided_slice %779 {offsets = [16, 0], sizes = [8, 8], strides = [1, 1]} : vector<32x8xbf16> to vector<8x8xbf16>
    %787 = vector.extract_strided_slice %751 {offsets = [0, 16], sizes = [8, 8], strides = [1, 1]} : vector<8x32xbf16> to vector<8x8xbf16>
    %cst_252 = arith.constant dense<0.000000e+00> : vector<8x8xf32>
    %788 = tpu.matmul %786, %787, %cst_252 {dimension_numbers = #tpu.dot_dimension_numbers<[1], [0], [0], [1], [0, 0, 1, 1], [], []>} : vector<8x8xbf16>, vector<8x8xbf16>, vector<8x8xf32> -> vector<8x8xf32>
    %789 = vector.extract_strided_slice %779 {offsets = [24, 0], sizes = [8, 8], strides = [1, 1]} : vector<32x8xbf16> to vector<8x8xbf16>
    %790 = vector.extract_strided_slice %751 {offsets = [0, 24], sizes = [8, 8], strides = [1, 1]} : vector<8x32xbf16> to vector<8x8xbf16>
    %cst_253 = arith.constant dense<0.000000e+00> : vector<8x8xf32>
    %791 = tpu.matmul %789, %790, %cst_253 {dimension_numbers = #tpu.dot_dimension_numbers<[1], [0], [0], [1], [0, 0, 1, 1], [], []>} : vector<8x8xbf16>, vector<8x8xbf16>, vector<8x8xf32> -> vector<8x8xf32>
    %792 = tpu.concatenate %782, %785, %788, %791 in 1 : vector<8x8xf32>, vector<8x8xf32>, vector<8x8xf32>, vector<8x8xf32> -> vector<8x32xf32>
    %793 = arith.truncf %792 : vector<8x32xf32> to vector<8x32xbf16>
    %cst_254 = arith.constant dense<0.000000e+00> : vector<8x32xf32>
    %794 = tpu.matmul %793, %721, %cst_254 {dimension_numbers = #tpu.dot_dimension_numbers<[1], [0], [0], [1], [0, 0, 1, 1], [], []>} : vector<8x32xbf16>, vector<32x32xbf16>, vector<8x32xf32> -> vector<8x32xf32>
    %795 = arith.addf %717, %794 : vector<8x32xf32>
    %796 = arith.mulf %795, %795 : vector<8x32xf32>
    %cst_255 = arith.constant dense<0.000000e+00> : vector<8xf32>
    %797 = vector.multi_reduction <add>, %796, %cst_255 [1] : vector<8x32xf32> to vector<8xf32>
    %798 = vector.shape_cast %797 : vector<8xf32> to vector<8x1xf32>
    %cst_256 = arith.constant 3.200000e+01 : f32
    %799 = vector.broadcast %cst_256 : f32 to vector<8x1xf32>
    %800 = arith.divf %798, %799 : vector<8x1xf32>
    %cst_257 = arith.constant 9.99999997E-7 : f32
    %801 = vector.broadcast %cst_257 : f32 to vector<8x1xf32>
    %802 = arith.addf %800, %801 : vector<8x1xf32>
    %803 = math.rsqrt %802 : vector<8x1xf32>
    %804 = vector.broadcast %803 : vector<8x1xf32> to vector<8x32xf32>
    %805 = arith.mulf %795, %804 : vector<8x32xf32>
    %806 = arith.truncf %805 : vector<8x32xf32> to vector<8x32xbf16>
    %cst_258 = arith.constant dense<0.000000e+00> : vector<8x128xf32>
    %807 = tpu.matmul %806, %723, %cst_258 {dimension_numbers = #tpu.dot_dimension_numbers<[1], [0], [0], [1], [0, 0, 1, 1], [], []>} : vector<8x32xbf16>, vector<32x128xbf16>, vector<8x128xf32> -> vector<8x128xf32>
    %808 = vector.extract_strided_slice %807 {offsets = [0, 0], sizes = [8, 64], strides = [1, 1]} : vector<8x128xf32> to vector<8x64xf32>
    %809 = vector.extract_strided_slice %807 {offsets = [0, 64], sizes = [8, 64], strides = [1, 1]} : vector<8x128xf32> to vector<8x64xf32>
    %810 = arith.negf %808 : vector<8x64xf32>
    %811 = math.exp %810 : vector<8x64xf32>
    %cst_259 = arith.constant 1.000000e+00 : f32
    %812 = vector.broadcast %cst_259 : f32 to vector<8x64xf32>
    %813 = arith.addf %812, %811 : vector<8x64xf32>
    %814 = arith.divf %812, %813 : vector<8x64xf32>
    %815 = arith.mulf %808, %814 : vector<8x64xf32>
    %816 = arith.mulf %815, %809 : vector<8x64xf32>
    %817 = arith.truncf %816 : vector<8x64xf32> to vector<8x64xbf16>
    %cst_260 = arith.constant dense<0.000000e+00> : vector<8x32xf32>
    %818 = tpu.matmul %817, %725, %cst_260 {dimension_numbers = #tpu.dot_dimension_numbers<[1], [0], [0], [1], [0, 0, 1, 1], [], []>} : vector<8x64xbf16>, vector<64x32xbf16>, vector<8x32xf32> -> vector<8x32xf32>
    %819 = arith.addf %795, %818 : vector<8x32xf32>
    %c0_261 = arith.constant 0 : index
    %c0_262 = arith.constant 0 : index
    %c0_263 = arith.constant 0 : index
    %820 = vector.load %arg7[%c0_261, %c0_262, %c0_263] : memref<1x8x32xf32, #tpu.memory_space<vmem>>, vector<1x8x32xf32>
    %821 = vector.shape_cast %820 : vector<1x8x32xf32> to vector<8x32xf32>
    %822 = vector.shape_cast %819 : vector<8x32xf32> to vector<1x8x32xf32>
    tpu.vector_store %arg7[%c0_261, %c0_262, %c0_263], %822 {strides = array<i32>} : memref<1x8x32xf32, #tpu.memory_space<vmem>>, vector<1x8x32xf32>,
    return
  }
  func.func @transform_0(%arg0: i32) -> (i32, i32, i32) {
    %c0_i32 = arith.constant 0 : i32
    %c0_i32_0 = arith.constant 0 : i32
    %c0_i32_1 = arith.constant 0 : i32
    return %arg0, %c0_i32, %c0_i32_0 : i32, i32, i32
  }
  func.func @transform_1(%arg0: i32) -> (i32, i32) {
    %c0_i32 = arith.constant 0 : i32
    %c0_i32_0 = arith.constant 0 : i32
    %c0_i32_1 = arith.constant 0 : i32
    return %c0_i32, %c0_i32_0 : i32, i32
  }
  func.func @transform_2(%arg0: i32) -> (i32, i32, i32) {
    %c0_i32 = arith.constant 0 : i32
    %c0_i32_0 = arith.constant 0 : i32
    %c0_i32_1 = arith.constant 0 : i32
    %c0_i32_2 = arith.constant 0 : i32
    return %c0_i32, %c0_i32_0, %c0_i32_1 : i32, i32, i32
  }
  func.func @transform_3(%arg0: i32) -> (i32, i32, i32) {
    %c0_i32 = arith.constant 0 : i32
    %c0_i32_0 = arith.constant 0 : i32
    %c0_i32_1 = arith.constant 0 : i32
    %c0_i32_2 = arith.constant 0 : i32
    return %c0_i32, %c0_i32_0, %c0_i32_1 : i32, i32, i32
  }
  func.func @transform_4(%arg0: i32) -> (i32, i32, i32) {
    %c0_i32 = arith.constant 0 : i32
    %c0_i32_0 = arith.constant 0 : i32
    %c0_i32_1 = arith.constant 0 : i32
    %c0_i32_2 = arith.constant 0 : i32
    return %c0_i32, %c0_i32_0, %c0_i32_1 : i32, i32, i32
  }
  func.func @transform_5(%arg0: i32) -> (i32, i32, i32) {
    %c0_i32 = arith.constant 0 : i32
    %c0_i32_0 = arith.constant 0 : i32
    %c0_i32_1 = arith.constant 0 : i32
    %c0_i32_2 = arith.constant 0 : i32
    return %c0_i32, %c0_i32_0, %c0_i32_1 : i32, i32, i32
  }
  func.func @transform_6(%arg0: i32) -> (i32, i32, i32) {
    %c0_i32 = arith.constant 0 : i32
    %c0_i32_0 = arith.constant 0 : i32
    %c0_i32_1 = arith.constant 0 : i32
    return %arg0, %c0_i32, %c0_i32_0 : i32, i32, i32
  }
}

</mosaic_0001>

<bundles_post_ra>
// kernel: abbreviated_model_forward.1
= control target key start
LH: loop header
LB: loop body
LE: loop exit
PB: predicated region body
PF: predicated region fallthrough
CT: control target
= control target key end

     0   :  { %s9704_s0 = inlined_call_operand.hbm [shape: f32[2,8,32], index: 0, kind: input, shape index: {}]   ;;  %s9705_s1 = inlined_call_operand.hbm [shape: f32[8,64], index: 1, kind: input, shape index: {}]   ;;  %s9706_s2 = inlined_call_operand.vmem [shape: bf16[8,32,160], index: 2, kind: input, shape index: {}]   ;;  %s9707_s3 = inlined_call_operand.vmem [shape: bf16[8,32,32], index: 3, kind: input, shape index: {}]   ;;  %s9708_s4 = inlined_call_operand.hbm [shape: bf16[8,32,128], index: 4, kind: input, shape index: {}]   ;;  %s9709_s5 = inlined_call_operand.vmem [shape: bf16[8,64,32], index: 5, kind: input, shape index: {}]   ;;  %s9710_s6 = inlined_call_operand.hbm [shape: f32[2,8,32], index: 6, kind: output, shape index: {}]  }
   0x1   :  { %9751 = sst [smem:[#allocation18_spill]] %s9704_s0 }
   0x2   :  { %9752 = sst [smem:[#allocation19_spill]] %s9705_s1 }
   0x3   :  { %9753 = sst [smem:[#allocation20_spill]] %s9708_s4 }
   0x4   :  { %11 = vsyncpa [#allocation3], 0 }
   0x5   :  { %13 = vsyncpa [#allocation3 + $0x1], 0 }
   0x6   :  { %14 = vsyncpa [#allocation6], 0 }
   0x7   :  { %15 = vsyncpa [#allocation4], 0 }
   0x8   :  { %17 = vsyncpa [#allocation4 + $0x1], 0  ;;  %s8369_s21 = smov 0   ;;  %s8371_s22 = smov 0  }
   0x9   :  { %s8373_s23 = smov 0   ;;  %s8375_s24 = smov 0  }
   0xa LB: > { %9754 = sst [smem:[#allocation12_spill]] %s8300_s22  ;;  %s8390_s25 = sadd.s32 4294967295, %s8308_s24   ;;  %s8308_s24 = sphi %s8375_s24, %s9794_s24   ;;  %s8304_s23 = sphi %s8373_s23, %s9797_s23   ;;  %s8300_s22 = sphi %s8371_s22, %s9796_s22   ;;  %s8296_s21 = sphi %s8369_s21, %s9795_s21  }
   0xb   : > { %9755 = sst [smem:[#allocation13_spill]] %s8304_s23  ;;  %s6606_s26 = sadd.s32 4294967294, %s8308_s24  }
   0xc   : > { %9756 = sst [smem:[#allocation14_spill]] %s8308_s24  ;;  %p43_p0 = scmp.ne.s32.totalorder %s8300_s22, %s8296_s21 }
   0xd   : > { %p9711_p1 = scmp.eq.s32.totalorder %s8390_s25, 0  ;;  %p178_p3 = scmp.eq.s32.totalorder %s6606_s26, 1 }
   0xe   : > { %p6607_p5 = scmp.ge.s32.totalorder %s8308_s24, 1  ;;  %p185_p7 = scmp.lt.s32.totalorder %s8308_s24, 3 }
   0xf   : > { %p8399_p4 = por %p9711_p1, %p43_p0  ;;  %p8404_p6 = por %p178_p3, %p43_p0 }
  0x10   : > { %p8409_p8 = pnand %p6607_p5, %p185_p7  ;;  %s8310_s30 = smov [#allocation5]  }
  0x11   : > { %s9757_s27 = scalar_select %p8399_p4, 1, 0 }
  0x12   : > { %s9758_s28 = scalar_select %p8404_p6, 1, 0 }
  0x13   : > { %s9760_s29 = scalar_select %p8409_p8, 1, 0 }
  0x14   : > { %9759 = sst [smem:[#allocation15_spill]] %s9758_s28  ;;  %s198_s7 = sshll.u32 %s8310_s30, 4  ;;  %s199_s7 = int_to_ptr.vmem [resolvable:$true] %s198_s7 }
  0x15   : > { %p7770_p10 = pneg %p8409_p8  ;;  %s8311_s8 = smov [#allocation7]  }
  0x16   : > { %s214_s9 = sshll.u32 %s8311_s8, 4  ;;  %s9762_s1 = sld [smem:[#allocation19_spill]]  ;;  %s8422_s9 = int_to_ptr.vmem [resolvable:$true] %s214_s9 }
  0x17   : > { %p8418_p11 = pnand %p7770_p10, %p9711_p1 }
  0x19   : > { %p8154_p13 = pneg %p8418_p11 }
  0x1c   : > { %s8152_s13 = scalar_lea.hbm %s9762_s1, 128 }
  0x1d   : > { %p8153_p12 = scmp.ne.s32.totalorder %s9762_s1, %s8152_s13  ;;  %p8159_p5 = scmp.lt.u32.totalorder %s8152_s13, %s9762_s1 }
  0x1f   : > { %p8155_p0 = pnand %p8154_p13, %p8153_p12 }
  0x21   : > { %p8156_p3 = pneg %p8155_p0 }
  0x23   : > { %p8161_p7 = pnand %p8159_p5, %p8156_p3 }
  0x25   : > { %8164 = shalt.err (!%p8161_p7)
}
  0x26   : > { %s8165_s18 = scalar_lea.vmem %s199_s7, 128  ;;  %p8173_p2 = scmp.lt.s32.totalorder %s199_s7, %s199_s7 }
  0x27   : > { %p8166_p10 = scmp.ne.s32.totalorder %s199_s7, %s8165_s18  ;;  %p8174_p6 = scmp.lt.s32.totalorder %s8165_s18, %s8165_s18 }
  0x29   : > { %p8168_p9 = pnand %p8166_p10, %p8154_p13  ;;  %p8175_p4 = por %p8174_p6, %p8173_p2 }
  0x2b   : > { %p8169_p1 = pneg %p8168_p9 }
  0x2d   : > { %p8176_p8 = pnand %p8175_p4, %p8169_p1 }
  0x2f   : > { %8179 = shalt.err (!%p8176_p8)
}
  0x30   : > { %7773 = dma.hbm_to_vmem [thread:$0]  (!%p8418_p11), %s9762_s1, 128, %s199_s7, [#allocation6]  }
  0x31   : > { %s9763_s4 = sld [smem:[#allocation20_spill]] }
  0x37   : > { %s8180_s8 = scalar_lea.hbm %s9763_s4, 2048 }
  0x38   : > { %p8181_p9 = scmp.ne.s32.totalorder %s9763_s4, %s8180_s8  ;;  %p8187_p4 = scmp.lt.u32.totalorder %s8180_s8, %s9763_s4 }
  0x3a   : > { %p8183_p2 = pnand %p8181_p9, %p8154_p13 }
  0x3c   : > { %p8184_p1 = pneg %p8183_p2 }
  0x3e   : > { %p8189_p6 = pnand %p8187_p4, %p8184_p1 }
  0x40   : > { %8192 = shalt.err (!%p8189_p6)
}
  0x41   : > { %s8193_s7 = scalar_lea.vmem %s8422_s9, 2048  ;;  %p8201_p3 = scmp.lt.s32.totalorder %s8422_s9, %s8422_s9 }
  0x42   : > { %p8194_p8 = scmp.ne.s32.totalorder %s8422_s9, %s8193_s7  ;;  %p8202_p5 = scmp.lt.s32.totalorder %s8193_s7, %s8193_s7 }
  0x44   : > { %p8196_p12 = pnand %p8194_p8, %p8154_p13  ;;  %p8203_p7 = por %p8202_p5, %p8201_p3 }
  0x46   : > { %p8197_p0 = pneg %p8196_p12 }
  0x48   : > { %p8204_p10 = pnand %p8203_p7, %p8197_p0 }
  0x4a   : > { %8207 = shalt.err (!%p8204_p10)
}
  0x4b   : > { %s8312_s15 = smov 64   ;;  %s8313_s16 = smov 4  }
  0x4c   : > { %7776 = dma.hbm_to_vmem [thread:$0]  (!%p8418_p11), %s9763_s4, 2048, %s8422_s9, [#allocation6], %s8312_s15, %s8312_s15, %s8313_s16  }
  0x4d   : > { %s8472_s19 = sadd.s32 1, %s8308_s24   ;;  %s30_s20 = sadd.s32 1, %s8304_s23 }
  0x4e   : > { %9764 = sst [smem:[#allocation16_spill]] %s8472_s19  ;;  %s27_s26 = ssub.s32 %s8308_s24, %s8472_s19 }
  0x4f   : > { %p37_p13 = scmp.ne.s32.totalorder %s8304_s23, %s8300_s22  ;;  %p28_p9 = scmp.eq.s32.totalorder %s27_s26, 0 }
  0x50   : > { %p38_p2 = scmp.eq.s32.totalorder %s8308_s24, 0  ;;  %p9765_p1 = scmp.eq.s32.totalorder %s8390_s25, 1 }
  0x51   : > { %p7787_p6 = scmp.lt.s32.totalorder %s8308_s24, 2  ;;  %s231_s10 = sand.u32 1, %s8304_s23  }
  0x52   : > { %p8482_p4 = por %p9765_p1, %p37_p13  ;;  %p39_p8 = por %p38_p2, %p37_p13 }
  0x53   : > { %s8488_s8 = scalar_select %p28_p9, %s8304_s23, %s30_s20  }
  0x54   : > { %s6611_s11 = sshll.u32 %s231_s10, 3  ;;  %s6612_s9 = sshll.u32 %s8308_s24, 7 }
  0x55   : > { %9767 = sst [smem:[#allocation17_spill]] %s8488_s8  ;;  %s9768_s0 = sld [smem:[#allocation18_spill]] }
  0x56   : > { %s235_s7 = scalar_lea.vmem [#allocation2], %s6611_s11  ;;  %p8499_p11 = pnand %p7787_p6, %p39_p8 }
  0x57   : > { %s242_s15 = sshll.u32 %s235_s7, 4  ;;  %s232_s17 = scalar_lea.sflag [#allocation3], %s231_s10  ;;  %s8497_s15 = int_to_ptr.vmem [resolvable:$true] %s242_s15 }
  0x58   : > { %p8210_p0 = pneg %p8499_p11 }
  0x5b   : > { %s8495_s14 = scalar_lea.hbm %s9768_s0, %s6612_s9  ;;  %s8213_s11 = scalar_lea.hbm %s9768_s0, 256 }
  0x5c   : > { %s8208_s18 = scalar_lea.hbm %s8495_s14, 128  ;;  %p8214_p7 = scmp.lt.u32.totalorder %s8495_s14, %s9768_s0 }
  0x5d   : > { %p8209_p12 = scmp.ne.s32.totalorder %s8495_s14, %s8208_s18  ;;  %p8215_p10 = scmp.lt.u32.totalorder %s8213_s11, %s8208_s18 }
  0x5e   : > { %p8217_p9 = scmp.lt.u32.totalorder %s8208_s18, %s8495_s14 }
  0x5f   : > { %p8211_p3 = pnand %p8210_p0, %p8209_p12  ;;  %p8216_p13 = por %p8215_p10, %p8214_p7 }
  0x61   : > { %p8212_p5 = pneg %p8211_p3  ;;  %p8218_p2 = por %p8217_p9, %p8216_p13 }
  0x63   : > { %p8219_p1 = pnand %p8218_p2, %p8212_p5 }
  0x65   : > { %8222 = shalt.err (!%p8219_p1)
}
  0x66   : > { %s8223_s10 = scalar_lea.vmem %s8497_s15, 128  ;;  %s8314_s13 = smov [#allocation2]  }
  0x67   : > { %p8224_p6 = scmp.ne.s32.totalorder %s8497_s15, %s8223_s10  ;;  %s8228_s7 = sshll.u32 %s8314_s13, 4  ;;  %s8229_s7 = int_to_ptr.vmem [resolvable:$false] %s8228_s7 }
  0x68   : > { %s8230_s20 = scalar_lea.vmem %s8229_s7, 256  ;;  %p8231_p3 = scmp.lt.s32.totalorder %s8497_s15, %s8229_s7 }
  0x69   : > { %p8226_p8 = pnand %p8224_p6, %p8210_p0  ;;  %p8232_p7 = scmp.lt.s32.totalorder %s8230_s20, %s8223_s10 }
  0x6b   : > { %p8227_p12 = pneg %p8226_p8  ;;  %p8233_p10 = por %p8232_p7, %p8231_p3 }
  0x6d   : > { %p8234_p13 = pnand %p8233_p10, %p8227_p12 }
  0x6f   : > { %8237 = shalt.err (!%p8234_p13)
}
  0x70   : > { %7780 = dma.hbm_to_vmem [thread:$0]  (!%p8499_p11), %s8495_s14, 128, %s8497_s15, %s232_s17  }
  0x71   : > { %p9770_p5 = scmp.ne.s32.totalorder %s9760_s29, 0 }
  0x72   : > { %s8531_s18 = sand.u32 (!%p9770_p5), 1, %s8300_s22   ;;  %p9771_p0 = scmp.ne.s32.totalorder (!%p9770_p5), %s9757_s27, 0 }
  0x73   : > { %251 = sbr.rel (%p9770_p5) target bundleno = 19469 (0x4c0d), region = 44  ;;  %s9714_s26 = sshll.u32 (!%p9770_p5), %s8531_s18, 3 }
  0x74   : > { %s254_s11 = scalar_lea.sflag (!%p9770_p5), [#allocation3], %s8531_s18  ;;  %s257_s9 = scalar_lea.vmem (!%p9770_p5), [#allocation2], %s9714_s26 }
  0x7a   : > { %8283 = dma.done.wait (%p9771_p0), %s254_s11, 128  }
  0x7b   : > { %8285 = vsyncadd (%p9771_p0), %s254_s11, 4294967168  ;;  %p9772_p11 = scmp.eq.s32.totalorder %s8390_s25, 0 }
  0x7d   : > { %8287 = dma.done.wait (%p9772_p11), [#allocation6], 2176   ;;  %p9773_p9 = pmov %p9772_p11 }
  0x7e   : > { %v8545_v0 = vld [vmem:[%s257_s9] sm:$0xff]  ;;  %vm318_vm0 = vcmask 261120   ;;  %v7848_v5 = vld [vmem:[%s9706_s2 + $0x14] ss:$8 sps:$4 sm:$0xff]   ;;  %v7850_v6 = vld [vmem:[%s9706_s2 + $0x10] ss:$8 sps:$4 sm:$0xff]  }
  0x7f   : > { %8289 = vsyncadd (%p9773_p9), [#allocation6], 4294965120  ;;  %v317_v1 = vmul.f32 %v8545_v0, %v8545_v0  ;;  %v7845_v3 = vld [vmem:[%s9706_s2 + $0x4] ss:$8 sps:$4 sm:$0xff]   ;;  %v7847_v4 = vld [vmem:[%s9706_s2] ss:$8 sps:$4 sm:$0xff]  }
  0x80   : > { %351 = vmatprep.subr.bf16.mxu1 %v7845_v3  ;;  %v8315_v7 = vmov 0   ;;  %v8563_v8 = vld [vmem:[#allocation5] sm:$0xff]  ;;  %s9731_s13 = smov 64   ;;  %s9739_s7 = smov 96   ;;  %v8319_v23 = vmov 0.0   ;;  %vm8320_vm1 = vmmov 0  }
  0x81   : > { %v319_v2 = vsel %vm318_vm0, %v317_v1, 0.0  ;;  %383 = vmatprep.mubr.bf16.mxu1 %v8315_v7  ;;  %352 = vmatpush1.bf16.msra.mxu1 %v7847_v4  ;;  %s9743_s20 = smov 32   ;;  %s9729_s11 = smov 80   ;;  %vm422_vm2 = vcmask 64512   ;;  %vm672_vm3 = vcmask 1043456   ;;  %vm877_vm4 = vcmask 130048  }
  0x82   : > { %320 = vadd.xlane.f32.xlu0 %v319_v2  ;;  %353 = vmatprep.subr.bf16.mxu1 %v7848_v5  ;;  %s9735_s9 = smov 88   ;;  %s9727_s29 = smov 112   ;;  %vm879_vm5 = vcmask 195584   ;;  %vm1039_vm6 = vcmask 523264  }
  0x83   : > { %394 = vrot.lane.b32.xlu1 %v8563_v8, %s9731_s13  ;;  %7156 = vmatprep.subr.bf16.mxu0 %v8319_v23  ;;  %s9741_s14 = smov 120   ;;  %s9737_s27 = smov 72  }
  0x84   : > { %7158 = vmatprep.mubr.msk.bf16.mxu0 %vm8320_vm1, %v8319_v23  ;;  %s9733_s15 = smov 104   ;;  %s9717_s16 = smov 48  }
  0x85   : > { %354 = vmatpush1.bf16.msra.mxu1 %v7850_v6  ;;  %s9715_s17 = smov 40   ;;  %s9719_s12 = smov 56  }
  0x86   : > { %7150 = vmatprep.subr.bf16.mxu1 %v8319_v23  ;;  %s9723_s26 = smov 16   ;;  %s9781_s10 = smov 16  }
  0x87   : > { %403 = vrot.lane.b32.xlu1 %v8563_v8, %s9743_s20  ;;  %s9783_s4 = smov 32   ;;  %s9784_s0 = smov 120  }
  0x88   : > { %s9785_s1 = smov 96  }
  0x98   : > { %407 = vrot.lane.b32.xlu0 %v8563_v8, %s9739_s7 }
  0xf5   : > { %v8579_v21 = vpop.permute.xlu1 %394 }
  0xf9   : > { %v8586_v24 = vpop.permute.xlu1 %403 }
 0x10f   : > { %v321_v9 = vpop.xlane.xlu0 %320 }
 0x110   : > { %v323_v10 = vmul.f32 0.03125, %v321_v9 }
 0x112   : > { %v324_v11 = vadd.f32 1e-06, %v323_v10 }
 0x113   : > { %v8573_v15 = vpop.permute.xlu0 %407 }
 0x114   : > { %7957 = vrsqrt.f32 %v324_v11 }
 0x11e   : > { %v7958_v12 = vpop.eup %7957 }
 0x11f   : > { %v326_v13 = vmul.f32 %v7958_v12, %v8545_v0 }
 0x121   : > { %v327_v14 = vpack.c.bf16 %v326_v13, %v326_v13 }
 0x123   : > { %6622 = vmatmul.mubr.msk.bf16.vlgmr.msra.gmra.mrb[0].mxu1 %vm318_vm0, %v327_v14 }
 0x124   : > { %7152 = vmatprep.mubr.msk.bf16.mxu1 %vm8320_vm1, %v8319_v23 }
 0x1f6   : > { %v8575_v16 = vpop.f32.mrb[0].mxu1 }
 0x1f7   : > { %v387_v17 = vpop.f32.mrb[1].mxu1  ;;  %v397_v22 = vmul.f32 %v8579_v21, %v8575_v16  ;;  %v406_v25 = vmul.f32 %v8586_v24, %v8575_v16  ;;  %v392_v29 = vmul.f32 %v8575_v16, %v8563_v8  ;;  %v418_v1 = vpack.c.bf16 %v8575_v16, %v8575_v16 }
 0x1f8   : > { %v389_v18 = vpop.f32.mrb[2].mxu1  ;;  %v410_v19 = vmul.f32 %v8573_v15, %v387_v17 }
 0x1f9   : > { %v390_v20 = vpop.f32.mrb[3].mxu1 }
 0x1fa   : > { %412 = vrot.lane.b32.xlu1 %v410_v19, %s9743_s20 }
 0x1fe   : > { %399 = vrot.lane.b32.xlu1 %v397_v22, %s9743_s20 }
 0x26c   : > { %v413_v26 = vpop.permute.xlu1 %412 }
 0x26d   : > { %v415_v27 = vadd.f32 %v413_v26, %v406_v25 }
 0x26f   : > { %v417_v28 = vpack.c.bf16 %v415_v27, %v415_v27 }
 0x270   : > { %v400_v30 = vpop.permute.xlu1 %399 }
 0x271   : > { %v402_v31 = vadd.f32 %v400_v30, %v392_v29  ;;  %522 = vrot.lane.b32.xlu0 %v417_v28, %s9729_s11  ;;  %420 = vrot.lane.b32.xlu1 %v417_v28, %s9739_s7  ;;  %s9775_s11 = smov 112  }
 0x273   : > { %v416_v32 = vpack.c.bf16 %v402_v31, %v402_v31 }
 0x275   : > { %472 = vrot.lane.b32.xlu1 %v417_v28, %s9735_s9  ;;  %520 = vrot.lane.b32.xlu0 %v416_v32, %s9727_s29  ;;  %s9776_s29 = smov 56  }
 0x279   : > { %470 = vrot.lane.b32.xlu1 %v416_v32, %s9741_s14 }
 0x27d   : > { %572 = vrot.lane.b32.xlu1 %v417_v28, %s9737_s27 }
 0x281   : > { %570 = vrot.lane.b32.xlu1 %v416_v32, %s9733_s15 }
 0x2e3   : > { %v421_v33 = vpop.permute.xlu1 %420  ;;  %v523_v37 = vpop.permute.xlu0 %522 }
 0x2e4   : > { %v427_v34 = vsel %vm422_vm2, %v421_v33, 0  ;;  %v528_v39 = vsel %vm422_vm2, %v523_v37, 0 }
 0x2e5   : > { %7151 = vmatpush3.bf16.xpose.msra.mxu1 %v427_v34 }
 0x2e6   : > { %7162 = vmatprep.subr.bf16.mxu1 %v8319_v23 }
 0x2e7   : > { %v473_v35 = vpop.permute.xlu1 %472  ;;  %v521_v42 = vpop.permute.xlu0 %520 }
 0x2e8   : > { %v478_v36 = vsel %vm422_vm2, %v473_v35, 0 }
 0x2e9   : > { %7157 = vmatpush3.bf16.xpose.msra.mxu0 %v478_v36 }
 0x2ea   : > { %7168 = vmatprep.subr.bf16.mxu0 %v8319_v23 }
 0x2eb   : > { %v471_v38 = vpop.permute.xlu1 %470 }
 0x2ec   : > { %7153 = vmatmul.mubr.msk.bf16.vlgmr.msra.gmra.mrb[4].mxu1 %vm422_vm2, %v416_v32 }
 0x2ed   : > { %7163 = vmatpush3.bf16.xpose.msra.mxu1 %v528_v39  ;;  %7164 = vmatprep.mubr.msk.bf16.mxu1 %vm8320_vm1, %v8319_v23 }
 0x2ee   : > { %7174 = vmatprep.subr.bf16.mxu1 %v8319_v23 }
 0x2ef   : > { %v573_v40 = vpop.permute.xlu1 %572 }
 0x2f0   : > { %v578_v41 = vsel %vm422_vm2, %v573_v40, 0  ;;  %7159 = vmatmul.mubr.msk.bf16.vlgmr.msra.gmra.mrb[0].mxu0 %vm422_vm2, %v471_v38 }
 0x2f1   : > { %7169 = vmatpush3.bf16.xpose.msra.mxu0 %v578_v41  ;;  %7170 = vmatprep.mubr.msk.bf16.mxu0 %vm8320_vm1, %v8319_v23 }
 0x2f2   : > { %7180 = vmatprep.subr.bf16.mxu0 %v8319_v23 }
 0x2f3   : > { %v571_v43 = vpop.permute.xlu1 %570 }
 0x2f4   : > { %7165 = vmatmul.mubr.msk.bf16.vlgmr.msra.gmra.mrb[8].mxu1 %vm422_vm2, %v521_v42 }
 0x2f5   : > { %7176 = vmatprep.mubr.msk.bf16.mxu1 %vm8320_vm1, %v8319_v23 }
 0x2f8   : > { %7171 = vmatmul.mubr.msk.bf16.vlgmr.msra.gmra.mrb[4].mxu0 %vm422_vm2, %v571_v43 }
 0x2f9   : > { %7182 = vmatprep.mubr.msk.bf16.mxu0 %vm8320_vm1, %v8319_v23 }
 0x3bf   : > { %v463_v44 = vpop.f32.mrb[4].mxu1 }
 0x3c0   : > { %v7154_v45 = vpop.f32.mrb[5].mxu1  ;;  %v620_v46 = vsel %vm422_vm2, %v463_v44, -inf }
 0x3c1   : > { %621 = vmax.xlane.f32.xlu0 %v620_v46  ;;  %v466_v47 = vpop.f32.mrb[6].mxu1 }
 0x3c2   : > { %v7155_v48 = vpop.f32.mrb[7].mxu1 }
 0x3c3   : > { %v514_v49 = vpop.f32.mrb[0].mxu0 }
 0x3c4   : > { %v7160_v50 = vpop.f32.mrb[1].mxu0  ;;  %v623_v51 = vsel %vm422_vm2, %v514_v49, -inf }
 0x3c5   : > { %624 = vmax.xlane.f32.xlu1 %v623_v51  ;;  %v517_v52 = vpop.f32.mrb[2].mxu0 }
 0x3c6   : > { %v7161_v53 = vpop.f32.mrb[3].mxu0  ;;  %v7851_v52 = vld [vmem:[%s9707_s3] sm:$0xff]  }
 0x3c7   : > { %v564_v54 = vpop.f32.mrb[8].mxu1  ;;  %v7852_v53 = vld [vmem:[%s9707_s3 + $0x8] sm:$0xff]  }
 0x3c8   : > { %v7166_v55 = vpop.f32.mrb[9].mxu1  ;;  %v626_v56 = vsel %vm422_vm2, %v564_v54, -inf }
 0x3c9   : > { %627 = vmax.xlane.f32.xlu0 %v626_v56  ;;  %v567_v57 = vpop.f32.mrb[10].mxu1 }
 0x3ca   : > { %v7167_v58 = vpop.f32.mrb[11].mxu1 }
 0x3cb   : > { %v614_v59 = vpop.f32.mrb[4].mxu0 }
 0x3cc   : > { %v7172_v60 = vpop.f32.mrb[5].mxu0  ;;  %v629_v61 = vsel %vm422_vm2, %v614_v59, -inf }
 0x3cd   : > { %v617_v62 = vpop.f32.mrb[6].mxu0  ;;  %630 = vmax.xlane.f32.xlu0 %v629_v61 }
 0x3ce   : > { %v7173_v63 = vpop.f32.mrb[7].mxu0 }
 0x3d6   : > { %667 = vrot.lane.b32.xlu1 %v418_v1, %s9731_s13 }
 0x44e   : > { %v622_v2 = vpop.xlane.xlu0 %621 }
 0x44f   : > { %v632_v3 = vsub.f32 %v463_v44, %v622_v2 }
 0x451   : > { %v636_v4 = vmul.f32 1.442695, %v632_v3 }
 0x452   : > { %v625_v5 = vpop.xlane.xlu1 %624 }
 0x453   : > { %7959 = vpow2.f32 %v636_v4  ;;  %v633_v6 = vsub.f32 %v514_v49, %v625_v5 }
 0x455   : > { %v638_v9 = vmul.f32 1.442695, %v633_v6 }
 0x456   : > { %v668_v10 = vpop.permute.xlu1 %667  ;;  %v628_v11 = vpop.xlane.xlu0 %627 }
 0x457   : > { %7961 = vpow2.f32 %v638_v9  ;;  %v674_v12 = vsel %vm672_vm3, %v668_v10, 0  ;;  %v634_v13 = vsub.f32 %v564_v54, %v628_v11 }
 0x458   : > { %7175 = vmatpush3.bf16.msra.mxu1 %v674_v12 }
 0x459   : > { %v640_v14 = vmul.f32 1.442695, %v634_v13  ;;  %7186 = vmatprep.subr.bf16.mxu1 %v8319_v23 }
 0x45a   : > { %v631_v16 = vpop.xlane.xlu0 %630 }
 0x45b   : > { %7963 = vpow2.f32 %v640_v14  ;;  %v635_v17 = vsub.f32 %v614_v59, %v631_v16 }
 0x45d   : > { %v7960_v18 = vpop.eup %7959  ;;  %v642_v19 = vmul.f32 1.442695, %v635_v17 }
 0x45e   : > { %v644_v20 = vsel %vm422_vm2, %v7960_v18, 0.0 }
 0x45f   : > { %7965 = vpow2.f32 %v642_v19  ;;  %645 = vadd.xlane.f32.xlu1 %v644_v20 }
 0x461   : > { %v7962_v22 = vpop.eup %7961 }
 0x462   : > { %v647_v25 = vsel %vm422_vm2, %v7962_v22, 0.0 }
 0x463   : > { %648 = vadd.xlane.f32.xlu0 %v647_v25 }
 0x465   : > { %v7964_v26 = vpop.eup %7963 }
 0x466   : > { %v650_v27 = vsel %vm422_vm2, %v7964_v26, 0.0 }
 0x467   : > { %651 = vadd.xlane.f32.xlu1 %v650_v27  ;;  %v7853_v27 = vld [vmem:[#allocation7] sm:$0xff]  }
 0x469   : > { %v7966_v28 = vpop.eup %7965 }
 0x46a   : > { %v653_v29 = vsel %vm422_vm2, %v7966_v28, 0.0 }
 0x46b   : > { %654 = vadd.xlane.f32.xlu0 %v653_v29 }
 0x478   : > { %766 = vrot.lane.b32.xlu1 %v418_v1, %s9717_s16  ;;  %s9721_s16 = smov 24  }
 0x47c   : > { %816 = vrot.lane.b32.xlu1 %v418_v1, %s9715_s17  ;;  %s8333_s17 = smov [#allocation8]  }
 0x481   : > { %718 = vrot.lane.b32.xlu0 %v418_v1, %s9719_s12  ;;  %s9725_s12 = smov 8  }
 0x4ec   : > { %v646_v30 = vpop.xlane.xlu1 %645 }
 0x4ed   : > { %7967 = vrcp.f32 %v646_v30 }
 0x4f0   : > { %v649_v31 = vpop.xlane.xlu0 %648 }
 0x4f1   : > { %7969 = vrcp.f32 %v649_v31 }
 0x4f4   : > { %v652_v32 = vpop.xlane.xlu1 %651 }
 0x4f5   : > { %7971 = vrcp.f32 %v652_v32 }
 0x4f7   : > { %v7968_v34 = vpop.eup %7967 }
 0x4f8   : > { %v655_v33 = vpop.xlane.xlu0 %654  ;;  %v767_v35 = vpop.permute.xlu1 %766  ;;  %v660_v37 = vmul.f32 %v7968_v34, %v7960_v18  ;;  %v7855_v34 = vld [vmem:[%s9709_s5] sm:$0xff]  }
 0x4f9   : > { %7973 = vrcp.f32 %v655_v33  ;;  %v772_v43 = vsel %vm672_vm3, %v767_v35, 0  ;;  %v7856_v35 = vld [vmem:[%s9709_s5 + $0x8] sm:$0xff]  }
 0x4fb   : > { %v7970_v36 = vpop.eup %7969 }
 0x4fc   : > { %v661_v38 = vmul.f32 %v7970_v36, %v7962_v22  ;;  %v719_v39 = vpop.permute.xlu0 %718  ;;  %v817_v42 = vpop.permute.xlu1 %816  ;;  %v7857_v36 = vld [vmem:[%s9709_s5 + $0x10] sm:$0xff]  }
 0x4fd   : > { %v724_v40 = vsel %vm672_vm3, %v719_v39, 0  ;;  %v822_v46 = vsel %vm672_vm3, %v817_v42, 0 }
 0x4fe   : > { %7181 = vmatpush3.bf16.msra.mxu0 %v724_v40  ;;  %v664_v41 = vpack.c.bf16 %v661_v38, %v660_v37  ;;  %v7858_v37 = vld [vmem:[%s9709_s5 + $0x18] sm:$0xff]  }
 0x4ff   : > { %7192 = vmatprep.subr.bf16.mxu0 %v8319_v23  ;;  %v7972_v45 = vpop.eup %7971 }
 0x500   : > { %7177 = vmatmul.mubr.msk.bf16.vlgmr.msra.gmra.mrb[12].mxu1 %vm422_vm2, %v664_v41  ;;  %v717_v44 = vrot.slane %v664_v41, 4  ;;  %v662_v48 = vmul.f32 %v7972_v45, %v7964_v26 }
 0x501   : > { %7187 = vmatpush3.bf16.msra.mxu1 %v772_v43  ;;  %7188 = vmatprep.mubr.msk.bf16.mxu1 %vm8320_vm1, %v8319_v23 }
 0x502   : > { %7183 = vmatmul.mubr.msk.bf16.vlgmr.msra.gmra.mrb[8].mxu0 %vm422_vm2, %v717_v44  ;;  %7198 = vmatprep.subr.bf16.mxu1 %v8319_v23 }
 0x503   : > { %v7974_v47 = vpop.eup %7973  ;;  %7193 = vmatpush3.bf16.msra.mxu0 %v822_v46  ;;  %7194 = vmatprep.mubr.msk.bf16.mxu0 %vm8320_vm1, %v8319_v23 }
 0x504   : > { %v663_v49 = vmul.f32 %v7974_v47, %v7966_v28  ;;  %7206 = vmatprep.subr.bf16.mxu0 %v8319_v23  ;;  %v7854_v28 = vld [vmem:[#allocation7 + $0x8] sm:$0xff]  }
 0x506   : > { %v665_v50 = vpack.c.bf16 %v663_v49, %v662_v48 }
 0x508   : > { %7189 = vmatmul.mubr.msk.bf16.vlgmr.msra.gmra.mrb[16].mxu1 %vm422_vm2, %v665_v50  ;;  %v815_v51 = vrot.slane %v665_v50, 4 }
 0x509   : > { %7202 = vmatprep.mubr.msk.bf16.mxu1 %vm8320_vm1, %v8319_v23  ;;  %7199 = vmatpush3.bf16.msra.mxu1 %v7851_v52 }
 0x50a   : > { %7195 = vmatmul.mubr.msk.bf16.vlgmr.msra.gmra.mrb[12].mxu0 %vm422_vm2, %v815_v51  ;;  %7200 = vmatprep.subr.bf16.mxu1 %v8319_v23 }
 0x50b   : > { %7210 = vmatprep.mubr.msk.bf16.mxu0 %vm8320_vm1, %v8319_v23  ;;  %7207 = vmatpush3.bf16.msra.mxu0 %v7853_v27 }
 0x50c   : > { %7208 = vmatprep.subr.bf16.mxu0 %v8319_v23 }
 0x50d   : > { %7201 = vmatpush3.bf16.msra.mxu1 %v7852_v53 }
 0x50e   : > { %7214 = vmatprep.subr.bf16.mxu1 %v8319_v23 }
 0x50f   : > { %7209 = vmatpush3.bf16.msra.mxu0 %v7854_v28 }
 0x5d3   : > { %v710_v54 = vpop.f32.mrb[12].mxu1 }
 0x5d4   : > { %v7178_v55 = vpop.f32.mrb[13].mxu1 }
 0x5d5   : > { %v713_v56 = vpop.f32.mrb[14].mxu1  ;;  %v760_v57 = vpop.f32.mrb[8].mxu0 }
 0x5d6   : > { %865 = vrot.lane.b32.xlu0 %v760_v57, %s9725_s12  ;;  %v7179_v58 = vpop.f32.mrb[15].mxu1  ;;  %v7184_v59 = vpop.f32.mrb[9].mxu0  ;;  %v7859_v57 = vld [vmem:[%s9706_s2 + $0x20] ss:$8 sps:$4 sm:$0xff]   ;;  %s9777_s12 = smov 64  }
 0x5d7   : > { %v763_v60 = vpop.f32.mrb[10].mxu0  ;;  %v7861_v58 = vld [vmem:[%s9706_s2 + $0x24] ss:$8 sps:$4 sm:$0xff]   ;;  %v7864_v59 = vld [vmem:[%s9706_s2 + $0x34] ss:$8 sps:$4 sm:$0xff]  }
 0x5d8   : > { %v7185_v61 = vpop.f32.mrb[11].mxu0  ;;  %1140 = vmatprep.subr.bf16.mxu0 %v7861_v58  ;;  %v7862_v60 = vld [vmem:[%s9706_s2 + $0x30] ss:$8 sps:$4 sm:$0xff]  }
 0x5db   : > { %v808_v62 = vpop.f32.mrb[16].mxu1 }
 0x5dc   : > { %869 = vrot.lane.b32.xlu1 %v808_v62, %s9723_s26  ;;  %v7190_v63 = vpop.f32.mrb[17].mxu1  ;;  %s9778_s26 = smov 48  }
 0x5dd   : > { %v811_v1 = vpop.f32.mrb[18].mxu1  ;;  %v858_v2 = vpop.f32.mrb[12].mxu0 }
 0x5de   : > { %873 = vrot.lane.b32.xlu0 %v858_v2, %s9721_s16  ;;  %v7191_v3 = vpop.f32.mrb[19].mxu1  ;;  %v7196_v4 = vpop.f32.mrb[13].mxu0  ;;  %s9779_s16 = smov 40  }
 0x5df   : > { %v861_v5 = vpop.f32.mrb[14].mxu0 }
 0x5e0   : > { %v7197_v6 = vpop.f32.mrb[15].mxu0 }
 0x648   : > { %v866_v9 = vpop.permute.xlu0 %865 }
 0x649   : > { %v876_v10 = vsel %vm422_vm2, %v710_v54, %v866_v9 }
 0x64e   : > { %v870_v11 = vpop.permute.xlu1 %869 }
 0x64f   : > { %v878_v12 = vsel %vm877_vm4, %v876_v10, %v870_v11 }
 0x650   : > { %v874_v13 = vpop.permute.xlu0 %873 }
 0x651   : > { %v880_v14 = vsel %vm879_vm5, %v878_v12, %v874_v13 }
 0x652   : > { %v881_v16 = vpack.c.bf16 %v880_v14, %v880_v14 }
 0x654   : > { %7203 = vmatmul.mubr.msk.bf16.vlgmr.msra.gmra.mrb[20].mxu1 %vm318_vm0, %v881_v16 }
 0x655   : > { %7222 = vmatprep.mubr.msk.bf16.mxu1 %vm8320_vm1, %v8319_v23  ;;  %7215 = vmatpush3.bf16.msra.mxu1 %v7855_v34 }
 0x656   : > { %7216 = vmatprep.subr.bf16.mxu1 %v8319_v23 }
 0x659   : > { %7217 = vmatpush3.bf16.msra.mxu1 %v7856_v35 }
 0x65a   : > { %7218 = vmatprep.subr.bf16.mxu1 %v8319_v23 }
 0x65d   : > { %7219 = vmatpush3.bf16.msra.mxu1 %v7857_v36 }
 0x65e   : > { %7220 = vmatprep.subr.bf16.mxu1 %v8319_v23 }
 0x661   : > { %7221 = vmatpush3.bf16.msra.mxu1 %v7858_v37 }
 0x662   : > { %7232 = vmatprep.subr.bf16.mxu1 %v8319_v23 }
 0x727   : > { %v931_v17 = vpop.f32.mrb[20].mxu1 }
 0x728   : > { %v937_v18 = vadd.f32 %v931_v17, %v8545_v0  ;;  %v7204_v19 = vpop.f32.mrb[21].mxu1 }
 0x729   : > { %v934_v20 = vpop.f32.mrb[22].mxu1 }
 0x72a   : > { %v7205_v22 = vpop.f32.mrb[23].mxu1  ;;  %v938_v25 = vmul.f32 %v937_v18, %v937_v18 }
 0x72c   : > { %v939_v26 = vsel %vm318_vm0, %v938_v25, 0.0 }
 0x72d   : > { %940 = vadd.xlane.f32.xlu1 %v939_v26 }
 0x7ba   : > { %v941_v29 = vpop.xlane.xlu1 %940 }
 0x7bb   : > { %v942_v30 = vmul.f32 0.03125, %v941_v29 }
 0x7bd   : > { %v943_v31 = vadd.f32 1e-06, %v942_v30 }
 0x7bf   : > { %7975 = vrsqrt.f32 %v943_v31 }
 0x7c9   : > { %v7976_v32 = vpop.eup %7975 }
 0x7ca   : > { %v945_v33 = vmul.f32 %v7976_v32, %v937_v18 }
 0x7cc   : > { %v946_v0 = vpack.c.bf16 %v945_v33, %v945_v33 }
 0x7ce   : > { %7211 = vmatmul.mubr.msk.bf16.vlgmr.msra.gmra.mrb[16].mxu0 %vm318_vm0, %v946_v0 }
 0x7cf   : > { %1172 = vmatprep.mubr.bf16.mxu0 %v8315_v7  ;;  %1141 = vmatpush1.bf16.msra.mxu0 %v7859_v57 }
 0x7d0   : > { %1142 = vmatprep.subr.bf16.mxu0 %v7864_v59 }
 0x7d3   : > { %1143 = vmatpush1.bf16.msra.mxu0 %v7862_v60 }
 0x7d4   : > { %7226 = vmatprep.subr.bf16.mxu0 %v8319_v23 }
 0x8a1   : > { %v996_v38 = vpop.f32.mrb[16].mxu0 }
 0x8a2   : > { %1010 = vrot.lane.b32.xlu0 %v996_v38, %s9731_s13  ;;  %v7212_v39 = vpop.f32.mrb[17].mxu0  ;;  %v6637_v42 = vmul.f32 -1.442695, %v996_v38  ;;  %s9774_s13 = smov 80  }
 0x8a3   : > { %v999_v40 = vpop.f32.mrb[18].mxu0 }
 0x8a4   : > { %v7213_v41 = vpop.f32.mrb[19].mxu0  ;;  %7977 = vpow2.f32 %v6637_v42 }
 0x8ae   : > { %v7978_v43 = vpop.eup %7977 }
 0x8af   : > { %v1005_v44 = vadd.f32 1.0, %v7978_v43 }
 0x8b1   : > { %7979 = vrcp.f32 %v1005_v44 }
 0x8bb   : > { %v7980_v45 = vpop.eup %7979 }
 0x8bc   : > { %v1008_v46 = vmul.f32 %v7980_v45, %v996_v38 }
 0x914   : > { %v1011_v47 = vpop.permute.xlu0 %1010 }
 0x915   : > { %v1013_v48 = vmul.f32 %v1011_v47, %v1008_v46 }
 0x917   : > { %v1014_v49 = vpack.c.bf16 %v1013_v48, %v1013_v48 }
 0x919   : > { %7223 = vmatmul.mubr.msk.bf16.vlgmr.msra.gmra.mrb[24].mxu1 %vm1039_vm6, %v1014_v49 }
 0x91a   : > { %7234 = vmatprep.mubr.msk.bf16.mxu1 %vm8320_vm1, %v8319_v23 }
 0x9ec   : > { %v1077_v50 = vpop.f32.mrb[24].mxu1 }
 0x9ed   : > { %v8699_v51 = vadd.f32 %v1077_v50, %v937_v18  ;;  %v7224_v52 = vpop.f32.mrb[25].mxu1 }
 0x9ee   : > { %v1080_v53 = vpop.f32.mrb[26].mxu1 }
 0x9ef   : > { %v7225_v54 = vpop.f32.mrb[27].mxu1  ;;  %v1108_v55 = vmul.f32 %v8699_v51, %v8699_v51 }
 0x9f1   : > { %v1109_v56 = vsel %vm318_vm0, %v1108_v55, 0.0 }
 0x9f2   : > { %1110 = vadd.xlane.f32.xlu0 %v1109_v56 }
 0xa7f   : > { %v1111_v61 = vpop.xlane.xlu0 %1110 }
 0xa80   : > { %v1112_v62 = vmul.f32 0.03125, %v1111_v61 }
 0xa82   : > { %v1113_v63 = vadd.f32 1e-06, %v1112_v62 }
 0xa84   : > { %7981 = vrsqrt.f32 %v1113_v63 }
 0xa8e   : > { %v7982_v1 = vpop.eup %7981 }
 0xa8f   : > { %v1115_v2 = vmul.f32 %v7982_v1, %v8699_v51 }
 0xa91   : > { %v1116_v3 = vpack.c.bf16 %v1115_v2, %v1115_v2 }
 0xa93   : > { %6663 = vmatmul.mubr.msk.bf16.vlgmr.msra.gmra.mrb[20].mxu0 %vm318_vm0, %v1116_v3 }
 0xa94   : > { %7228 = vmatprep.mubr.msk.bf16.mxu0 %vm8320_vm1, %v8319_v23 }
 0xb66   : > { %v8721_v4 = vpop.f32.mrb[20].mxu0 }
 0xb67   : > { %v1176_v5 = vpop.f32.mrb[21].mxu0  ;;  %v1182_v6 = vmul.f32 %v8721_v4, %v8579_v21  ;;  %v1181_v12 = vmul.f32 %v8721_v4, %v8563_v8  ;;  %v1188_v14 = vmul.f32 %v8721_v4, %v8586_v24  ;;  %v1197_v54 = vpack.c.bf16 %v8721_v4, %v8721_v4 }
 0xb68   : > { %v1189_v9 = vmul.f32 %v1176_v5, %v8573_v15  ;;  %v1178_v10 = vpop.f32.mrb[22].mxu0 }
 0xb69   : > { %1184 = vrot.lane.b32.xlu0 %v1182_v6, %s9743_s20  ;;  %v1179_v11 = vpop.f32.mrb[23].mxu0 }
 0xb6a   : > { %1191 = vrot.lane.b32.xlu1 %v1189_v9, %s9743_s20  ;;  %s9787_s20 = smov 88  }
 0xbdb   : > { %v1185_v13 = vpop.permute.xlu0 %1184 }
 0xbdc   : > { %v1187_v16 = vadd.f32 %v1185_v13, %v1181_v12  ;;  %v1192_v17 = vpop.permute.xlu1 %1191 }
 0xbdd   : > { %v1194_v18 = vadd.f32 %v1192_v17, %v1188_v14 }
 0xbde   : > { %v1195_v19 = vpack.c.bf16 %v1187_v16, %v1187_v16 }
 0xbdf   : > { %v1196_v20 = vpack.c.bf16 %v1194_v18, %v1194_v18 }
 0xbe0   : > { %1248 = vrot.lane.b32.xlu0 %v1195_v19, %s9741_s14  ;;  %s9788_s14 = smov 104  }
 0xbe1   : > { %1199 = vrot.lane.b32.xlu1 %v1196_v20, %s9739_s7  ;;  %s9786_s7 = smov 72  }
 0xbe4   : > { %1350 = vrot.lane.b32.xlu0 %v1196_v20, %s9737_s27  ;;  %s9780_s27 = smov 8  }
 0xbe5   : > { %1250 = vrot.lane.b32.xlu1 %v1196_v20, %s9735_s9  ;;  %s9782_s9 = smov 24  }
 0xbe8   : > { %1348 = vrot.lane.b32.xlu0 %v1195_v19, %s9733_s15  ;;  %s8242_s15 = sshll.u32 %s8333_s17, 4  ;;  %s8243_s15 = int_to_ptr.vmem [resolvable:$false] %s8242_s15 }
 0xbe9   : > { %1300 = vrot.lane.b32.xlu1 %v1196_v20, %s9774_s13  ;;  %s8244_s23 = scalar_lea.vmem %s8243_s15, 256 }
 0xbed   : > { %1298 = vrot.lane.b32.xlu1 %v1195_v19, %s9775_s11 }
 0xc52   : > { %v1249_v25 = vpop.permute.xlu0 %1248 }
 0xc53   : > { %v1200_v8 = vpop.permute.xlu1 %1199 }
 0xc54   : > { %v1205_v22 = vsel %vm422_vm2, %v1200_v8, 0 }
 0xc55   : > { %7227 = vmatpush3.bf16.xpose.msra.mxu0 %v1205_v22 }
 0xc56   : > { %7238 = vmatprep.subr.bf16.mxu0 %v8319_v23  ;;  %v1351_v30 = vpop.permute.xlu0 %1350 }
 0xc57   : > { %v1251_v26 = vpop.permute.xlu1 %1250  ;;  %v1356_v31 = vsel %vm422_vm2, %v1351_v30, 0 }
 0xc58   : > { %v1256_v27 = vsel %vm422_vm2, %v1251_v26, 0 }
 0xc59   : > { %7233 = vmatpush3.bf16.xpose.msra.mxu1 %v1256_v27 }
 0xc5a   : > { %7244 = vmatprep.subr.bf16.mxu1 %v8319_v23  ;;  %v1349_v33 = vpop.permute.xlu0 %1348 }
 0xc5b   : > { %v1301_v28 = vpop.permute.xlu1 %1300 }
 0xc5c   : > { %v1306_v29 = vsel %vm422_vm2, %v1301_v28, 0  ;;  %7229 = vmatmul.mubr.msk.bf16.vlgmr.msra.gmra.mrb[24].mxu0 %vm422_vm2, %v1195_v19 }
 0xc5d   : > { %7239 = vmatpush3.bf16.xpose.msra.mxu0 %v1306_v29  ;;  %7240 = vmatprep.mubr.msk.bf16.mxu0 %vm8320_vm1, %v8319_v23 }
 0xc5e   : > { %7250 = vmatprep.subr.bf16.mxu0 %v8319_v23 }
 0xc5f   : > { %v1299_v32 = vpop.permute.xlu1 %1298 }
 0xc60   : > { %7235 = vmatmul.mubr.msk.bf16.vlgmr.msra.gmra.mrb[28].mxu1 %vm422_vm2, %v1249_v25 }
 0xc61   : > { %7245 = vmatpush3.bf16.xpose.msra.mxu1 %v1356_v31  ;;  %7246 = vmatprep.mubr.msk.bf16.mxu1 %vm8320_vm1, %v8319_v23 }
 0xc62   : > { %7256 = vmatprep.subr.bf16.mxu1 %v8319_v23 }
 0xc64   : > { %7241 = vmatmul.mubr.msk.bf16.vlgmr.msra.gmra.mrb[28].mxu0 %vm422_vm2, %v1299_v32 }
 0xc65   : > { %7252 = vmatprep.mubr.msk.bf16.mxu0 %vm8320_vm1, %v8319_v23 }
 0xc68   : > { %7247 = vmatmul.mubr.msk.bf16.vlgmr.msra.gmra.mrb[32].mxu1 %vm422_vm2, %v1349_v33 }
 0xc69   : > { %7258 = vmatprep.mubr.msk.bf16.mxu1 %vm8320_vm1, %v8319_v23 }
 0xd2f   : > { %v1241_v0 = vpop.f32.mrb[24].mxu0 }
 0xd30   : > { %v7230_v34 = vpop.f32.mrb[25].mxu0  ;;  %v1398_v35 = vsel %vm422_vm2, %v1241_v0, -inf }
 0xd31   : > { %1399 = vmax.xlane.f32.xlu1 %v1398_v35  ;;  %v1244_v36 = vpop.f32.mrb[26].mxu0 }
 0xd32   : > { %v7231_v37 = vpop.f32.mrb[27].mxu0 }
 0xd33   : > { %v1292_v38 = vpop.f32.mrb[28].mxu1 }
 0xd34   : > { %v7236_v39 = vpop.f32.mrb[29].mxu1  ;;  %v1401_v40 = vsel %vm422_vm2, %v1292_v38, -inf }
 0xd35   : > { %1402 = vmax.xlane.f32.xlu0 %v1401_v40  ;;  %v1295_v41 = vpop.f32.mrb[30].mxu1  ;;  %v7865_v40 = vld [vmem:[%s9707_s3 + $0x10] sm:$0xff]  }
 0xd36   : > { %v7237_v42 = vpop.f32.mrb[31].mxu1  ;;  %v7866_v41 = vld [vmem:[%s9707_s3 + $0x18] sm:$0xff]  }
 0xd37   : > { %v1342_v43 = vpop.f32.mrb[28].mxu0 }
 0xd38   : > { %v7242_v44 = vpop.f32.mrb[29].mxu0  ;;  %v1404_v45 = vsel %vm422_vm2, %v1342_v43, -inf }
 0xd39   : > { %v1345_v46 = vpop.f32.mrb[30].mxu0  ;;  %1405 = vmax.xlane.f32.xlu0 %v1404_v45 }
 0xd3a   : > { %v7243_v47 = vpop.f32.mrb[31].mxu0 }
 0xd3b   : > { %v1392_v48 = vpop.f32.mrb[32].mxu1 }
 0xd3c   : > { %v7248_v49 = vpop.f32.mrb[33].mxu1  ;;  %v1407_v50 = vsel %vm422_vm2, %v1392_v48, -inf }
 0xd3d   : > { %1408 = vmax.xlane.f32.xlu1 %v1407_v50  ;;  %v1395_v52 = vpop.f32.mrb[34].mxu1 }
 0xd3e   : > { %v7249_v53 = vpop.f32.mrb[35].mxu1 }
 0xd4e   : > { %1495 = vrot.lane.b32.xlu1 %v1197_v54, %s9776_s29 }
 0xd4f   : > { %1445 = vrot.lane.b32.xlu0 %v1197_v54, %s9777_s12 }
 0xdbe   : > { %v1400_v55 = vpop.xlane.xlu1 %1399 }
 0xdbf   : > { %v1410_v56 = vsub.f32 %v1241_v0, %v1400_v55 }
 0xdc1   : > { %v1414_v57 = vmul.f32 1.442695, %v1410_v56 }
 0xdc2   : > { %v1403_v58 = vpop.xlane.xlu0 %1402 }
 0xdc3   : > { %7983 = vpow2.f32 %v1414_v57  ;;  %v1411_v59 = vsub.f32 %v1292_v38, %v1403_v58 }
 0xdc5   : > { %v1416_v60 = vmul.f32 1.442695, %v1411_v59 }
 0xdc6   : > { %v1406_v61 = vpop.xlane.xlu0 %1405 }
 0xdc7   : > { %7985 = vpow2.f32 %v1416_v60  ;;  %v1412_v62 = vsub.f32 %v1342_v43, %v1406_v61 }
 0xdc9   : > { %v1418_v63 = vmul.f32 1.442695, %v1412_v62 }
 0xdca   : > { %v1446_v1 = vpop.permute.xlu0 %1445  ;;  %v1409_v2 = vpop.xlane.xlu1 %1408 }
 0xdcb   : > { %7987 = vpow2.f32 %v1418_v63  ;;  %v1451_v3 = vsel %vm672_vm3, %v1446_v1, 0  ;;  %v1413_v4 = vsub.f32 %v1392_v48, %v1409_v2 }
 0xdcc   : > { %7251 = vmatpush3.bf16.msra.mxu0 %v1451_v3 }
 0xdcd   : > { %v7984_v5 = vpop.eup %7983  ;;  %v1420_v6 = vmul.f32 1.442695, %v1413_v4  ;;  %7262 = vmatprep.subr.bf16.mxu0 %v8319_v23 }
 0xdce   : > { %v1496_v9 = vpop.permute.xlu1 %1495  ;;  %v1422_v10 = vsel %vm422_vm2, %v7984_v5, 0.0 }
 0xdcf   : > { %7989 = vpow2.f32 %v1420_v6  ;;  %v1501_v11 = vsel %vm672_vm3, %v1496_v9, 0  ;;  %1423 = vadd.xlane.f32.xlu0 %v1422_v10 }
 0xdd0   : > { %7257 = vmatpush3.bf16.msra.mxu1 %v1501_v11 }
 0xdd1   : > { %v7986_v12 = vpop.eup %7985  ;;  %7268 = vmatprep.subr.bf16.mxu1 %v8319_v23 }
 0xdd2   : > { %v1425_v13 = vsel %vm422_vm2, %v7986_v12, 0.0 }
 0xdd3   : > { %1426 = vadd.xlane.f32.xlu1 %v1425_v13  ;;  %v7868_v13 = vld [vmem:[#allocation7 + $0x18] sm:$0xff]  }
 0xdd5   : > { %v7988_v14 = vpop.eup %7987 }
 0xdd6   : > { %v1428_v16 = vsel %vm422_vm2, %v7988_v14, 0.0 }
 0xdd7   : > { %1429 = vadd.xlane.f32.xlu0 %v1428_v16 }
 0xdd9   : > { %v7990_v17 = vpop.eup %7989 }
 0xdda   : > { %v1431_v18 = vsel %vm422_vm2, %v7990_v17, 0.0 }
 0xddb   : > { %1432 = vadd.xlane.f32.xlu1 %v1431_v18 }
 0xdec   : > { %1543 = vrot.lane.b32.xlu1 %v1197_v54, %s9778_s26 }
 0xded   : > { %1593 = vrot.lane.b32.xlu0 %v1197_v54, %s9779_s16 }
 0xe5c   : > { %v1424_v19 = vpop.xlane.xlu0 %1423 }
 0xe5d   : > { %7991 = vrcp.f32 %v1424_v19 }
 0xe60   : > { %v1427_v20 = vpop.xlane.xlu1 %1426 }
 0xe61   : > { %7993 = vrcp.f32 %v1427_v20  ;;  %v7869_v20 = vld [vmem:[%s9709_s5 + $0x20] sm:$0xff]  }
 0xe64   : > { %v1430_v8 = vpop.xlane.xlu0 %1429 }
 0xe65   : > { %7995 = vrcp.f32 %v1430_v8  ;;  %v7870_v8 = vld [vmem:[%s9709_s5 + $0x28] sm:$0xff]  }
 0xe67   : > { %v7992_v25 = vpop.eup %7991 }
 0xe68   : > { %v1433_v22 = vpop.xlane.xlu1 %1432  ;;  %v1438_v27 = vmul.f32 %v7992_v25, %v7984_v5  ;;  %v1594_v31 = vpop.permute.xlu0 %1593  ;;  %v7872_v25 = vld [vmem:[%s9709_s5 + $0x38] sm:$0xff]  }
 0xe69   : > { %7997 = vrcp.f32 %v1433_v22  ;;  %v1599_v34 = vsel %vm672_vm3, %v1594_v31, 0  ;;  %v7871_v22 = vld [vmem:[%s9709_s5 + $0x30] sm:$0xff]  }
 0xe6b   : > { %v7994_v26 = vpop.eup %7993 }
 0xe6c   : > { %v1439_v28 = vmul.f32 %v7994_v26, %v7986_v12  ;;  %v1544_v29 = vpop.permute.xlu1 %1543  ;;  %v7867_v12 = vld [vmem:[#allocation7 + $0x10] sm:$0xff]  }
 0xe6d   : > { %v1549_v32 = vsel %vm672_vm3, %v1544_v29, 0 }
 0xe6e   : > { %v1442_v30 = vpack.c.bf16 %v1439_v28, %v1438_v27 }
 0xe6f   : > { %v7996_v0 = vpop.eup %7995 }
 0xe70   : > { %7253 = vmatmul.mubr.msk.bf16.vlgmr.msra.gmra.mrb[32].mxu0 %vm422_vm2, %v1442_v30  ;;  %v1494_v33 = vrot.slane %v1442_v30, 4  ;;  %v1440_v36 = vmul.f32 %v7996_v0, %v7988_v14 }
 0xe71   : > { %7263 = vmatpush3.bf16.msra.mxu0 %v1549_v32  ;;  %7264 = vmatprep.mubr.msk.bf16.mxu0 %vm8320_vm1, %v8319_v23 }
 0xe72   : > { %7259 = vmatmul.mubr.msk.bf16.vlgmr.msra.gmra.mrb[36].mxu1 %vm422_vm2, %v1494_v33  ;;  %7274 = vmatprep.subr.bf16.mxu0 %v8319_v23 }
 0xe73   : > { %v7998_v35 = vpop.eup %7997  ;;  %7269 = vmatpush3.bf16.msra.mxu1 %v1599_v34  ;;  %7270 = vmatprep.mubr.msk.bf16.mxu1 %vm8320_vm1, %v8319_v23 }
 0xe74   : > { %v1441_v37 = vmul.f32 %v7998_v35, %v7990_v17  ;;  %7282 = vmatprep.subr.bf16.mxu1 %v8319_v23 }
 0xe76   : > { %v1443_v38 = vpack.c.bf16 %v1441_v37, %v1440_v36 }
 0xe78   : > { %7265 = vmatmul.mubr.msk.bf16.vlgmr.msra.gmra.mrb[36].mxu0 %vm422_vm2, %v1443_v38  ;;  %v1592_v39 = vrot.slane %v1443_v38, 4 }
 0xe79   : > { %7278 = vmatprep.mubr.msk.bf16.mxu0 %vm8320_vm1, %v8319_v23  ;;  %7275 = vmatpush3.bf16.msra.mxu0 %v7865_v40 }
 0xe7a   : > { %7271 = vmatmul.mubr.msk.bf16.vlgmr.msra.gmra.mrb[40].mxu1 %vm422_vm2, %v1592_v39  ;;  %7276 = vmatprep.subr.bf16.mxu0 %v8319_v23 }
 0xe7b   : > { %7286 = vmatprep.mubr.msk.bf16.mxu1 %vm8320_vm1, %v8319_v23  ;;  %7283 = vmatpush3.bf16.msra.mxu1 %v7867_v12 }
 0xe7c   : > { %7284 = vmatprep.subr.bf16.mxu1 %v8319_v23 }
 0xe7d   : > { %7277 = vmatpush3.bf16.msra.mxu0 %v7866_v41 }
 0xe7e   : > { %7290 = vmatprep.subr.bf16.mxu0 %v8319_v23 }
 0xe7f   : > { %7285 = vmatpush3.bf16.msra.mxu1 %v7868_v13 }
 0xf43   : > { %v1487_v42 = vpop.f32.mrb[32].mxu0 }
 0xf44   : > { %v7254_v43 = vpop.f32.mrb[33].mxu0 }
 0xf45   : > { %v1490_v44 = vpop.f32.mrb[34].mxu0  ;;  %v1537_v45 = vpop.f32.mrb[36].mxu1 }
 0xf46   : > { %v7255_v46 = vpop.f32.mrb[35].mxu0  ;;  %1642 = vrot.lane.b32.xlu1 %v1537_v45, %s9780_s27  ;;  %v7260_v47 = vpop.f32.mrb[37].mxu1  ;;  %v7873_v44 = vld [vmem:[%s9706_s2 + $0x40] ss:$8 sps:$4 sm:$0xff]   ;;  %v7875_v45 = vld [vmem:[%s9706_s2 + $0x44] ss:$8 sps:$4 sm:$0xff]  }
 0xf47   : > { %v1540_v48 = vpop.f32.mrb[38].mxu1  ;;  %v7878_v46 = vld [vmem:[%s9706_s2 + $0x54] ss:$8 sps:$4 sm:$0xff]   ;;  %1914 = vmatprep.subr.bf16.mxu1 %v7875_v45  ;;  %v7876_v47 = vld [vmem:[%s9706_s2 + $0x50] ss:$8 sps:$4 sm:$0xff]  }
 0xf48   : > { %v7261_v49 = vpop.f32.mrb[39].mxu1 }
 0xf4b   : > { %v1585_v50 = vpop.f32.mrb[36].mxu0 }
 0xf4c   : > { %1646 = vrot.lane.b32.xlu0 %v1585_v50, %s9781_s10  ;;  %v7266_v52 = vpop.f32.mrb[37].mxu0 }
 0xf4d   : > { %v1588_v53 = vpop.f32.mrb[38].mxu0  ;;  %v1635_v54 = vpop.f32.mrb[40].mxu1 }
 0xf4e   : > { %v7267_v55 = vpop.f32.mrb[39].mxu0  ;;  %1650 = vrot.lane.b32.xlu1 %v1635_v54, %s9782_s9  ;;  %v7272_v56 = vpop.f32.mrb[41].mxu1 }
 0xf4f   : > { %v1638_v57 = vpop.f32.mrb[42].mxu1 }
 0xf50   : > { %v7273_v58 = vpop.f32.mrb[43].mxu1 }
 0xfb8   : > { %v1643_v59 = vpop.permute.xlu1 %1642 }
 0xfb9   : > { %v1653_v60 = vsel %vm422_vm2, %v1487_v42, %v1643_v59 }
 0xfbe   : > { %v1647_v61 = vpop.permute.xlu0 %1646 }
 0xfbf   : > { %v1654_v62 = vsel %vm877_vm4, %v1653_v60, %v1647_v61  ;;  %v8864_v61 = vld [vmem:[#allocation5] sm:$0xff] }
 0xfc0   : > { %v1651_v63 = vpop.permute.xlu1 %1650 }
 0xfc1   : > { %v1655_v1 = vsel %vm879_vm5, %v1654_v62, %v1651_v63 }
 0xfc2   : > { %v1656_v2 = vpack.c.bf16 %v1655_v1, %v1655_v1 }
 0xfc4   : > { %7279 = vmatmul.mubr.msk.bf16.vlgmr.msra.gmra.mrb[40].mxu0 %vm318_vm0, %v1656_v2 }
 0xfc5   : > { %7298 = vmatprep.mubr.msk.bf16.mxu0 %vm8320_vm1, %v8319_v23  ;;  %7291 = vmatpush3.bf16.msra.mxu0 %v7869_v20 }
 0xfc6   : > { %7292 = vmatprep.subr.bf16.mxu0 %v8319_v23 }
 0xfc9   : > { %7293 = vmatpush3.bf16.msra.mxu0 %v7870_v8 }
 0xfca   : > { %7294 = vmatprep.subr.bf16.mxu0 %v8319_v23 }
 0xfcd   : > { %7295 = vmatpush3.bf16.msra.mxu0 %v7871_v22 }
 0xfce   : > { %7296 = vmatprep.subr.bf16.mxu0 %v8319_v23 }
 0xfd1   : > { %7297 = vmatpush3.bf16.msra.mxu0 %v7872_v25 }
 0xfd2   : > { %7308 = vmatprep.subr.bf16.mxu0 %v8319_v23 }
0x1097   : > { %v1706_v3 = vpop.f32.mrb[40].mxu0 }
0x1098   : > { %v1712_v4 = vadd.f32 %v1706_v3, %v8699_v51  ;;  %v7280_v5 = vpop.f32.mrb[41].mxu0 }
0x1099   : > { %v1709_v6 = vpop.f32.mrb[42].mxu0 }
0x109a   : > { %v7281_v9 = vpop.f32.mrb[43].mxu0  ;;  %v1713_v10 = vmul.f32 %v1712_v4, %v1712_v4 }
0x109c   : > { %v1714_v11 = vsel %vm318_vm0, %v1713_v10, 0.0 }
0x109d   : > { %1715 = vadd.xlane.f32.xlu0 %v1714_v11 }
0x112a   : > { %v1716_v14 = vpop.xlane.xlu0 %1715 }
0x112b   : > { %v1717_v16 = vmul.f32 0.03125, %v1716_v14 }
0x112d   : > { %v1718_v17 = vadd.f32 1e-06, %v1717_v16 }
0x112f   : > { %7999 = vrsqrt.f32 %v1718_v17 }
0x1139   : > { %v8000_v18 = vpop.eup %7999 }
0x113a   : > { %v1720_v19 = vmul.f32 %v8000_v18, %v1712_v4 }
0x113c   : > { %v1721_v51 = vpack.c.bf16 %v1720_v19, %v1720_v19 }
0x113e   : > { %7287 = vmatmul.mubr.msk.bf16.vlgmr.msra.gmra.mrb[44].mxu1 %vm318_vm0, %v1721_v51 }
0x113f   : > { %1946 = vmatprep.mubr.bf16.mxu1 %v8315_v7  ;;  %1915 = vmatpush1.bf16.msra.mxu1 %v7873_v44 }
0x1140   : > { %1916 = vmatprep.subr.bf16.mxu1 %v7878_v46 }
0x1143   : > { %1917 = vmatpush1.bf16.msra.mxu1 %v7876_v47 }
0x1144   : > { %7302 = vmatprep.subr.bf16.mxu1 %v8319_v23 }
0x1211   : > { %v1771_v26 = vpop.f32.mrb[44].mxu1 }
0x1212   : > { %1785 = vrot.lane.b32.xlu1 %v1771_v26, %s9777_s12  ;;  %v7288_v27 = vpop.f32.mrb[45].mxu1  ;;  %v6678_v30 = vmul.f32 -1.442695, %v1771_v26 }
0x1213   : > { %v1774_v28 = vpop.f32.mrb[46].mxu1 }
0x1214   : > { %v7289_v29 = vpop.f32.mrb[47].mxu1  ;;  %8001 = vpow2.f32 %v6678_v30 }
0x121e   : > { %v8002_v31 = vpop.eup %8001 }
0x121f   : > { %v1780_v32 = vadd.f32 1.0, %v8002_v31 }
0x1221   : > { %8003 = vrcp.f32 %v1780_v32 }
0x122b   : > { %v8004_v33 = vpop.eup %8003 }
0x122c   : > { %v1783_v0 = vmul.f32 %v8004_v33, %v1771_v26 }
0x1284   : > { %v1786_v34 = vpop.permute.xlu1 %1785 }
0x1285   : > { %v1788_v35 = vmul.f32 %v1786_v34, %v1783_v0 }
0x1287   : > { %v1789_v36 = vpack.c.bf16 %v1788_v35, %v1788_v35 }
0x1289   : > { %7299 = vmatmul.mubr.msk.bf16.vlgmr.msra.gmra.mrb[44].mxu0 %vm1039_vm6, %v1789_v36 }
0x128a   : > { %7310 = vmatprep.mubr.msk.bf16.mxu0 %vm8320_vm1, %v8319_v23 }
0x135c   : > { %v1851_v37 = vpop.f32.mrb[44].mxu0 }
0x135d   : > { %v8835_v38 = vadd.f32 %v1851_v37, %v1712_v4  ;;  %v7300_v39 = vpop.f32.mrb[45].mxu0 }
0x135e   : > { %v1854_v40 = vpop.f32.mrb[46].mxu0 }
0x135f   : > { %v7301_v41 = vpop.f32.mrb[47].mxu0  ;;  %v1882_v42 = vmul.f32 %v8835_v38, %v8835_v38 }
0x1361   : > { %v1883_v43 = vsel %vm318_vm0, %v1882_v42, 0.0 }
0x1362   : > { %1884 = vadd.xlane.f32.xlu1 %v1883_v43 }
0x13ef   : > { %v1885_v48 = vpop.xlane.xlu1 %1884 }
0x13f0   : > { %v1886_v49 = vmul.f32 0.03125, %v1885_v48 }
0x13f2   : > { %v1887_v50 = vadd.f32 1e-06, %v1886_v49 }
0x13f4   : > { %8005 = vrsqrt.f32 %v1887_v50 }
0x13fe   : > { %v8006_v52 = vpop.eup %8005 }
0x13ff   : > { %v1889_v53 = vmul.f32 %v8006_v52, %v8835_v38 }
0x1401   : > { %v1890_v54 = vpack.c.bf16 %v1889_v53, %v1889_v53 }
0x1403   : > { %6704 = vmatmul.mubr.msk.bf16.vlgmr.msra.gmra.mrb[48].mxu1 %vm318_vm0, %v1890_v54 }
0x1404   : > { %7304 = vmatprep.mubr.msk.bf16.mxu1 %vm8320_vm1, %v8319_v23 }
0x14d6   : > { %v8857_v55 = vpop.f32.mrb[48].mxu1 }
0x14d7   : > { %v1950_v56 = vpop.f32.mrb[49].mxu1  ;;  %v1956_v57 = vmul.f32 %v8857_v55, %v8579_v21  ;;  %v1955_v62 = vmul.f32 %v8864_v61, %v8857_v55  ;;  %v1962_v1 = vmul.f32 %v8857_v55, %v8586_v24  ;;  %v1971_v42 = vpack.c.bf16 %v8857_v55, %v8857_v55 }
0x14d8   : > { %v1963_v58 = vmul.f32 %v1950_v56, %v8573_v15  ;;  %v1952_v59 = vpop.f32.mrb[50].mxu1 }
0x14d9   : > { %1958 = vrot.lane.b32.xlu1 %v1956_v57, %s9783_s4  ;;  %v1953_v60 = vpop.f32.mrb[51].mxu1 }
0x14da   : > { %1965 = vrot.lane.b32.xlu0 %v1963_v58, %s9783_s4 }
0x154b   : > { %v1959_v63 = vpop.permute.xlu1 %1958 }
0x154c   : > { %v1961_v2 = vadd.f32 %v1959_v63, %v1955_v62  ;;  %v1966_v3 = vpop.permute.xlu0 %1965 }
0x154d   : > { %v1968_v4 = vadd.f32 %v1966_v3, %v1962_v1 }
0x154e   : > { %v1969_v5 = vpack.c.bf16 %v1961_v2, %v1961_v2 }
0x154f   : > { %v1970_v6 = vpack.c.bf16 %v1968_v4, %v1968_v4 }
0x1550   : > { %2022 = vrot.lane.b32.xlu1 %v1969_v5, %s9784_s0 }
0x1551   : > { %1973 = vrot.lane.b32.xlu0 %v1970_v6, %s9785_s1 }
0x1554   : > { %2124 = vrot.lane.b32.xlu1 %v1970_v6, %s9786_s7 }
0x1555   : > { %2024 = vrot.lane.b32.xlu0 %v1970_v6, %s9787_s20 }
0x1558   : > { %2122 = vrot.lane.b32.xlu1 %v1969_v5, %s9788_s14 }
0x1559   : > { %2074 = vrot.lane.b32.xlu0 %v1970_v6, %s9774_s13 }
0x155d   : > { %2072 = vrot.lane.b32.xlu0 %v1969_v5, %s9775_s11 }
0x15c2   : > { %v2023_v11 = vpop.permute.xlu1 %2022 }
0x15c3   : > { %v1974_v9 = vpop.permute.xlu0 %1973 }
0x15c4   : > { %v1979_v10 = vsel %vm422_vm2, %v1974_v9, 0 }
0x15c5   : > { %7303 = vmatpush3.bf16.xpose.msra.mxu1 %v1979_v10 }
0x15c6   : > { %7314 = vmatprep.subr.bf16.mxu1 %v8319_v23  ;;  %v2125_v17 = vpop.permute.xlu1 %2124 }
0x15c7   : > { %v2025_v12 = vpop.permute.xlu0 %2024  ;;  %v2130_v18 = vsel %vm422_vm2, %v2125_v17, 0 }
0x15c8   : > { %v2030_v13 = vsel %vm422_vm2, %v2025_v12, 0 }
0x15c9   : > { %7309 = vmatpush3.bf16.xpose.msra.mxu0 %v2030_v13 }
0x15ca   : > { %7320 = vmatprep.subr.bf16.mxu0 %v8319_v23  ;;  %v2123_v51 = vpop.permute.xlu1 %2122 }
0x15cb   : > { %v2075_v14 = vpop.permute.xlu0 %2074 }
0x15cc   : > { %v2080_v16 = vsel %vm422_vm2, %v2075_v14, 0  ;;  %7305 = vmatmul.mubr.msk.bf16.vlgmr.msra.gmra.mrb[52].mxu1 %vm422_vm2, %v1969_v5 }
0x15cd   : > { %7315 = vmatpush3.bf16.xpose.msra.mxu1 %v2080_v16  ;;  %7316 = vmatprep.mubr.msk.bf16.mxu1 %vm8320_vm1, %v8319_v23 }
0x15ce   : > { %7326 = vmatprep.subr.bf16.mxu1 %v8319_v23 }
0x15cf   : > { %v2073_v19 = vpop.permute.xlu0 %2072 }
0x15d0   : > { %7311 = vmatmul.mubr.msk.bf16.vlgmr.msra.gmra.mrb[48].mxu0 %vm422_vm2, %v2023_v11 }
0x15d1   : > { %7321 = vmatpush3.bf16.xpose.msra.mxu0 %v2130_v18  ;;  %7322 = vmatprep.mubr.msk.bf16.mxu0 %vm8320_vm1, %v8319_v23 }
0x15d2   : > { %7332 = vmatprep.subr.bf16.mxu0 %v8319_v23 }
0x15d4   : > { %7317 = vmatmul.mubr.msk.bf16.vlgmr.msra.gmra.mrb[56].mxu1 %vm422_vm2, %v2073_v19 }
0x15d5   : > { %7328 = vmatprep.mubr.msk.bf16.mxu1 %vm8320_vm1, %v8319_v23 }
0x15d8   : > { %7323 = vmatmul.mubr.msk.bf16.vlgmr.msra.gmra.mrb[52].mxu0 %vm422_vm2, %v2123_v51 }
0x15d9   : > { %7334 = vmatprep.mubr.msk.bf16.mxu0 %vm8320_vm1, %v8319_v23 }
0x169f   : > { %v2015_v20 = vpop.f32.mrb[52].mxu1 }
0x16a0   : > { %v7306_v8 = vpop.f32.mrb[53].mxu1  ;;  %v2172_v22 = vsel %vm422_vm2, %v2015_v20, -inf }
0x16a1   : > { %2173 = vmax.xlane.f32.xlu0 %v2172_v22  ;;  %v2018_v25 = vpop.f32.mrb[54].mxu1 }
0x16a2   : > { %v7307_v26 = vpop.f32.mrb[55].mxu1 }
0x16a3   : > { %v2066_v27 = vpop.f32.mrb[48].mxu0 }
0x16a4   : > { %v7312_v28 = vpop.f32.mrb[49].mxu0  ;;  %v2175_v29 = vsel %vm422_vm2, %v2066_v27, -inf }
0x16a5   : > { %2176 = vmax.xlane.f32.xlu1 %v2175_v29  ;;  %v2069_v30 = vpop.f32.mrb[50].mxu0 }
0x16a6   : > { %v7313_v31 = vpop.f32.mrb[51].mxu0  ;;  %v7879_v30 = vld [vmem:[%s9707_s3 + $0x20] sm:$0xff]  }
0x16a7   : > { %v2116_v32 = vpop.f32.mrb[56].mxu1  ;;  %v7880_v31 = vld [vmem:[%s9707_s3 + $0x28] sm:$0xff]  }
0x16a8   : > { %v7318_v33 = vpop.f32.mrb[57].mxu1  ;;  %v2178_v0 = vsel %vm422_vm2, %v2116_v32, -inf }
0x16a9   : > { %2179 = vmax.xlane.f32.xlu0 %v2178_v0  ;;  %v2119_v34 = vpop.f32.mrb[58].mxu1 }
0x16aa   : > { %v7319_v35 = vpop.f32.mrb[59].mxu1 }
0x16ab   : > { %v2166_v36 = vpop.f32.mrb[52].mxu0 }
0x16ac   : > { %v7324_v37 = vpop.f32.mrb[53].mxu0  ;;  %v2181_v39 = vsel %vm422_vm2, %v2166_v36, -inf }
0x16ad   : > { %v2169_v40 = vpop.f32.mrb[54].mxu0  ;;  %2182 = vmax.xlane.f32.xlu0 %v2181_v39 }
0x16ae   : > { %v7325_v41 = vpop.f32.mrb[55].mxu0 }
0x16b6   : > { %2219 = vrot.lane.b32.xlu1 %v1971_v42, %s9777_s12 }
0x172e   : > { %v2174_v43 = vpop.xlane.xlu0 %2173 }
0x172f   : > { %v2184_v44 = vsub.f32 %v2015_v20, %v2174_v43 }
0x1731   : > { %v2188_v45 = vmul.f32 1.442695, %v2184_v44 }
0x1732   : > { %v2177_v46 = vpop.xlane.xlu1 %2176 }
0x1733   : > { %8007 = vpow2.f32 %v2188_v45  ;;  %v2185_v47 = vsub.f32 %v2066_v27, %v2177_v46 }
0x1735   : > { %v2190_v48 = vmul.f32 1.442695, %v2185_v47 }
0x1736   : > { %v2220_v49 = vpop.permute.xlu1 %2219  ;;  %v2180_v50 = vpop.xlane.xlu0 %2179 }
0x1737   : > { %8009 = vpow2.f32 %v2190_v48  ;;  %v2225_v52 = vsel %vm672_vm3, %v2220_v49, 0  ;;  %v2186_v53 = vsub.f32 %v2116_v32, %v2180_v50 }
0x1738   : > { %7327 = vmatpush3.bf16.msra.mxu1 %v2225_v52 }
0x1739   : > { %v2192_v54 = vmul.f32 1.442695, %v2186_v53  ;;  %7338 = vmatprep.subr.bf16.mxu1 %v8319_v23 }
0x173a   : > { %v2183_v55 = vpop.xlane.xlu0 %2182 }
0x173b   : > { %8011 = vpow2.f32 %v2192_v54  ;;  %v2187_v56 = vsub.f32 %v2166_v36, %v2183_v55 }
0x173d   : > { %v8008_v57 = vpop.eup %8007  ;;  %v2194_v58 = vmul.f32 1.442695, %v2187_v56 }
0x173e   : > { %v2196_v59 = vsel %vm422_vm2, %v8008_v57, 0.0 }
0x173f   : > { %8013 = vpow2.f32 %v2194_v58  ;;  %2197 = vadd.xlane.f32.xlu1 %v2196_v59 }
0x1741   : > { %v8010_v60 = vpop.eup %8009 }
0x1742   : > { %v2199_v62 = vsel %vm422_vm2, %v8010_v60, 0.0 }
0x1743   : > { %2200 = vadd.xlane.f32.xlu0 %v2199_v62 }
0x1745   : > { %v8012_v63 = vpop.eup %8011 }
0x1746   : > { %v2202_v1 = vsel %vm422_vm2, %v8012_v63, 0.0 }
0x1747   : > { %2203 = vadd.xlane.f32.xlu1 %v2202_v1  ;;  %v7881_v1 = vld [vmem:[#allocation7 + $0x20] sm:$0xff]  }
0x1749   : > { %v8014_v2 = vpop.eup %8013 }
0x174a   : > { %v2205_v3 = vsel %vm422_vm2, %v8014_v2, 0.0 }
0x174b   : > { %2206 = vadd.xlane.f32.xlu0 %v2205_v3 }
0x1758   : > { %2317 = vrot.lane.b32.xlu1 %v1971_v42, %s9778_s26 }
0x175c   : > { %2367 = vrot.lane.b32.xlu1 %v1971_v42, %s9779_s16 }
0x1761   : > { %2269 = vrot.lane.b32.xlu0 %v1971_v42, %s9776_s29 }
0x17cc   : > { %v2198_v4 = vpop.xlane.xlu1 %2197 }
0x17cd   : > { %8015 = vrcp.f32 %v2198_v4 }
0x17d0   : > { %v2201_v5 = vpop.xlane.xlu0 %2200 }
0x17d1   : > { %8017 = vrcp.f32 %v2201_v5 }
0x17d4   : > { %v2204_v6 = vpop.xlane.xlu1 %2203 }
0x17d5   : > { %8019 = vrcp.f32 %v2204_v6 }
0x17d7   : > { %v8016_v10 = vpop.eup %8015 }
0x17d8   : > { %v2207_v9 = vpop.xlane.xlu0 %2206  ;;  %v2318_v11 = vpop.permute.xlu1 %2317  ;;  %v2212_v13 = vmul.f32 %v8016_v10, %v8008_v57  ;;  %v7883_v10 = vld [vmem:[%s9709_s5 + $0x40] sm:$0xff]  }
0x17d9   : > { %8021 = vrcp.f32 %v2207_v9  ;;  %v2323_v51 = vsel %vm672_vm3, %v2318_v11, 0  ;;  %v7884_v11 = vld [vmem:[%s9709_s5 + $0x48] sm:$0xff]  }
0x17db   : > { %v8018_v12 = vpop.eup %8017 }
0x17dc   : > { %v2213_v14 = vmul.f32 %v8018_v12, %v8010_v60  ;;  %v2270_v16 = vpop.permute.xlu0 %2269  ;;  %v2368_v19 = vpop.permute.xlu1 %2367  ;;  %v7885_v12 = vld [vmem:[%s9709_s5 + $0x50] sm:$0xff]  }
0x17dd   : > { %v2275_v17 = vsel %vm672_vm3, %v2270_v16, 0  ;;  %v2373_v22 = vsel %vm672_vm3, %v2368_v19, 0 }
0x17de   : > { %7333 = vmatpush3.bf16.msra.mxu0 %v2275_v17  ;;  %v2216_v18 = vpack.c.bf16 %v2213_v14, %v2212_v13  ;;  %v7886_v13 = vld [vmem:[%s9709_s5 + $0x58] sm:$0xff]  }
0x17df   : > { %7344 = vmatprep.subr.bf16.mxu0 %v8319_v23  ;;  %v8020_v8 = vpop.eup %8019 }
0x17e0   : > { %7329 = vmatmul.mubr.msk.bf16.vlgmr.msra.gmra.mrb[60].mxu1 %vm422_vm2, %v2216_v18  ;;  %v2268_v20 = vrot.slane %v2216_v18, 4  ;;  %v2214_v26 = vmul.f32 %v8020_v8, %v8012_v63 }
0x17e1   : > { %7339 = vmatpush3.bf16.msra.mxu1 %v2323_v51  ;;  %7340 = vmatprep.mubr.msk.bf16.mxu1 %vm8320_vm1, %v8319_v23 }
0x17e2   : > { %7335 = vmatmul.mubr.msk.bf16.vlgmr.msra.gmra.mrb[56].mxu0 %vm422_vm2, %v2268_v20  ;;  %7350 = vmatprep.subr.bf16.mxu1 %v8319_v23 }
0x17e3   : > { %v8022_v25 = vpop.eup %8021  ;;  %7345 = vmatpush3.bf16.msra.mxu0 %v2373_v22  ;;  %7346 = vmatprep.mubr.msk.bf16.mxu0 %vm8320_vm1, %v8319_v23 }
0x17e4   : > { %v2215_v27 = vmul.f32 %v8022_v25, %v8014_v2  ;;  %7358 = vmatprep.subr.bf16.mxu0 %v8319_v23  ;;  %v7882_v2 = vld [vmem:[#allocation7 + $0x28] sm:$0xff]  }
0x17e6   : > { %v2217_v28 = vpack.c.bf16 %v2215_v27, %v2214_v26 }
0x17e8   : > { %7341 = vmatmul.mubr.msk.bf16.vlgmr.msra.gmra.mrb[64].mxu1 %vm422_vm2, %v2217_v28  ;;  %v2366_v29 = vrot.slane %v2217_v28, 4 }
0x17e9   : > { %7354 = vmatprep.mubr.msk.bf16.mxu1 %vm8320_vm1, %v8319_v23  ;;  %7351 = vmatpush3.bf16.msra.mxu1 %v7879_v30 }
0x17ea   : > { %7347 = vmatmul.mubr.msk.bf16.vlgmr.msra.gmra.mrb[60].mxu0 %vm422_vm2, %v2366_v29  ;;  %7352 = vmatprep.subr.bf16.mxu1 %v8319_v23 }
0x17eb   : > { %7362 = vmatprep.mubr.msk.bf16.mxu0 %vm8320_vm1, %v8319_v23  ;;  %7359 = vmatpush3.bf16.msra.mxu0 %v7881_v1 }
0x17ec   : > { %7360 = vmatprep.subr.bf16.mxu0 %v8319_v23 }
0x17ed   : > { %7353 = vmatpush3.bf16.msra.mxu1 %v7880_v31 }
0x17ee   : > { %7366 = vmatprep.subr.bf16.mxu1 %v8319_v23 }
0x17ef   : > { %7361 = vmatpush3.bf16.msra.mxu0 %v7882_v2 }
0x18b3   : > { %v2261_v32 = vpop.f32.mrb[60].mxu1 }
0x18b4   : > { %v7330_v33 = vpop.f32.mrb[61].mxu1 }
0x18b5   : > { %v2264_v0 = vpop.f32.mrb[62].mxu1  ;;  %v2311_v34 = vpop.f32.mrb[56].mxu0 }
0x18b6   : > { %2416 = vrot.lane.b32.xlu0 %v2311_v34, %s9780_s27  ;;  %v7331_v35 = vpop.f32.mrb[63].mxu1  ;;  %v7336_v36 = vpop.f32.mrb[57].mxu0  ;;  %v7887_v34 = vld [vmem:[%s9706_s2 + $0x60] ss:$8 sps:$4 sm:$0xff]  }
0x18b7   : > { %v2314_v37 = vpop.f32.mrb[58].mxu0  ;;  %v7889_v35 = vld [vmem:[%s9706_s2 + $0x64] ss:$8 sps:$4 sm:$0xff]   ;;  %v7892_v36 = vld [vmem:[%s9706_s2 + $0x74] ss:$8 sps:$4 sm:$0xff]  }
0x18b8   : > { %v7337_v39 = vpop.f32.mrb[59].mxu0  ;;  %2688 = vmatprep.subr.bf16.mxu0 %v7889_v35  ;;  %v7890_v37 = vld [vmem:[%s9706_s2 + $0x70] ss:$8 sps:$4 sm:$0xff]  }
0x18bb   : > { %v2359_v40 = vpop.f32.mrb[64].mxu1 }
0x18bc   : > { %2420 = vrot.lane.b32.xlu1 %v2359_v40, %s9781_s10  ;;  %v7342_v41 = vpop.f32.mrb[65].mxu1 }
0x18bd   : > { %v2362_v42 = vpop.f32.mrb[66].mxu1  ;;  %v2409_v43 = vpop.f32.mrb[60].mxu0 }
0x18be   : > { %2424 = vrot.lane.b32.xlu0 %v2409_v43, %s9782_s9  ;;  %v7343_v44 = vpop.f32.mrb[67].mxu1  ;;  %v7348_v45 = vpop.f32.mrb[61].mxu0 }
0x18bf   : > { %v2412_v46 = vpop.f32.mrb[62].mxu0 }
0x18c0   : > { %v7349_v47 = vpop.f32.mrb[63].mxu0 }
0x1928   : > { %v2417_v48 = vpop.permute.xlu0 %2416 }
0x1929   : > { %v2427_v49 = vsel %vm422_vm2, %v2261_v32, %v2417_v48 }
0x192e   : > { %v2421_v50 = vpop.permute.xlu1 %2420 }
0x192f   : > { %v2428_v52 = vsel %vm877_vm4, %v2427_v49, %v2421_v50 }
0x1930   : > { %v2425_v53 = vpop.permute.xlu0 %2424 }
0x1931   : > { %v2429_v54 = vsel %vm879_vm5, %v2428_v52, %v2425_v53 }
0x1932   : > { %v2430_v55 = vpack.c.bf16 %v2429_v54, %v2429_v54 }
0x1934   : > { %7355 = vmatmul.mubr.msk.bf16.vlgmr.msra.gmra.mrb[68].mxu1 %vm318_vm0, %v2430_v55 }
0x1935   : > { %7374 = vmatprep.mubr.msk.bf16.mxu1 %vm8320_vm1, %v8319_v23  ;;  %7367 = vmatpush3.bf16.msra.mxu1 %v7883_v10 }
0x1936   : > { %7368 = vmatprep.subr.bf16.mxu1 %v8319_v23 }
0x1939   : > { %7369 = vmatpush3.bf16.msra.mxu1 %v7884_v11 }
0x193a   : > { %7370 = vmatprep.subr.bf16.mxu1 %v8319_v23 }
0x193d   : > { %7371 = vmatpush3.bf16.msra.mxu1 %v7885_v12 }
0x193e   : > { %7372 = vmatprep.subr.bf16.mxu1 %v8319_v23 }
0x1941   : > { %7373 = vmatpush3.bf16.msra.mxu1 %v7886_v13 }
0x1942   : > { %7384 = vmatprep.subr.bf16.mxu1 %v8319_v23 }
0x1a07   : > { %v2480_v56 = vpop.f32.mrb[68].mxu1 }
0x1a08   : > { %v2486_v57 = vadd.f32 %v2480_v56, %v8835_v38  ;;  %v7356_v58 = vpop.f32.mrb[69].mxu1 }
0x1a09   : > { %v2483_v59 = vpop.f32.mrb[70].mxu1 }
0x1a0a   : > { %v7357_v60 = vpop.f32.mrb[71].mxu1  ;;  %v2487_v62 = vmul.f32 %v2486_v57, %v2486_v57 }
0x1a0c   : > { %v2488_v63 = vsel %vm318_vm0, %v2487_v62, 0.0 }
0x1a0d   : > { %2489 = vadd.xlane.f32.xlu1 %v2488_v63 }
0x1a9a   : > { %v2490_v3 = vpop.xlane.xlu1 %2489 }
0x1a9b   : > { %v2491_v4 = vmul.f32 0.03125, %v2490_v3 }
0x1a9d   : > { %v2492_v5 = vadd.f32 1e-06, %v2491_v4 }
0x1a9f   : > { %8023 = vrsqrt.f32 %v2492_v5 }
0x1aa9   : > { %v8024_v6 = vpop.eup %8023 }
0x1aaa   : > { %v2494_v9 = vmul.f32 %v8024_v6, %v2486_v57 }
0x1aac   : > { %v2495_v38 = vpack.c.bf16 %v2494_v9, %v2494_v9 }
0x1aae   : > { %7363 = vmatmul.mubr.msk.bf16.vlgmr.msra.gmra.mrb[64].mxu0 %vm318_vm0, %v2495_v38 }
0x1aaf   : > { %2720 = vmatprep.mubr.bf16.mxu0 %v8315_v7  ;;  %2689 = vmatpush1.bf16.msra.mxu0 %v7887_v34 }
0x1ab0   : > { %2690 = vmatprep.subr.bf16.mxu0 %v7892_v36 }
0x1ab3   : > { %2691 = vmatpush1.bf16.msra.mxu0 %v7890_v37 }
0x1ab4   : > { %7378 = vmatprep.subr.bf16.mxu0 %v8319_v23 }
0x1b81   : > { %v2545_v14 = vpop.f32.mrb[64].mxu0 }
0x1b82   : > { %2559 = vrot.lane.b32.xlu0 %v2545_v14, %s9777_s12  ;;  %v7364_v16 = vpop.f32.mrb[65].mxu0  ;;  %v6719_v19 = vmul.f32 -1.442695, %v2545_v14 }
0x1b83   : > { %v2548_v17 = vpop.f32.mrb[66].mxu0 }
0x1b84   : > { %v7365_v18 = vpop.f32.mrb[67].mxu0  ;;  %8025 = vpow2.f32 %v6719_v19 }
0x1b8e   : > { %v8026_v51 = vpop.eup %8025 }
0x1b8f   : > { %v2554_v20 = vadd.f32 1.0, %v8026_v51 }
0x1b91   : > { %8027 = vrcp.f32 %v2554_v20 }
0x1b9b   : > { %v8028_v8 = vpop.eup %8027 }
0x1b9c   : > { %v2557_v22 = vmul.f32 %v8028_v8, %v2545_v14 }
0x1bf4   : > { %v2560_v25 = vpop.permute.xlu0 %2559 }
0x1bf5   : > { %v2562_v26 = vmul.f32 %v2560_v25, %v2557_v22 }
0x1bf7   : > { %v2563_v27 = vpack.c.bf16 %v2562_v26, %v2562_v26 }
0x1bf9   : > { %7375 = vmatmul.mubr.msk.bf16.vlgmr.msra.gmra.mrb[72].mxu1 %vm1039_vm6, %v2563_v27 }
0x1bfa   : > { %7386 = vmatprep.mubr.msk.bf16.mxu1 %vm8320_vm1, %v8319_v23 }
0x1ccc   : > { %v2625_v28 = vpop.f32.mrb[72].mxu1 }
0x1ccd   : > { %v8973_v29 = vadd.f32 %v2625_v28, %v2486_v57  ;;  %v7376_v30 = vpop.f32.mrb[73].mxu1 }
0x1cce   : > { %v2628_v31 = vpop.f32.mrb[74].mxu1 }
0x1ccf   : > { %v7377_v32 = vpop.f32.mrb[75].mxu1  ;;  %v2656_v33 = vmul.f32 %v8973_v29, %v8973_v29 }
0x1cd1   : > { %v2657_v0 = vsel %vm318_vm0, %v2656_v33, 0.0 }
0x1cd2   : > { %2658 = vadd.xlane.f32.xlu0 %v2657_v0 }
0x1d5f   : > { %v2659_v39 = vpop.xlane.xlu0 %2658 }
0x1d60   : > { %v2660_v40 = vmul.f32 0.03125, %v2659_v39 }
0x1d62   : > { %v2661_v41 = vadd.f32 1e-06, %v2660_v40 }
0x1d64   : > { %8029 = vrsqrt.f32 %v2661_v41 }
0x1d6e   : > { %v8030_v42 = vpop.eup %8029 }
0x1d6f   : > { %v2663_v43 = vmul.f32 %v8030_v42, %v8973_v29 }
0x1d71   : > { %v2664_v44 = vpack.c.bf16 %v2663_v43, %v2663_v43 }
0x1d73   : > { %6745 = vmatmul.mubr.msk.bf16.vlgmr.msra.gmra.mrb[68].mxu0 %vm318_vm0, %v2664_v44 }
0x1d74   : > { %7380 = vmatprep.mubr.msk.bf16.mxu0 %vm8320_vm1, %v8319_v23 }
0x1e46   : > { %v8995_v45 = vpop.f32.mrb[68].mxu0 }
0x1e47   : > { %v2724_v46 = vpop.f32.mrb[69].mxu0  ;;  %v2730_v47 = vmul.f32 %v8995_v45, %v8579_v21  ;;  %v2729_v52 = vmul.f32 %v8864_v61, %v8995_v45  ;;  %v2736_v54 = vmul.f32 %v8995_v45, %v8586_v24  ;;  %v2745_v32 = vpack.c.bf16 %v8995_v45, %v8995_v45 }
0x1e48   : > { %v2737_v48 = vmul.f32 %v2724_v46, %v8573_v15  ;;  %v2726_v49 = vpop.f32.mrb[70].mxu0 }
0x1e49   : > { %2732 = vrot.lane.b32.xlu0 %v2730_v47, %s9783_s4  ;;  %v2727_v50 = vpop.f32.mrb[71].mxu0 }
0x1e4a   : > { %2739 = vrot.lane.b32.xlu1 %v2737_v48, %s9783_s4 }
0x1ebb   : > { %v2733_v53 = vpop.permute.xlu0 %2732 }
0x1ebc   : > { %v2735_v55 = vadd.f32 %v2733_v53, %v2729_v52  ;;  %v2740_v56 = vpop.permute.xlu1 %2739 }
0x1ebd   : > { %v2742_v57 = vadd.f32 %v2740_v56, %v2736_v54 }
0x1ebe   : > { %v2743_v58 = vpack.c.bf16 %v2735_v55, %v2735_v55 }
0x1ebf   : > { %v2744_v59 = vpack.c.bf16 %v2742_v57, %v2742_v57 }
0x1ec0   : > { %2796 = vrot.lane.b32.xlu0 %v2743_v58, %s9784_s0 }
0x1ec1   : > { %2747 = vrot.lane.b32.xlu1 %v2744_v59, %s9785_s1 }
0x1ec4   : > { %2898 = vrot.lane.b32.xlu0 %v2744_v59, %s9786_s7 }
0x1ec5   : > { %2798 = vrot.lane.b32.xlu1 %v2744_v59, %s9787_s20 }
0x1ec8   : > { %2896 = vrot.lane.b32.xlu0 %v2743_v58, %s9788_s14 }
0x1ec9   : > { %2848 = vrot.lane.b32.xlu1 %v2744_v59, %s9774_s13 }
0x1ecd   : > { %2846 = vrot.lane.b32.xlu1 %v2743_v58, %s9775_s11 }
0x1f32   : > { %v2797_v62 = vpop.permute.xlu0 %2796 }
0x1f33   : > { %v2748_v61 = vpop.permute.xlu1 %2747 }
0x1f34   : > { %v2753_v60 = vsel %vm422_vm2, %v2748_v61, 0 }
0x1f35   : > { %7379 = vmatpush3.bf16.xpose.msra.mxu0 %v2753_v60 }
0x1f36   : > { %7390 = vmatprep.subr.bf16.mxu0 %v8319_v23  ;;  %v2899_v4 = vpop.permute.xlu0 %2898 }
0x1f37   : > { %v2799_v63 = vpop.permute.xlu1 %2798  ;;  %v2904_v5 = vsel %vm422_vm2, %v2899_v4, 0 }
0x1f38   : > { %v2804_v1 = vsel %vm422_vm2, %v2799_v63, 0 }
0x1f39   : > { %7385 = vmatpush3.bf16.xpose.msra.mxu1 %v2804_v1 }
0x1f3a   : > { %7396 = vmatprep.subr.bf16.mxu1 %v8319_v23  ;;  %v2897_v9 = vpop.permute.xlu0 %2896 }
0x1f3b   : > { %v2849_v2 = vpop.permute.xlu1 %2848 }
0x1f3c   : > { %v2854_v3 = vsel %vm422_vm2, %v2849_v2, 0  ;;  %7381 = vmatmul.mubr.msk.bf16.vlgmr.msra.gmra.mrb[72].mxu0 %vm422_vm2, %v2743_v58 }
0x1f3d   : > { %7391 = vmatpush3.bf16.xpose.msra.mxu0 %v2854_v3  ;;  %7392 = vmatprep.mubr.msk.bf16.mxu0 %vm8320_vm1, %v8319_v23 }
0x1f3e   : > { %7402 = vmatprep.subr.bf16.mxu0 %v8319_v23 }
0x1f3f   : > { %v2847_v6 = vpop.permute.xlu1 %2846 }
0x1f40   : > { %7387 = vmatmul.mubr.msk.bf16.vlgmr.msra.gmra.mrb[76].mxu1 %vm422_vm2, %v2797_v62 }
0x1f41   : > { %7397 = vmatpush3.bf16.xpose.msra.mxu1 %v2904_v5  ;;  %7398 = vmatprep.mubr.msk.bf16.mxu1 %vm8320_vm1, %v8319_v23 }
0x1f42   : > { %7408 = vmatprep.subr.bf16.mxu1 %v8319_v23 }
0x1f44   : > { %7393 = vmatmul.mubr.msk.bf16.vlgmr.msra.gmra.mrb[76].mxu0 %vm422_vm2, %v2847_v6 }
0x1f45   : > { %7404 = vmatprep.mubr.msk.bf16.mxu0 %vm8320_vm1, %v8319_v23 }
0x1f48   : > { %7399 = vmatmul.mubr.msk.bf16.vlgmr.msra.gmra.mrb[80].mxu1 %vm422_vm2, %v2897_v9 }
0x1f49   : > { %7410 = vmatprep.mubr.msk.bf16.mxu1 %vm8320_vm1, %v8319_v23 }
0x200f   : > { %v2789_v38 = vpop.f32.mrb[72].mxu0 }
0x2010   : > { %v7382_v10 = vpop.f32.mrb[73].mxu0  ;;  %v2946_v11 = vsel %vm422_vm2, %v2789_v38, -inf }
0x2011   : > { %2947 = vmax.xlane.f32.xlu1 %v2946_v11  ;;  %v2792_v12 = vpop.f32.mrb[74].mxu0 }
0x2012   : > { %v7383_v13 = vpop.f32.mrb[75].mxu0 }
0x2013   : > { %v2840_v14 = vpop.f32.mrb[76].mxu1 }
0x2014   : > { %v7388_v16 = vpop.f32.mrb[77].mxu1  ;;  %v2949_v17 = vsel %vm422_vm2, %v2840_v14, -inf }
0x2015   : > { %2950 = vmax.xlane.f32.xlu0 %v2949_v17  ;;  %v2843_v18 = vpop.f32.mrb[78].mxu1  ;;  %v7893_v17 = vld [vmem:[%s9707_s3 + $0x30] sm:$0xff]  }
0x2016   : > { %v7389_v19 = vpop.f32.mrb[79].mxu1  ;;  %v7894_v18 = vld [vmem:[%s9707_s3 + $0x38] sm:$0xff]  }
0x2017   : > { %v2890_v51 = vpop.f32.mrb[76].mxu0 }
0x2018   : > { %v7394_v20 = vpop.f32.mrb[77].mxu0  ;;  %v2952_v8 = vsel %vm422_vm2, %v2890_v51, -inf }
0x2019   : > { %v2893_v22 = vpop.f32.mrb[78].mxu0  ;;  %2953 = vmax.xlane.f32.xlu0 %v2952_v8 }
0x201a   : > { %v7395_v25 = vpop.f32.mrb[79].mxu0 }
0x201b   : > { %v2940_v26 = vpop.f32.mrb[80].mxu1 }
0x201c   : > { %v7400_v27 = vpop.f32.mrb[81].mxu1  ;;  %v2955_v28 = vsel %vm422_vm2, %v2940_v26, -inf }
0x201d   : > { %2956 = vmax.xlane.f32.xlu1 %v2955_v28  ;;  %v2943_v30 = vpop.f32.mrb[82].mxu1 }
0x201e   : > { %v7401_v31 = vpop.f32.mrb[83].mxu1 }
0x202e   : > { %3043 = vrot.lane.b32.xlu1 %v2745_v32, %s9776_s29 }
0x202f   : > { %2993 = vrot.lane.b32.xlu0 %v2745_v32, %s9777_s12 }
0x209e   : > { %v2948_v33 = vpop.xlane.xlu1 %2947 }
0x209f   : > { %v2958_v0 = vsub.f32 %v2789_v38, %v2948_v33 }
0x20a1   : > { %v2962_v34 = vmul.f32 1.442695, %v2958_v0 }
0x20a2   : > { %v2951_v35 = vpop.xlane.xlu0 %2950 }
0x20a3   : > { %8031 = vpow2.f32 %v2962_v34  ;;  %v2959_v36 = vsub.f32 %v2840_v14, %v2951_v35 }
0x20a5   : > { %v2964_v37 = vmul.f32 1.442695, %v2959_v36 }
0x20a6   : > { %v2954_v39 = vpop.xlane.xlu0 %2953 }
0x20a7   : > { %8033 = vpow2.f32 %v2964_v37  ;;  %v2960_v40 = vsub.f32 %v2890_v51, %v2954_v39 }
0x20a9   : > { %v2966_v41 = vmul.f32 1.442695, %v2960_v40 }
0x20aa   : > { %v2994_v42 = vpop.permute.xlu0 %2993  ;;  %v2957_v43 = vpop.xlane.xlu1 %2956 }
0x20ab   : > { %8035 = vpow2.f32 %v2966_v41  ;;  %v2999_v44 = vsel %vm672_vm3, %v2994_v42, 0  ;;  %v2961_v45 = vsub.f32 %v2940_v26, %v2957_v43 }
0x20ac   : > { %7403 = vmatpush3.bf16.msra.mxu0 %v2999_v44 }
0x20ad   : > { %v8032_v46 = vpop.eup %8031  ;;  %v2968_v47 = vmul.f32 1.442695, %v2961_v45  ;;  %7414 = vmatprep.subr.bf16.mxu0 %v8319_v23 }
0x20ae   : > { %v3044_v48 = vpop.permute.xlu1 %3043  ;;  %v2970_v49 = vsel %vm422_vm2, %v8032_v46, 0.0 }
0x20af   : > { %8037 = vpow2.f32 %v2968_v47  ;;  %v3049_v50 = vsel %vm672_vm3, %v3044_v48, 0  ;;  %2971 = vadd.xlane.f32.xlu0 %v2970_v49 }
0x20b0   : > { %7409 = vmatpush3.bf16.msra.mxu1 %v3049_v50 }
0x20b1   : > { %v8034_v52 = vpop.eup %8033  ;;  %7420 = vmatprep.subr.bf16.mxu1 %v8319_v23 }
0x20b2   : > { %v2973_v53 = vsel %vm422_vm2, %v8034_v52, 0.0 }
0x20b3   : > { %2974 = vadd.xlane.f32.xlu1 %v2973_v53  ;;  %v7896_v53 = vld [vmem:[#allocation7 + $0x38] sm:$0xff]  }
0x20b5   : > { %v8036_v54 = vpop.eup %8035 }
0x20b6   : > { %v2976_v55 = vsel %vm422_vm2, %v8036_v54, 0.0 }
0x20b7   : > { %2977 = vadd.xlane.f32.xlu0 %v2976_v55 }
0x20b9   : > { %v8038_v56 = vpop.eup %8037 }
0x20ba   : > { %v2979_v57 = vsel %vm422_vm2, %v8038_v56, 0.0 }
0x20bb   : > { %2980 = vadd.xlane.f32.xlu1 %v2979_v57 }
0x20cc   : > { %3091 = vrot.lane.b32.xlu1 %v2745_v32, %s9778_s26 }
0x20cd   : > { %3141 = vrot.lane.b32.xlu0 %v2745_v32, %s9779_s16 }
0x213c   : > { %v2972_v58 = vpop.xlane.xlu0 %2971 }
0x213d   : > { %8039 = vrcp.f32 %v2972_v58 }
0x2140   : > { %v2975_v59 = vpop.xlane.xlu1 %2974 }
0x2141   : > { %8041 = vrcp.f32 %v2975_v59  ;;  %v7897_v59 = vld [vmem:[%s9709_s5 + $0x60] sm:$0xff]  }
0x2144   : > { %v2978_v61 = vpop.xlane.xlu0 %2977 }
0x2145   : > { %8043 = vrcp.f32 %v2978_v61  ;;  %v7898_v61 = vld [vmem:[%s9709_s5 + $0x68] sm:$0xff]  }
0x2147   : > { %v8040_v62 = vpop.eup %8039 }
0x2148   : > { %v2981_v60 = vpop.xlane.xlu1 %2980  ;;  %v2986_v1 = vmul.f32 %v8040_v62, %v8032_v46  ;;  %v3142_v5 = vpop.permute.xlu0 %3141  ;;  %v7900_v62 = vld [vmem:[%s9709_s5 + $0x78] sm:$0xff]  }
0x2149   : > { %8045 = vrcp.f32 %v2981_v60  ;;  %v3147_v10 = vsel %vm672_vm3, %v3142_v5, 0  ;;  %v7899_v60 = vld [vmem:[%s9709_s5 + $0x70] sm:$0xff]  }
0x214b   : > { %v8042_v63 = vpop.eup %8041 }
0x214c   : > { %v2987_v2 = vmul.f32 %v8042_v63, %v8034_v52  ;;  %v3092_v3 = vpop.permute.xlu1 %3091  ;;  %v7895_v52 = vld [vmem:[#allocation7 + $0x30] sm:$0xff]  }
0x214d   : > { %v3097_v6 = vsel %vm672_vm3, %v3092_v3, 0 }
0x214e   : > { %v2990_v4 = vpack.c.bf16 %v2987_v2, %v2986_v1 }
0x214f   : > { %v8044_v38 = vpop.eup %8043 }
0x2150   : > { %7405 = vmatmul.mubr.msk.bf16.vlgmr.msra.gmra.mrb[80].mxu0 %vm422_vm2, %v2990_v4  ;;  %v3042_v9 = vrot.slane %v2990_v4, 4  ;;  %v2988_v12 = vmul.f32 %v8044_v38, %v8036_v54 }
0x2151   : > { %7415 = vmatpush3.bf16.msra.mxu0 %v3097_v6  ;;  %7416 = vmatprep.mubr.msk.bf16.mxu0 %vm8320_vm1, %v8319_v23 }
0x2152   : > { %7411 = vmatmul.mubr.msk.bf16.vlgmr.msra.gmra.mrb[84].mxu1 %vm422_vm2, %v3042_v9  ;;  %7426 = vmatprep.subr.bf16.mxu0 %v8319_v23 }
0x2153   : > { %v8046_v11 = vpop.eup %8045  ;;  %7421 = vmatpush3.bf16.msra.mxu1 %v3147_v10  ;;  %7422 = vmatprep.mubr.msk.bf16.mxu1 %vm8320_vm1, %v8319_v23 }
0x2154   : > { %v2989_v13 = vmul.f32 %v8046_v11, %v8038_v56  ;;  %7434 = vmatprep.subr.bf16.mxu1 %v8319_v23 }
0x2156   : > { %v2991_v14 = vpack.c.bf16 %v2989_v13, %v2988_v12 }
0x2158   : > { %7417 = vmatmul.mubr.msk.bf16.vlgmr.msra.gmra.mrb[84].mxu0 %vm422_vm2, %v2991_v14  ;;  %v3140_v16 = vrot.slane %v2991_v14, 4 }
0x2159   : > { %7430 = vmatprep.mubr.msk.bf16.mxu0 %vm8320_vm1, %v8319_v23  ;;  %7427 = vmatpush3.bf16.msra.mxu0 %v7893_v17 }
0x215a   : > { %7423 = vmatmul.mubr.msk.bf16.vlgmr.msra.gmra.mrb[88].mxu1 %vm422_vm2, %v3140_v16  ;;  %7428 = vmatprep.subr.bf16.mxu0 %v8319_v23 }
0x215b   : > { %7438 = vmatprep.mubr.msk.bf16.mxu1 %vm8320_vm1, %v8319_v23  ;;  %7435 = vmatpush3.bf16.msra.mxu1 %v7895_v52 }
0x215c   : > { %7436 = vmatprep.subr.bf16.mxu1 %v8319_v23 }
0x215d   : > { %7429 = vmatpush3.bf16.msra.mxu0 %v7894_v18 }
0x215e   : > { %7442 = vmatprep.subr.bf16.mxu0 %v8319_v23 }
0x215f   : > { %7437 = vmatpush3.bf16.msra.mxu1 %v7896_v53 }
0x2223   : > { %v3035_v19 = vpop.f32.mrb[80].mxu0 }
0x2224   : > { %v7406_v51 = vpop.f32.mrb[81].mxu0 }
0x2225   : > { %v3038_v20 = vpop.f32.mrb[82].mxu0  ;;  %v3085_v8 = vpop.f32.mrb[84].mxu1 }
0x2226   : > { %v7407_v22 = vpop.f32.mrb[83].mxu0  ;;  %3190 = vrot.lane.b32.xlu1 %v3085_v8, %s9780_s27  ;;  %v7412_v25 = vpop.f32.mrb[85].mxu1  ;;  %v7901_v20 = vld [vmem:[%s9706_s2 + $0x80] ss:$8 sps:$4 sm:$0xff]   ;;  %v7903_v8 = vld [vmem:[%s9706_s2 + $0x84] ss:$8 sps:$4 sm:$0xff]  }
0x2227   : > { %v3088_v26 = vpop.f32.mrb[86].mxu1  ;;  %v7906_v22 = vld [vmem:[%s9706_s2 + $0x94] ss:$8 sps:$4 sm:$0xff]   ;;  %3462 = vmatprep.subr.bf16.mxu1 %v7903_v8  ;;  %v7904_v25 = vld [vmem:[%s9706_s2 + $0x90] ss:$8 sps:$4 sm:$0xff]  }
0x2228   : > { %v7413_v27 = vpop.f32.mrb[87].mxu1 }
0x222b   : > { %v3133_v28 = vpop.f32.mrb[84].mxu0 }
0x222c   : > { %3194 = vrot.lane.b32.xlu0 %v3133_v28, %s9781_s10  ;;  %v7418_v30 = vpop.f32.mrb[85].mxu0 }
0x222d   : > { %v3136_v31 = vpop.f32.mrb[86].mxu0  ;;  %v3183_v32 = vpop.f32.mrb[88].mxu1 }
0x222e   : > { %v7419_v33 = vpop.f32.mrb[87].mxu0  ;;  %3198 = vrot.lane.b32.xlu1 %v3183_v32, %s9782_s9  ;;  %v7424_v0 = vpop.f32.mrb[89].mxu1 }
0x222f   : > { %v3186_v34 = vpop.f32.mrb[90].mxu1 }
0x2230   : > { %v7425_v35 = vpop.f32.mrb[91].mxu1 }
0x2298   : > { %v3191_v36 = vpop.permute.xlu1 %3190 }
0x2299   : > { %v3201_v37 = vsel %vm422_vm2, %v3035_v19, %v3191_v36 }
0x229e   : > { %v3195_v39 = vpop.permute.xlu0 %3194 }
0x229f   : > { %v3202_v40 = vsel %vm877_vm4, %v3201_v37, %v3195_v39  ;;  %v9138_v39 = vld [vmem:[#allocation5] sm:$0xff] }
0x22a0   : > { %v3199_v41 = vpop.permute.xlu1 %3198 }
0x22a1   : > { %v3203_v42 = vsel %vm879_vm5, %v3202_v40, %v3199_v41 }
0x22a2   : > { %v3204_v43 = vpack.c.bf16 %v3203_v42, %v3203_v42 }
0x22a4   : > { %7431 = vmatmul.mubr.msk.bf16.vlgmr.msra.gmra.mrb[88].mxu0 %vm318_vm0, %v3204_v43 }
0x22a5   : > { %7450 = vmatprep.mubr.msk.bf16.mxu0 %vm8320_vm1, %v8319_v23  ;;  %7443 = vmatpush3.bf16.msra.mxu0 %v7897_v59 }
0x22a6   : > { %7444 = vmatprep.subr.bf16.mxu0 %v8319_v23 }
0x22a9   : > { %7445 = vmatpush3.bf16.msra.mxu0 %v7898_v61 }
0x22aa   : > { %7446 = vmatprep.subr.bf16.mxu0 %v8319_v23 }
0x22ad   : > { %7447 = vmatpush3.bf16.msra.mxu0 %v7899_v60 }
0x22ae   : > { %7448 = vmatprep.subr.bf16.mxu0 %v8319_v23 }
0x22b1   : > { %7449 = vmatpush3.bf16.msra.mxu0 %v7900_v62 }
0x22b2   : > { %7460 = vmatprep.subr.bf16.mxu0 %v8319_v23 }
0x2377   : > { %v3254_v44 = vpop.f32.mrb[88].mxu0 }
0x2378   : > { %v3260_v45 = vadd.f32 %v3254_v44, %v8973_v29  ;;  %v7432_v46 = vpop.f32.mrb[89].mxu0 }
0x2379   : > { %v3257_v47 = vpop.f32.mrb[90].mxu0 }
0x237a   : > { %v7433_v48 = vpop.f32.mrb[91].mxu0  ;;  %v3261_v49 = vmul.f32 %v3260_v45, %v3260_v45 }
0x237c   : > { %v3262_v50 = vsel %vm318_vm0, %v3261_v49, 0.0 }
0x237d   : > { %3263 = vadd.xlane.f32.xlu0 %v3262_v50 }
0x240a   : > { %v3264_v54 = vpop.xlane.xlu0 %3263 }
0x240b   : > { %v3265_v55 = vmul.f32 0.03125, %v3264_v54 }
0x240d   : > { %v3266_v56 = vadd.f32 1e-06, %v3265_v55 }
0x240f   : > { %8047 = vrsqrt.f32 %v3266_v56 }
0x2419   : > { %v8048_v57 = vpop.eup %8047 }
0x241a   : > { %v3268_v58 = vmul.f32 %v8048_v57, %v3260_v45 }
0x241c   : > { %v3269_v29 = vpack.c.bf16 %v3268_v58, %v3268_v58 }
0x241e   : > { %7439 = vmatmul.mubr.msk.bf16.vlgmr.msra.gmra.mrb[92].mxu1 %vm318_vm0, %v3269_v29 }
0x241f   : > { %3494 = vmatprep.mubr.bf16.mxu1 %v8315_v7  ;;  %3463 = vmatpush1.bf16.msra.mxu1 %v7901_v20 }
0x2420   : > { %3464 = vmatprep.subr.bf16.mxu1 %v7906_v22 }
0x2423   : > { %3465 = vmatpush1.bf16.msra.mxu1 %v7904_v25 }
0x2424   : > { %7454 = vmatprep.subr.bf16.mxu1 %v8319_v23 }
0x24f1   : > { %v3319_v63 = vpop.f32.mrb[92].mxu1 }
0x24f2   : > { %3333 = vrot.lane.b32.xlu1 %v3319_v63, %s9777_s12  ;;  %v7440_v1 = vpop.f32.mrb[93].mxu1  ;;  %v6760_v4 = vmul.f32 -1.442695, %v3319_v63 }
0x24f3   : > { %v3322_v2 = vpop.f32.mrb[94].mxu1 }
0x24f4   : > { %v7441_v3 = vpop.f32.mrb[95].mxu1  ;;  %8049 = vpow2.f32 %v6760_v4 }
0x24fe   : > { %v8050_v5 = vpop.eup %8049 }
0x24ff   : > { %v3328_v6 = vadd.f32 1.0, %v8050_v5 }
0x2501   : > { %8051 = vrcp.f32 %v3328_v6 }
0x250b   : > { %v8052_v9 = vpop.eup %8051 }
0x250c   : > { %v3331_v38 = vmul.f32 %v8052_v9, %v3319_v63 }
0x2564   : > { %v3334_v10 = vpop.permute.xlu1 %3333 }
0x2565   : > { %v3336_v11 = vmul.f32 %v3334_v10, %v3331_v38 }
0x2567   : > { %v3337_v12 = vpack.c.bf16 %v3336_v11, %v3336_v11 }
0x2569   : > { %7451 = vmatmul.mubr.msk.bf16.vlgmr.msra.gmra.mrb[92].mxu0 %vm1039_vm6, %v3337_v12 }
0x256a   : > { %7462 = vmatprep.mubr.msk.bf16.mxu0 %vm8320_vm1, %v8319_v23 }
0x263c   : > { %v3399_v13 = vpop.f32.mrb[92].mxu0 }
0x263d   : > { %v9109_v14 = vadd.f32 %v3399_v13, %v3260_v45  ;;  %v7452_v16 = vpop.f32.mrb[93].mxu0 }
0x263e   : > { %v3402_v17 = vpop.f32.mrb[94].mxu0 }
0x263f   : > { %v7453_v18 = vpop.f32.mrb[95].mxu0  ;;  %v3430_v19 = vmul.f32 %v9109_v14, %v9109_v14 }
0x2641   : > { %v3431_v51 = vsel %vm318_vm0, %v3430_v19, 0.0 }
0x2642   : > { %3432 = vadd.xlane.f32.xlu1 %v3431_v51 }
0x26cf   : > { %v3433_v26 = vpop.xlane.xlu1 %3432 }
0x26d0   : > { %v3434_v27 = vmul.f32 0.03125, %v3433_v26 }
0x26d2   : > { %v3435_v28 = vadd.f32 1e-06, %v3434_v27 }
0x26d4   : > { %8053 = vrsqrt.f32 %v3435_v28 }
0x26de   : > { %v8054_v30 = vpop.eup %8053 }
0x26df   : > { %v3437_v31 = vmul.f32 %v8054_v30, %v9109_v14 }
0x26e1   : > { %v3438_v32 = vpack.c.bf16 %v3437_v31, %v3437_v31 }
0x26e3   : > { %6786 = vmatmul.mubr.msk.bf16.vlgmr.msra.gmra.mrb[96].mxu1 %vm318_vm0, %v3438_v32 }
0x26e4   : > { %7456 = vmatprep.mubr.msk.bf16.mxu1 %vm8320_vm1, %v8319_v23 }
0x27b6   : > { %v9131_v33 = vpop.f32.mrb[96].mxu1 }
0x27b7   : > { %v3504_v0 = vmul.f32 %v9131_v33, %v8579_v21  ;;  %v3498_v34 = vpop.f32.mrb[97].mxu1  ;;  %v3503_v40 = vmul.f32 %v9138_v39, %v9131_v33  ;;  %v3510_v42 = vmul.f32 %v9131_v33, %v8586_v24  ;;  %v3519_v19 = vpack.c.bf16 %v9131_v33, %v9131_v33 }
0x27b8   : > { %v3511_v35 = vmul.f32 %v3498_v34, %v8573_v15  ;;  %v3500_v36 = vpop.f32.mrb[98].mxu1 }
0x27b9   : > { %3506 = vrot.lane.b32.xlu1 %v3504_v0, %s9783_s4  ;;  %v3501_v37 = vpop.f32.mrb[99].mxu1 }
0x27ba   : > { %3513 = vrot.lane.b32.xlu0 %v3511_v35, %s9783_s4 }
0x282b   : > { %v3507_v41 = vpop.permute.xlu1 %3506 }
0x282c   : > { %v3509_v43 = vadd.f32 %v3507_v41, %v3503_v40  ;;  %v3514_v44 = vpop.permute.xlu0 %3513 }
0x282d   : > { %v3516_v45 = vadd.f32 %v3514_v44, %v3510_v42 }
0x282e   : > { %v3517_v46 = vpack.c.bf16 %v3509_v43, %v3509_v43 }
0x282f   : > { %v3518_v47 = vpack.c.bf16 %v3516_v45, %v3516_v45 }
0x2830   : > { %3570 = vrot.lane.b32.xlu1 %v3517_v46, %s9784_s0 }
0x2831   : > { %3521 = vrot.lane.b32.xlu0 %v3518_v47, %s9785_s1 }
0x2834   : > { %3672 = vrot.lane.b32.xlu1 %v3518_v47, %s9786_s7 }
0x2835   : > { %3572 = vrot.lane.b32.xlu0 %v3518_v47, %s9787_s20 }
0x2838   : > { %3670 = vrot.lane.b32.xlu1 %v3517_v46, %s9788_s14 }
0x2839   : > { %3622 = vrot.lane.b32.xlu0 %v3518_v47, %s9774_s13 }
0x283d   : > { %3620 = vrot.lane.b32.xlu0 %v3517_v46, %s9775_s11 }
0x28a2   : > { %v3571_v50 = vpop.permute.xlu1 %3570 }
0x28a3   : > { %v3522_v48 = vpop.permute.xlu0 %3521 }
0x28a4   : > { %v3527_v49 = vsel %vm422_vm2, %v3522_v48, 0 }
0x28a5   : > { %7455 = vmatpush3.bf16.xpose.msra.mxu1 %v3527_v49 }
0x28a6   : > { %7466 = vmatprep.subr.bf16.mxu1 %v8319_v23  ;;  %v3673_v56 = vpop.permute.xlu1 %3672 }
0x28a7   : > { %v3573_v52 = vpop.permute.xlu0 %3572  ;;  %v3678_v57 = vsel %vm422_vm2, %v3673_v56, 0 }
0x28a8   : > { %v3578_v53 = vsel %vm422_vm2, %v3573_v52, 0 }
0x28a9   : > { %7461 = vmatpush3.bf16.xpose.msra.mxu0 %v3578_v53 }
0x28aa   : > { %7472 = vmatprep.subr.bf16.mxu0 %v8319_v23  ;;  %v3671_v29 = vpop.permute.xlu1 %3670 }
0x28ab   : > { %v3623_v54 = vpop.permute.xlu0 %3622 }
0x28ac   : > { %v3628_v55 = vsel %vm422_vm2, %v3623_v54, 0  ;;  %7457 = vmatmul.mubr.msk.bf16.vlgmr.msra.gmra.mrb[100].mxu1 %vm422_vm2, %v3517_v46 }
0x28ad   : > { %7467 = vmatpush3.bf16.xpose.msra.mxu1 %v3628_v55  ;;  %7468 = vmatprep.mubr.msk.bf16.mxu1 %vm8320_vm1, %v8319_v23 }
0x28ae   : > { %7478 = vmatprep.subr.bf16.mxu1 %v8319_v23 }
0x28af   : > { %v3621_v58 = vpop.permute.xlu0 %3620 }
0x28b0   : > { %7463 = vmatmul.mubr.msk.bf16.vlgmr.msra.gmra.mrb[96].mxu0 %vm422_vm2, %v3571_v50 }
0x28b1   : > { %7473 = vmatpush3.bf16.xpose.msra.mxu0 %v3678_v57  ;;  %7474 = vmatprep.mubr.msk.bf16.mxu0 %vm8320_vm1, %v8319_v23 }
0x28b2   : > { %7484 = vmatprep.subr.bf16.mxu0 %v8319_v23 }
0x28b4   : > { %7469 = vmatmul.mubr.msk.bf16.vlgmr.msra.gmra.mrb[104].mxu1 %vm422_vm2, %v3621_v58 }
0x28b5   : > { %7480 = vmatprep.mubr.msk.bf16.mxu1 %vm8320_vm1, %v8319_v23 }
0x28b8   : > { %7475 = vmatmul.mubr.msk.bf16.vlgmr.msra.gmra.mrb[100].mxu0 %vm422_vm2, %v3671_v29 }
0x28b9   : > { %7486 = vmatprep.mubr.msk.bf16.mxu0 %vm8320_vm1, %v8319_v23 }
0x297f   : > { %v3563_v59 = vpop.f32.mrb[100].mxu1 }
0x2980   : > { %v7458_v61 = vpop.f32.mrb[101].mxu1  ;;  %v3720_v60 = vsel %vm422_vm2, %v3563_v59, -inf }
0x2981   : > { %3721 = vmax.xlane.f32.xlu0 %v3720_v60  ;;  %v3566_v62 = vpop.f32.mrb[102].mxu1 }
0x2982   : > { %v7459_v63 = vpop.f32.mrb[103].mxu1 }
0x2983   : > { %v3614_v1 = vpop.f32.mrb[96].mxu0 }
0x2984   : > { %v7464_v2 = vpop.f32.mrb[97].mxu0  ;;  %v3723_v3 = vsel %vm422_vm2, %v3614_v1, -inf }
0x2985   : > { %3724 = vmax.xlane.f32.xlu1 %v3723_v3  ;;  %v3617_v4 = vpop.f32.mrb[98].mxu0 }
0x2986   : > { %v7465_v5 = vpop.f32.mrb[99].mxu0  ;;  %v7907_v4 = vld [vmem:[%s9707_s3 + $0x40] sm:$0xff]  }
0x2987   : > { %v3664_v6 = vpop.f32.mrb[104].mxu1  ;;  %v7908_v5 = vld [vmem:[%s9707_s3 + $0x48] sm:$0xff]  }
0x2988   : > { %v7470_v9 = vpop.f32.mrb[105].mxu1  ;;  %v3726_v38 = vsel %vm422_vm2, %v3664_v6, -inf }
0x2989   : > { %3727 = vmax.xlane.f32.xlu0 %v3726_v38  ;;  %v3667_v10 = vpop.f32.mrb[106].mxu1 }
0x298a   : > { %v7471_v11 = vpop.f32.mrb[107].mxu1 }
0x298b   : > { %v3714_v12 = vpop.f32.mrb[100].mxu0 }
0x298c   : > { %v7476_v13 = vpop.f32.mrb[101].mxu0  ;;  %v3729_v16 = vsel %vm422_vm2, %v3714_v12, -inf }
0x298d   : > { %v3717_v17 = vpop.f32.mrb[102].mxu0  ;;  %3730 = vmax.xlane.f32.xlu0 %v3729_v16 }
0x298e   : > { %v7477_v18 = vpop.f32.mrb[103].mxu0 }
0x2996   : > { %3767 = vrot.lane.b32.xlu1 %v3519_v19, %s9777_s12 }
0x2a0e   : > { %v3722_v51 = vpop.xlane.xlu0 %3721 }
0x2a0f   : > { %v3732_v20 = vsub.f32 %v3563_v59, %v3722_v51 }
0x2a11   : > { %v3736_v8 = vmul.f32 1.442695, %v3732_v20 }
0x2a12   : > { %v3725_v22 = vpop.xlane.xlu1 %3724 }
0x2a13   : > { %8055 = vpow2.f32 %v3736_v8  ;;  %v3733_v25 = vsub.f32 %v3614_v1, %v3725_v22 }
0x2a15   : > { %v3738_v26 = vmul.f32 1.442695, %v3733_v25 }
0x2a16   : > { %v3768_v27 = vpop.permute.xlu1 %3767  ;;  %v3728_v28 = vpop.xlane.xlu0 %3727 }
0x2a17   : > { %8057 = vpow2.f32 %v3738_v26  ;;  %v3773_v30 = vsel %vm672_vm3, %v3768_v27, 0  ;;  %v3734_v31 = vsub.f32 %v3664_v6, %v3728_v28 }
0x2a18   : > { %7479 = vmatpush3.bf16.msra.mxu1 %v3773_v30 }
0x2a19   : > { %v3740_v32 = vmul.f32 1.442695, %v3734_v31  ;;  %7490 = vmatprep.subr.bf16.mxu1 %v8319_v23 }
0x2a1a   : > { %v3731_v33 = vpop.xlane.xlu0 %3730 }
0x2a1b   : > { %8059 = vpow2.f32 %v3740_v32  ;;  %v3735_v0 = vsub.f32 %v3714_v12, %v3731_v33 }
0x2a1d   : > { %v8056_v34 = vpop.eup %8055  ;;  %v3742_v35 = vmul.f32 1.442695, %v3735_v0 }
0x2a1e   : > { %v3744_v36 = vsel %vm422_vm2, %v8056_v34, 0.0 }
0x2a1f   : > { %8061 = vpow2.f32 %v3742_v35  ;;  %3745 = vadd.xlane.f32.xlu1 %v3744_v36 }
0x2a21   : > { %v8058_v37 = vpop.eup %8057 }
0x2a22   : > { %v3747_v40 = vsel %vm422_vm2, %v8058_v37, 0.0 }
0x2a23   : > { %3748 = vadd.xlane.f32.xlu0 %v3747_v40 }
0x2a25   : > { %v8060_v41 = vpop.eup %8059 }
0x2a26   : > { %v3750_v42 = vsel %vm422_vm2, %v8060_v41, 0.0 }
0x2a27   : > { %3751 = vadd.xlane.f32.xlu1 %v3750_v42  ;;  %v7909_v42 = vld [vmem:[#allocation7 + $0x40] sm:$0xff]  }
0x2a29   : > { %v8062_v43 = vpop.eup %8061 }
0x2a2a   : > { %v3753_v44 = vsel %vm422_vm2, %v8062_v43, 0.0 }
0x2a2b   : > { %3754 = vadd.xlane.f32.xlu0 %v3753_v44 }
0x2a38   : > { %3865 = vrot.lane.b32.xlu1 %v3519_v19, %s9778_s26 }
0x2a3c   : > { %3915 = vrot.lane.b32.xlu1 %v3519_v19, %s9779_s16 }
0x2a41   : > { %3817 = vrot.lane.b32.xlu0 %v3519_v19, %s9776_s29 }
0x2aac   : > { %v3746_v45 = vpop.xlane.xlu1 %3745 }
0x2aad   : > { %8063 = vrcp.f32 %v3746_v45 }
0x2ab0   : > { %v3749_v46 = vpop.xlane.xlu0 %3748 }
0x2ab1   : > { %8065 = vrcp.f32 %v3749_v46 }
0x2ab4   : > { %v3752_v47 = vpop.xlane.xlu1 %3751 }
0x2ab5   : > { %8067 = vrcp.f32 %v3752_v47 }
0x2ab7   : > { %v8064_v49 = vpop.eup %8063 }
0x2ab8   : > { %v3755_v48 = vpop.xlane.xlu0 %3754  ;;  %v3866_v50 = vpop.permute.xlu1 %3865  ;;  %v3760_v53 = vmul.f32 %v8064_v49, %v8056_v34  ;;  %v7911_v49 = vld [vmem:[%s9709_s5 + $0x80] sm:$0xff]  }
0x2ab9   : > { %8069 = vrcp.f32 %v3755_v48  ;;  %v3871_v29 = vsel %vm672_vm3, %v3866_v50, 0  ;;  %v7912_v50 = vld [vmem:[%s9709_s5 + $0x88] sm:$0xff]  }
0x2abb   : > { %v8066_v52 = vpop.eup %8065 }
0x2abc   : > { %v3761_v54 = vmul.f32 %v8066_v52, %v8058_v37  ;;  %v3818_v55 = vpop.permute.xlu0 %3817  ;;  %v3916_v58 = vpop.permute.xlu1 %3915  ;;  %v7913_v52 = vld [vmem:[%s9709_s5 + $0x90] sm:$0xff]  }
0x2abd   : > { %v3823_v56 = vsel %vm672_vm3, %v3818_v55, 0  ;;  %v3921_v60 = vsel %vm672_vm3, %v3916_v58, 0 }
0x2abe   : > { %7485 = vmatpush3.bf16.msra.mxu0 %v3823_v56  ;;  %v3764_v57 = vpack.c.bf16 %v3761_v54, %v3760_v53  ;;  %v7914_v53 = vld [vmem:[%s9709_s5 + $0x98] sm:$0xff]  }
0x2abf   : > { %7496 = vmatprep.subr.bf16.mxu0 %v8319_v23  ;;  %v8068_v61 = vpop.eup %8067 }
0x2ac0   : > { %7481 = vmatmul.mubr.msk.bf16.vlgmr.msra.gmra.mrb[108].mxu1 %vm422_vm2, %v3764_v57  ;;  %v3816_v59 = vrot.slane %v3764_v57, 4  ;;  %v3762_v63 = vmul.f32 %v8068_v61, %v8060_v41 }
0x2ac1   : > { %7491 = vmatpush3.bf16.msra.mxu1 %v3871_v29  ;;  %7492 = vmatprep.mubr.msk.bf16.mxu1 %vm8320_vm1, %v8319_v23 }
0x2ac2   : > { %7487 = vmatmul.mubr.msk.bf16.vlgmr.msra.gmra.mrb[104].mxu0 %vm422_vm2, %v3816_v59  ;;  %7502 = vmatprep.subr.bf16.mxu1 %v8319_v23 }
0x2ac3   : > { %v8070_v62 = vpop.eup %8069  ;;  %7497 = vmatpush3.bf16.msra.mxu0 %v3921_v60  ;;  %7498 = vmatprep.mubr.msk.bf16.mxu0 %vm8320_vm1, %v8319_v23 }
0x2ac4   : > { %v3763_v1 = vmul.f32 %v8070_v62, %v8062_v43  ;;  %7510 = vmatprep.subr.bf16.mxu0 %v8319_v23  ;;  %v7910_v43 = vld [vmem:[#allocation7 + $0x48] sm:$0xff]  }
0x2ac6   : > { %v3765_v2 = vpack.c.bf16 %v3763_v1, %v3762_v63 }
0x2ac8   : > { %7493 = vmatmul.mubr.msk.bf16.vlgmr.msra.gmra.mrb[112].mxu1 %vm422_vm2, %v3765_v2  ;;  %v3914_v3 = vrot.slane %v3765_v2, 4 }
0x2ac9   : > { %7506 = vmatprep.mubr.msk.bf16.mxu1 %vm8320_vm1, %v8319_v23  ;;  %7503 = vmatpush3.bf16.msra.mxu1 %v7907_v4 }
0x2aca   : > { %7499 = vmatmul.mubr.msk.bf16.vlgmr.msra.gmra.mrb[108].mxu0 %vm422_vm2, %v3914_v3  ;;  %7504 = vmatprep.subr.bf16.mxu1 %v8319_v23 }
0x2acb   : > { %7514 = vmatprep.mubr.msk.bf16.mxu0 %vm8320_vm1, %v8319_v23  ;;  %7511 = vmatpush3.bf16.msra.mxu0 %v7909_v42 }
0x2acc   : > { %7512 = vmatprep.subr.bf16.mxu0 %v8319_v23 }
0x2acd   : > { %7505 = vmatpush3.bf16.msra.mxu1 %v7908_v5 }
0x2ace   : > { %7518 = vmatprep.subr.bf16.mxu1 %v8319_v23 }
0x2acf   : > { %7513 = vmatpush3.bf16.msra.mxu0 %v7910_v43 }
0x2b93   : > { %v3809_v6 = vpop.f32.mrb[108].mxu1 }
0x2b94   : > { %v7482_v9 = vpop.f32.mrb[109].mxu1 }
0x2b95   : > { %v3812_v38 = vpop.f32.mrb[110].mxu1  ;;  %v3859_v10 = vpop.f32.mrb[104].mxu0 }
0x2b96   : > { %3964 = vrot.lane.b32.xlu0 %v3859_v10, %s9780_s27  ;;  %v7483_v11 = vpop.f32.mrb[111].mxu1  ;;  %v7488_v12 = vpop.f32.mrb[105].mxu0  ;;  %v7915_v10 = vld [vmem:[%s9706_s2 + $0xa0] ss:$8 sps:$4 sm:$0xff]  }
0x2b97   : > { %v3862_v13 = vpop.f32.mrb[106].mxu0  ;;  %v7917_v11 = vld [vmem:[%s9706_s2 + $0xa4] ss:$8 sps:$4 sm:$0xff]   ;;  %v7920_v12 = vld [vmem:[%s9706_s2 + $0xb4] ss:$8 sps:$4 sm:$0xff]  }
0x2b98   : > { %v7489_v16 = vpop.f32.mrb[107].mxu0  ;;  %4236 = vmatprep.subr.bf16.mxu0 %v7917_v11  ;;  %v7918_v13 = vld [vmem:[%s9706_s2 + $0xb0] ss:$8 sps:$4 sm:$0xff]  }
0x2b9b   : > { %v3907_v17 = vpop.f32.mrb[112].mxu1 }
0x2b9c   : > { %3968 = vrot.lane.b32.xlu1 %v3907_v17, %s9781_s10  ;;  %v7494_v18 = vpop.f32.mrb[113].mxu1 }
0x2b9d   : > { %v3910_v19 = vpop.f32.mrb[114].mxu1  ;;  %v3957_v51 = vpop.f32.mrb[108].mxu0 }
0x2b9e   : > { %3972 = vrot.lane.b32.xlu0 %v3957_v51, %s9782_s9  ;;  %v7495_v20 = vpop.f32.mrb[115].mxu1  ;;  %v7500_v8 = vpop.f32.mrb[109].mxu0 }
0x2b9f   : > { %v3960_v22 = vpop.f32.mrb[110].mxu0 }
0x2ba0   : > { %v7501_v25 = vpop.f32.mrb[111].mxu0 }
0x2c08   : > { %v3965_v26 = vpop.permute.xlu0 %3964 }
0x2c09   : > { %v3975_v27 = vsel %vm422_vm2, %v3809_v6, %v3965_v26 }
0x2c0e   : > { %v3969_v28 = vpop.permute.xlu1 %3968 }
0x2c0f   : > { %v3976_v30 = vsel %vm877_vm4, %v3975_v27, %v3969_v28 }
0x2c10   : > { %v3973_v31 = vpop.permute.xlu0 %3972 }
0x2c11   : > { %v3977_v32 = vsel %vm879_vm5, %v3976_v30, %v3973_v31 }
0x2c12   : > { %v3978_v33 = vpack.c.bf16 %v3977_v32, %v3977_v32 }
0x2c14   : > { %7507 = vmatmul.mubr.msk.bf16.vlgmr.msra.gmra.mrb[116].mxu1 %vm318_vm0, %v3978_v33 }
0x2c15   : > { %7526 = vmatprep.mubr.msk.bf16.mxu1 %vm8320_vm1, %v8319_v23  ;;  %7519 = vmatpush3.bf16.msra.mxu1 %v7911_v49 }
0x2c16   : > { %7520 = vmatprep.subr.bf16.mxu1 %v8319_v23 }
0x2c19   : > { %7521 = vmatpush3.bf16.msra.mxu1 %v7912_v50 }
0x2c1a   : > { %7522 = vmatprep.subr.bf16.mxu1 %v8319_v23 }
0x2c1d   : > { %7523 = vmatpush3.bf16.msra.mxu1 %v7913_v52 }
0x2c1e   : > { %7524 = vmatprep.subr.bf16.mxu1 %v8319_v23 }
0x2c21   : > { %7525 = vmatpush3.bf16.msra.mxu1 %v7914_v53 }
0x2c22   : > { %7536 = vmatprep.subr.bf16.mxu1 %v8319_v23 }
0x2ce7   : > { %v4028_v0 = vpop.f32.mrb[116].mxu1 }
0x2ce8   : > { %v4034_v34 = vadd.f32 %v4028_v0, %v9109_v14  ;;  %v7508_v35 = vpop.f32.mrb[117].mxu1 }
0x2ce9   : > { %v4031_v36 = vpop.f32.mrb[118].mxu1 }
0x2cea   : > { %v7509_v37 = vpop.f32.mrb[119].mxu1  ;;  %v4035_v40 = vmul.f32 %v4034_v34, %v4034_v34 }
0x2cec   : > { %v4036_v41 = vsel %vm318_vm0, %v4035_v40, 0.0 }
0x2ced   : > { %4037 = vadd.xlane.f32.xlu1 %v4036_v41 }
0x2d7a   : > { %v4038_v44 = vpop.xlane.xlu1 %4037 }
0x2d7b   : > { %v4039_v45 = vmul.f32 0.03125, %v4038_v44 }
0x2d7d   : > { %v4040_v46 = vadd.f32 1e-06, %v4039_v45 }
0x2d7f   : > { %8071 = vrsqrt.f32 %v4040_v46 }
0x2d89   : > { %v8072_v47 = vpop.eup %8071 }
0x2d8a   : > { %v4042_v48 = vmul.f32 %v8072_v47, %v4034_v34 }
0x2d8c   : > { %v4043_v14 = vpack.c.bf16 %v4042_v48, %v4042_v48 }
0x2d8e   : > { %7515 = vmatmul.mubr.msk.bf16.vlgmr.msra.gmra.mrb[112].mxu0 %vm318_vm0, %v4043_v14 }
0x2d8f   : > { %4268 = vmatprep.mubr.bf16.mxu0 %v8315_v7  ;;  %4237 = vmatpush1.bf16.msra.mxu0 %v7915_v10 }
0x2d90   : > { %4238 = vmatprep.subr.bf16.mxu0 %v7920_v12 }
0x2d93   : > { %4239 = vmatpush1.bf16.msra.mxu0 %v7918_v13 }
0x2d94   : > { %7530 = vmatprep.subr.bf16.mxu0 %v8319_v23 }
0x2e61   : > { %v4093_v54 = vpop.f32.mrb[112].mxu0 }
0x2e62   : > { %4107 = vrot.lane.b32.xlu0 %v4093_v54, %s9777_s12  ;;  %v7516_v55 = vpop.f32.mrb[113].mxu0  ;;  %v6801_v58 = vmul.f32 -1.442695, %v4093_v54 }
0x2e63   : > { %v4096_v56 = vpop.f32.mrb[114].mxu0 }
0x2e64   : > { %v7517_v57 = vpop.f32.mrb[115].mxu0  ;;  %8073 = vpow2.f32 %v6801_v58 }
0x2e6e   : > { %v8074_v29 = vpop.eup %8073 }
0x2e6f   : > { %v4102_v59 = vadd.f32 1.0, %v8074_v29 }
0x2e71   : > { %8075 = vrcp.f32 %v4102_v59 }
0x2e7b   : > { %v8076_v61 = vpop.eup %8075 }
0x2e7c   : > { %v4105_v60 = vmul.f32 %v8076_v61, %v4093_v54 }
0x2ed4   : > { %v4108_v62 = vpop.permute.xlu0 %4107 }
0x2ed5   : > { %v4110_v63 = vmul.f32 %v4108_v62, %v4105_v60 }
0x2ed7   : > { %v4111_v1 = vpack.c.bf16 %v4110_v63, %v4110_v63 }
0x2ed9   : > { %7527 = vmatmul.mubr.msk.bf16.vlgmr.msra.gmra.mrb[120].mxu1 %vm1039_vm6, %v4111_v1 }
0x2eda   : > { %7538 = vmatprep.mubr.msk.bf16.mxu1 %vm8320_vm1, %v8319_v23 }
0x2fac   : > { %v4173_v2 = vpop.f32.mrb[120].mxu1 }
0x2fad   : > { %v9247_v3 = vadd.f32 %v4173_v2, %v4034_v34  ;;  %v7528_v4 = vpop.f32.mrb[121].mxu1 }
0x2fae   : > { %v4176_v5 = vpop.f32.mrb[122].mxu1 }
0x2faf   : > { %v7529_v6 = vpop.f32.mrb[123].mxu1  ;;  %v4204_v9 = vmul.f32 %v9247_v3, %v9247_v3 }
0x2fb1   : > { %v4205_v38 = vsel %vm318_vm0, %v4204_v9, 0.0 }
0x2fb2   : > { %4206 = vadd.xlane.f32.xlu0 %v4205_v38 }
0x303f   : > { %v4207_v16 = vpop.xlane.xlu0 %4206 }
0x3040   : > { %v4208_v17 = vmul.f32 0.03125, %v4207_v16 }
0x3042   : > { %v4209_v18 = vadd.f32 1e-06, %v4208_v17 }
0x3044   : > { %8077 = vrsqrt.f32 %v4209_v18 }
0x304e   : > { %v8078_v19 = vpop.eup %8077 }
0x304f   : > { %v4211_v51 = vmul.f32 %v8078_v19, %v9247_v3 }
0x3051   : > { %v4212_v20 = vpack.c.bf16 %v4211_v51, %v4211_v51 }
0x3053   : > { %6827 = vmatmul.mubr.msk.bf16.vlgmr.msra.gmra.mrb[116].mxu0 %vm318_vm0, %v4212_v20 }
0x3054   : > { %7532 = vmatprep.mubr.msk.bf16.mxu0 %vm8320_vm1, %v8319_v23 }
0x3126   : > { %v9269_v8 = vpop.f32.mrb[116].mxu0 }
0x3127   : > { %v4278_v22 = vmul.f32 %v9269_v8, %v8579_v21  ;;  %v4272_v25 = vpop.f32.mrb[117].mxu0  ;;  %v4277_v30 = vmul.f32 %v9138_v39, %v9269_v8  ;;  %v4284_v32 = vmul.f32 %v9269_v8, %v8586_v24  ;;  %v4293_v6 = vpack.c.bf16 %v9269_v8, %v9269_v8 }
0x3128   : > { %v4285_v26 = vmul.f32 %v4272_v25, %v8573_v15  ;;  %v4274_v27 = vpop.f32.mrb[118].mxu0 }
0x3129   : > { %4280 = vrot.lane.b32.xlu0 %v4278_v22, %s9783_s4  ;;  %v4275_v28 = vpop.f32.mrb[119].mxu0 }
0x312a   : > { %4287 = vrot.lane.b32.xlu1 %v4285_v26, %s9783_s4 }
0x319b   : > { %v4281_v31 = vpop.permute.xlu0 %4280 }
0x319c   : > { %v4283_v33 = vadd.f32 %v4281_v31, %v4277_v30  ;;  %v4288_v0 = vpop.permute.xlu1 %4287 }
0x319d   : > { %v4290_v34 = vadd.f32 %v4288_v0, %v4284_v32 }
0x319e   : > { %v4291_v35 = vpack.c.bf16 %v4283_v33, %v4283_v33 }
0x319f   : > { %v4292_v36 = vpack.c.bf16 %v4290_v34, %v4290_v34 }
0x31a0   : > { %4344 = vrot.lane.b32.xlu0 %v4291_v35, %s9784_s0 }
0x31a1   : > { %4295 = vrot.lane.b32.xlu1 %v4292_v36, %s9785_s1 }
0x31a4   : > { %4446 = vrot.lane.b32.xlu0 %v4292_v36, %s9786_s7 }
0x31a5   : > { %4346 = vrot.lane.b32.xlu1 %v4292_v36, %s9787_s20 }
0x31a8   : > { %4444 = vrot.lane.b32.xlu0 %v4291_v35, %s9788_s14 }
0x31a9   : > { %4396 = vrot.lane.b32.xlu1 %v4292_v36, %s9774_s13 }
0x31ad   : > { %4394 = vrot.lane.b32.xlu1 %v4291_v35, %s9775_s11 }
0x3212   : > { %v4345_v40 = vpop.permute.xlu0 %4344 }
0x3213   : > { %v4296_v39 = vpop.permute.xlu1 %4295 }
0x3214   : > { %v4301_v37 = vsel %vm422_vm2, %v4296_v39, 0 }
0x3215   : > { %7531 = vmatpush3.bf16.xpose.msra.mxu0 %v4301_v37 }
0x3216   : > { %7542 = vmatprep.subr.bf16.mxu0 %v8319_v23  ;;  %v4447_v45 = vpop.permute.xlu0 %4446 }
0x3217   : > { %v4347_v41 = vpop.permute.xlu1 %4346  ;;  %v4452_v46 = vsel %vm422_vm2, %v4447_v45, 0 }
0x3218   : > { %v4352_v42 = vsel %vm422_vm2, %v4347_v41, 0 }
0x3219   : > { %7537 = vmatpush3.bf16.xpose.msra.mxu1 %v4352_v42 }
0x321a   : > { %7548 = vmatprep.subr.bf16.mxu1 %v8319_v23  ;;  %v4445_v48 = vpop.permute.xlu0 %4444 }
0x321b   : > { %v4397_v43 = vpop.permute.xlu1 %4396 }
0x321c   : > { %v4402_v44 = vsel %vm422_vm2, %v4397_v43, 0  ;;  %7533 = vmatmul.mubr.msk.bf16.vlgmr.msra.gmra.mrb[120].mxu0 %vm422_vm2, %v4291_v35 }
0x321d   : > { %7543 = vmatpush3.bf16.xpose.msra.mxu0 %v4402_v44  ;;  %7544 = vmatprep.mubr.msk.bf16.mxu0 %vm8320_vm1, %v8319_v23 }
0x321e   : > { %7554 = vmatprep.subr.bf16.mxu0 %v8319_v23 }
0x321f   : > { %v4395_v47 = vpop.permute.xlu1 %4394 }
0x3220   : > { %7539 = vmatmul.mubr.msk.bf16.vlgmr.msra.gmra.mrb[124].mxu1 %vm422_vm2, %v4345_v40 }
0x3221   : > { %7549 = vmatpush3.bf16.xpose.msra.mxu1 %v4452_v46  ;;  %7550 = vmatprep.mubr.msk.bf16.mxu1 %vm8320_vm1, %v8319_v23 }
0x3222   : > { %7560 = vmatprep.subr.bf16.mxu1 %v8319_v23 }
0x3224   : > { %7545 = vmatmul.mubr.msk.bf16.vlgmr.msra.gmra.mrb[124].mxu0 %vm422_vm2, %v4395_v47 }
0x3225   : > { %7556 = vmatprep.mubr.msk.bf16.mxu0 %vm8320_vm1, %v8319_v23 }
0x3228   : > { %7551 = vmatmul.mubr.msk.bf16.vlgmr.msra.gmra.mrb[128].mxu1 %vm422_vm2, %v4445_v48 }
0x3229   : > { %7562 = vmatprep.mubr.msk.bf16.mxu1 %vm8320_vm1, %v8319_v23 }
0x32ef   : > { %v4337_v14 = vpop.f32.mrb[120].mxu0 }
0x32f0   : > { %v7534_v49 = vpop.f32.mrb[121].mxu0  ;;  %v4494_v50 = vsel %vm422_vm2, %v4337_v14, -inf }
0x32f1   : > { %4495 = vmax.xlane.f32.xlu1 %v4494_v50  ;;  %v4340_v52 = vpop.f32.mrb[122].mxu0 }
0x32f2   : > { %v7535_v53 = vpop.f32.mrb[123].mxu0 }
0x32f3   : > { %v4388_v54 = vpop.f32.mrb[124].mxu1 }
0x32f4   : > { %v7540_v55 = vpop.f32.mrb[125].mxu1  ;;  %v4497_v56 = vsel %vm422_vm2, %v4388_v54, -inf }
0x32f5   : > { %4498 = vmax.xlane.f32.xlu0 %v4497_v56  ;;  %v4391_v57 = vpop.f32.mrb[126].mxu1  ;;  %v7921_v56 = vld [vmem:[%s9707_s3 + $0x50] sm:$0xff]  }
0x32f6   : > { %v7541_v58 = vpop.f32.mrb[127].mxu1  ;;  %v7922_v57 = vld [vmem:[%s9707_s3 + $0x58] sm:$0xff]  }
0x32f7   : > { %v4438_v29 = vpop.f32.mrb[124].mxu0 }
0x32f8   : > { %v7546_v59 = vpop.f32.mrb[125].mxu0  ;;  %v4500_v61 = vsel %vm422_vm2, %v4438_v29, -inf }
0x32f9   : > { %v4441_v60 = vpop.f32.mrb[126].mxu0  ;;  %4501 = vmax.xlane.f32.xlu0 %v4500_v61 }
0x32fa   : > { %v7547_v62 = vpop.f32.mrb[127].mxu0 }
0x32fb   : > { %v4488_v63 = vpop.f32.mrb[128].mxu1 }
0x32fc   : > { %v7552_v1 = vpop.f32.mrb[129].mxu1  ;;  %v4503_v2 = vsel %vm422_vm2, %v4488_v63, -inf }
0x32fd   : > { %4504 = vmax.xlane.f32.xlu1 %v4503_v2  ;;  %v4491_v4 = vpop.f32.mrb[130].mxu1 }
0x32fe   : > { %v7553_v5 = vpop.f32.mrb[131].mxu1 }
0x330e   : > { %4591 = vrot.lane.b32.xlu1 %v4293_v6, %s9776_s29 }
0x330f   : > { %4541 = vrot.lane.b32.xlu0 %v4293_v6, %s9777_s12 }
0x337e   : > { %v4496_v9 = vpop.xlane.xlu1 %4495 }
0x337f   : > { %v4506_v38 = vsub.f32 %v4337_v14, %v4496_v9 }
0x3381   : > { %v4510_v10 = vmul.f32 1.442695, %v4506_v38 }
0x3382   : > { %v4499_v11 = vpop.xlane.xlu0 %4498 }
0x3383   : > { %8079 = vpow2.f32 %v4510_v10  ;;  %v4507_v12 = vsub.f32 %v4388_v54, %v4499_v11 }
0x3385   : > { %v4512_v13 = vmul.f32 1.442695, %v4507_v12 }
0x3386   : > { %v4502_v16 = vpop.xlane.xlu0 %4501 }
0x3387   : > { %8081 = vpow2.f32 %v4512_v13  ;;  %v4508_v17 = vsub.f32 %v4438_v29, %v4502_v16 }
0x3389   : > { %v4514_v18 = vmul.f32 1.442695, %v4508_v17 }
0x338a   : > { %v4542_v19 = vpop.permute.xlu0 %4541  ;;  %v4505_v51 = vpop.xlane.xlu1 %4504 }
0x338b   : > { %8083 = vpow2.f32 %v4514_v18  ;;  %v4547_v20 = vsel %vm672_vm3, %v4542_v19, 0  ;;  %v4509_v8 = vsub.f32 %v4488_v63, %v4505_v51 }
0x338c   : > { %7555 = vmatpush3.bf16.msra.mxu0 %v4547_v20 }
0x338d   : > { %v8080_v22 = vpop.eup %8079  ;;  %v4516_v25 = vmul.f32 1.442695, %v4509_v8  ;;  %7566 = vmatprep.subr.bf16.mxu0 %v8319_v23 }
0x338e   : > { %v4592_v26 = vpop.permute.xlu1 %4591  ;;  %v4518_v27 = vsel %vm422_vm2, %v8080_v22, 0.0 }
0x338f   : > { %8085 = vpow2.f32 %v4516_v25  ;;  %v4597_v28 = vsel %vm672_vm3, %v4592_v26, 0  ;;  %4519 = vadd.xlane.f32.xlu0 %v4518_v27 }
0x3390   : > { %7561 = vmatpush3.bf16.msra.mxu1 %v4597_v28 }
0x3391   : > { %v8082_v30 = vpop.eup %8081  ;;  %7572 = vmatprep.subr.bf16.mxu1 %v8319_v23 }
0x3392   : > { %v4521_v31 = vsel %vm422_vm2, %v8082_v30, 0.0 }
0x3393   : > { %4522 = vadd.xlane.f32.xlu1 %v4521_v31  ;;  %v7924_v31 = vld [vmem:[#allocation7 + $0x58] sm:$0xff]  }
0x3395   : > { %v8084_v32 = vpop.eup %8083 }
0x3396   : > { %v4524_v33 = vsel %vm422_vm2, %v8084_v32, 0.0 }
0x3397   : > { %4525 = vadd.xlane.f32.xlu0 %v4524_v33 }
0x3399   : > { %v8086_v0 = vpop.eup %8085 }
0x339a   : > { %v4527_v34 = vsel %vm422_vm2, %v8086_v0, 0.0 }
0x339b   : > { %4528 = vadd.xlane.f32.xlu1 %v4527_v34 }
0x33ac   : > { %4639 = vrot.lane.b32.xlu1 %v4293_v6, %s9778_s26 }
0x33ad   : > { %4689 = vrot.lane.b32.xlu0 %v4293_v6, %s9779_s16 }
0x341c   : > { %v4520_v35 = vpop.xlane.xlu0 %4519 }
0x341d   : > { %8087 = vrcp.f32 %v4520_v35 }
0x3420   : > { %v4523_v36 = vpop.xlane.xlu1 %4522 }
0x3421   : > { %8089 = vrcp.f32 %v4523_v36  ;;  %v7925_v36 = vld [vmem:[%s9709_s5 + $0xa0] sm:$0xff]  }
0x3424   : > { %v4526_v39 = vpop.xlane.xlu0 %4525 }
0x3425   : > { %8091 = vrcp.f32 %v4526_v39  ;;  %v7926_v39 = vld [vmem:[%s9709_s5 + $0xa8] sm:$0xff]  }
0x3427   : > { %v8088_v40 = vpop.eup %8087 }
0x3428   : > { %v4529_v37 = vpop.xlane.xlu1 %4528  ;;  %v4534_v42 = vmul.f32 %v8088_v40, %v8080_v22  ;;  %v4690_v46 = vpop.permute.xlu0 %4689  ;;  %v7928_v40 = vld [vmem:[%s9709_s5 + $0xb8] sm:$0xff]  }
0x3429   : > { %8093 = vrcp.f32 %v4529_v37  ;;  %v4695_v49 = vsel %vm672_vm3, %v4690_v46, 0  ;;  %v7927_v37 = vld [vmem:[%s9709_s5 + $0xb0] sm:$0xff]  }
0x342b   : > { %v8090_v41 = vpop.eup %8089 }
0x342c   : > { %v4535_v43 = vmul.f32 %v8090_v41, %v8082_v30  ;;  %v4640_v44 = vpop.permute.xlu1 %4639  ;;  %v7923_v30 = vld [vmem:[#allocation7 + $0x50] sm:$0xff]  }
0x342d   : > { %v4645_v47 = vsel %vm672_vm3, %v4640_v44, 0 }
0x342e   : > { %v4538_v45 = vpack.c.bf16 %v4535_v43, %v4534_v42 }
0x342f   : > { %v8092_v14 = vpop.eup %8091 }
0x3430   : > { %7557 = vmatmul.mubr.msk.bf16.vlgmr.msra.gmra.mrb[128].mxu0 %vm422_vm2, %v4538_v45  ;;  %v4590_v48 = vrot.slane %v4538_v45, 4  ;;  %v4536_v52 = vmul.f32 %v8092_v14, %v8084_v32 }
0x3431   : > { %7567 = vmatpush3.bf16.msra.mxu0 %v4645_v47  ;;  %7568 = vmatprep.mubr.msk.bf16.mxu0 %vm8320_vm1, %v8319_v23 }
0x3432   : > { %7563 = vmatmul.mubr.msk.bf16.vlgmr.msra.gmra.mrb[132].mxu1 %vm422_vm2, %v4590_v48  ;;  %7578 = vmatprep.subr.bf16.mxu0 %v8319_v23 }
0x3433   : > { %v8094_v50 = vpop.eup %8093  ;;  %7573 = vmatpush3.bf16.msra.mxu1 %v4695_v49  ;;  %7574 = vmatprep.mubr.msk.bf16.mxu1 %vm8320_vm1, %v8319_v23 }
0x3434   : > { %v4537_v53 = vmul.f32 %v8094_v50, %v8086_v0  ;;  %7586 = vmatprep.subr.bf16.mxu1 %v8319_v23 }
0x3436   : > { %v4539_v54 = vpack.c.bf16 %v4537_v53, %v4536_v52 }
0x3438   : > { %7569 = vmatmul.mubr.msk.bf16.vlgmr.msra.gmra.mrb[132].mxu0 %vm422_vm2, %v4539_v54  ;;  %v4688_v55 = vrot.slane %v4539_v54, 4 }
0x3439   : > { %7582 = vmatprep.mubr.msk.bf16.mxu0 %vm8320_vm1, %v8319_v23  ;;  %7579 = vmatpush3.bf16.msra.mxu0 %v7921_v56 }
0x343a   : > { %7575 = vmatmul.mubr.msk.bf16.vlgmr.msra.gmra.mrb[136].mxu1 %vm422_vm2, %v4688_v55  ;;  %7580 = vmatprep.subr.bf16.mxu0 %v8319_v23 }
0x343b   : > { %7590 = vmatprep.mubr.msk.bf16.mxu1 %vm8320_vm1, %v8319_v23  ;;  %7587 = vmatpush3.bf16.msra.mxu1 %v7923_v30 }
0x343c   : > { %7588 = vmatprep.subr.bf16.mxu1 %v8319_v23 }
0x343d   : > { %7581 = vmatpush3.bf16.msra.mxu0 %v7922_v57 }
0x343e   : > { %7594 = vmatprep.subr.bf16.mxu0 %v8319_v23 }
0x343f   : > { %7589 = vmatpush3.bf16.msra.mxu1 %v7924_v31 }
0x3503   : > { %v4583_v58 = vpop.f32.mrb[128].mxu0 }
0x3504   : > { %v7558_v29 = vpop.f32.mrb[129].mxu0 }
0x3505   : > { %v4586_v59 = vpop.f32.mrb[130].mxu0  ;;  %v4633_v61 = vpop.f32.mrb[132].mxu1 }
0x3506   : > { %v7559_v60 = vpop.f32.mrb[131].mxu0  ;;  %4738 = vrot.lane.b32.xlu1 %v4633_v61, %s9780_s27  ;;  %v7564_v62 = vpop.f32.mrb[133].mxu1  ;;  %v7929_v59 = vld [vmem:[%s9706_s2 + $0xc0] ss:$8 sps:$4 sm:$0xff]   ;;  %v7931_v61 = vld [vmem:[%s9706_s2 + $0xc4] ss:$8 sps:$4 sm:$0xff]  }
0x3507   : > { %v4636_v63 = vpop.f32.mrb[134].mxu1  ;;  %v7934_v60 = vld [vmem:[%s9706_s2 + $0xd4] ss:$8 sps:$4 sm:$0xff]   ;;  %5010 = vmatprep.subr.bf16.mxu1 %v7931_v61  ;;  %v7932_v62 = vld [vmem:[%s9706_s2 + $0xd0] ss:$8 sps:$4 sm:$0xff]  }
0x3508   : > { %v7565_v1 = vpop.f32.mrb[135].mxu1 }
0x350b   : > { %v4681_v2 = vpop.f32.mrb[132].mxu0 }
0x350c   : > { %4742 = vrot.lane.b32.xlu0 %v4681_v2, %s9781_s10  ;;  %v7570_v4 = vpop.f32.mrb[133].mxu0 }
0x350d   : > { %v4684_v5 = vpop.f32.mrb[134].mxu0  ;;  %v4731_v6 = vpop.f32.mrb[136].mxu1 }
0x350e   : > { %v7571_v9 = vpop.f32.mrb[135].mxu0  ;;  %4746 = vrot.lane.b32.xlu1 %v4731_v6, %s9782_s9  ;;  %v7576_v38 = vpop.f32.mrb[137].mxu1 }
0x350f   : > { %v4734_v10 = vpop.f32.mrb[138].mxu1 }
0x3510   : > { %v7577_v11 = vpop.f32.mrb[139].mxu1 }
0x3578   : > { %v4739_v12 = vpop.permute.xlu1 %4738 }
0x3579   : > { %v4749_v13 = vsel %vm422_vm2, %v4583_v58, %v4739_v12 }
0x357e   : > { %v4743_v16 = vpop.permute.xlu0 %4742 }
0x357f   : > { %v4750_v17 = vsel %vm877_vm4, %v4749_v13, %v4743_v16  ;;  %v9412_v16 = vld [vmem:[#allocation5] sm:$0xff] }
0x3580   : > { %v4747_v18 = vpop.permute.xlu1 %4746 }
0x3581   : > { %v4751_v19 = vsel %vm879_vm5, %v4750_v17, %v4747_v18 }
0x3582   : > { %v4752_v51 = vpack.c.bf16 %v4751_v19, %v4751_v19 }
0x3584   : > { %7583 = vmatmul.mubr.msk.bf16.vlgmr.msra.gmra.mrb[136].mxu0 %vm318_vm0, %v4752_v51 }
0x3585   : > { %7602 = vmatprep.mubr.msk.bf16.mxu0 %vm8320_vm1, %v8319_v23  ;;  %7595 = vmatpush3.bf16.msra.mxu0 %v7925_v36 }
0x3586   : > { %7596 = vmatprep.subr.bf16.mxu0 %v8319_v23 }
0x3589   : > { %7597 = vmatpush3.bf16.msra.mxu0 %v7926_v39 }
0x358a   : > { %7598 = vmatprep.subr.bf16.mxu0 %v8319_v23 }
0x358d   : > { %7599 = vmatpush3.bf16.msra.mxu0 %v7927_v37 }
0x358e   : > { %7600 = vmatprep.subr.bf16.mxu0 %v8319_v23 }
0x3591   : > { %7601 = vmatpush3.bf16.msra.mxu0 %v7928_v40 }
0x3592   : > { %7612 = vmatprep.subr.bf16.mxu0 %v8319_v23 }
0x3657   : > { %v4802_v20 = vpop.f32.mrb[136].mxu0 }
0x3658   : > { %v4808_v8 = vadd.f32 %v4802_v20, %v9247_v3  ;;  %v7584_v22 = vpop.f32.mrb[137].mxu0 }
0x3659   : > { %v4805_v25 = vpop.f32.mrb[138].mxu0 }
0x365a   : > { %v7585_v26 = vpop.f32.mrb[139].mxu0  ;;  %v4809_v27 = vmul.f32 %v4808_v8, %v4808_v8 }
0x365c   : > { %v4810_v28 = vsel %vm318_vm0, %v4809_v27, 0.0 }
0x365d   : > { %4811 = vadd.xlane.f32.xlu0 %v4810_v28 }
0x36ea   : > { %v4812_v32 = vpop.xlane.xlu0 %4811 }
0x36eb   : > { %v4813_v33 = vmul.f32 0.03125, %v4812_v32 }
0x36ed   : > { %v4814_v0 = vadd.f32 1e-06, %v4813_v33 }
0x36ef   : > { %8095 = vrsqrt.f32 %v4814_v0 }
0x36f9   : > { %v8096_v34 = vpop.eup %8095 }
0x36fa   : > { %v4816_v35 = vmul.f32 %v8096_v34, %v4808_v8 }
0x36fc   : > { %v4817_v3 = vpack.c.bf16 %v4816_v35, %v4816_v35 }
0x36fe   : > { %7591 = vmatmul.mubr.msk.bf16.vlgmr.msra.gmra.mrb[140].mxu1 %vm318_vm0, %v4817_v3 }
0x36ff   : > { %5042 = vmatprep.mubr.bf16.mxu1 %v8315_v7  ;;  %5011 = vmatpush1.bf16.msra.mxu1 %v7929_v59 }
0x3700   : > { %5012 = vmatprep.subr.bf16.mxu1 %v7934_v60 }
0x3703   : > { %5013 = vmatpush1.bf16.msra.mxu1 %v7932_v62 }
0x3704   : > { %7606 = vmatprep.subr.bf16.mxu1 %v8319_v23 }
0x37d1   : > { %v4867_v41 = vpop.f32.mrb[140].mxu1 }
0x37d2   : > { %4881 = vrot.lane.b32.xlu1 %v4867_v41, %s9777_s12  ;;  %v7592_v42 = vpop.f32.mrb[141].mxu1  ;;  %v6842_v45 = vmul.f32 -1.442695, %v4867_v41 }
0x37d3   : > { %v4870_v43 = vpop.f32.mrb[142].mxu1 }
0x37d4   : > { %v7593_v44 = vpop.f32.mrb[143].mxu1  ;;  %8097 = vpow2.f32 %v6842_v45 }
0x37de   : > { %v8098_v46 = vpop.eup %8097 }
0x37df   : > { %v4876_v47 = vadd.f32 1.0, %v8098_v46 }
0x37e1   : > { %8099 = vrcp.f32 %v4876_v47 }
0x37eb   : > { %v8100_v48 = vpop.eup %8099 }
0x37ec   : > { %v4879_v14 = vmul.f32 %v8100_v48, %v4867_v41 }
0x3844   : > { %v4882_v49 = vpop.permute.xlu1 %4881 }
0x3845   : > { %v4884_v50 = vmul.f32 %v4882_v49, %v4879_v14 }
0x3847   : > { %v4885_v52 = vpack.c.bf16 %v4884_v50, %v4884_v50 }
0x3849   : > { %7603 = vmatmul.mubr.msk.bf16.vlgmr.msra.gmra.mrb[140].mxu0 %vm1039_vm6, %v4885_v52 }
0x384a   : > { %7614 = vmatprep.mubr.msk.bf16.mxu0 %vm8320_vm1, %v8319_v23 }
0x391c   : > { %v4947_v53 = vpop.f32.mrb[140].mxu0 }
0x391d   : > { %v9383_v54 = vadd.f32 %v4947_v53, %v4808_v8  ;;  %v7604_v55 = vpop.f32.mrb[141].mxu0 }
0x391e   : > { %v4950_v56 = vpop.f32.mrb[142].mxu0 }
0x391f   : > { %v7605_v57 = vpop.f32.mrb[143].mxu0  ;;  %v4978_v58 = vmul.f32 %v9383_v54, %v9383_v54 }
0x3921   : > { %v4979_v29 = vsel %vm318_vm0, %v4978_v58, 0.0 }
0x3922   : > { %4980 = vadd.xlane.f32.xlu1 %v4979_v29 }
0x39af   : > { %v4981_v63 = vpop.xlane.xlu1 %4980 }
0x39b0   : > { %v4982_v1 = vmul.f32 0.03125, %v4981_v63 }
0x39b2   : > { %v4983_v2 = vadd.f32 1e-06, %v4982_v1 }
0x39b4   : > { %8101 = vrsqrt.f32 %v4983_v2 }
0x39be   : > { %v8102_v4 = vpop.eup %8101 }
0x39bf   : > { %v4985_v5 = vmul.f32 %v8102_v4, %v9383_v54 }
0x39c1   : > { %v4986_v6 = vpack.c.bf16 %v4985_v5, %v4985_v5 }
0x39c3   : > { %6868 = vmatmul.mubr.msk.bf16.vlgmr.msra.gmra.mrb[144].mxu1 %vm318_vm0, %v4986_v6 }
0x39c4   : > { %7608 = vmatprep.mubr.msk.bf16.mxu1 %vm8320_vm1, %v8319_v23 }
0x3a96   : > { %v9405_v9 = vpop.f32.mrb[144].mxu1 }
0x3a97   : > { %v5052_v38 = vmul.f32 %v9405_v9, %v8579_v21  ;;  %v5046_v10 = vpop.f32.mrb[145].mxu1  ;;  %v5051_v17 = vmul.f32 %v9412_v16, %v9405_v9  ;;  %v5058_v19 = vmul.f32 %v9405_v9, %v8586_v24  ;;  %v5067_v58 = vpack.c.bf16 %v9405_v9, %v9405_v9 }
0x3a98   : > { %v5059_v11 = vmul.f32 %v5046_v10, %v8573_v15  ;;  %v5048_v12 = vpop.f32.mrb[146].mxu1 }
0x3a99   : > { %5054 = vrot.lane.b32.xlu1 %v5052_v38, %s9783_s4  ;;  %v5049_v13 = vpop.f32.mrb[147].mxu1 }
0x3a9a   : > { %5061 = vrot.lane.b32.xlu0 %v5059_v11, %s9783_s4 }
0x3b0b   : > { %v5055_v18 = vpop.permute.xlu1 %5054 }
0x3b0c   : > { %v5057_v51 = vadd.f32 %v5055_v18, %v5051_v17  ;;  %v5062_v20 = vpop.permute.xlu0 %5061 }
0x3b0d   : > { %v5064_v8 = vadd.f32 %v5062_v20, %v5058_v19 }
0x3b0e   : > { %v5065_v22 = vpack.c.bf16 %v5057_v51, %v5057_v51 }
0x3b0f   : > { %v5066_v25 = vpack.c.bf16 %v5064_v8, %v5064_v8 }
0x3b10   : > { %5118 = vrot.lane.b32.xlu1 %v5065_v22, %s9784_s0 }
0x3b11   : > { %5069 = vrot.lane.b32.xlu0 %v5066_v25, %s9785_s1 }
0x3b14   : > { %5220 = vrot.lane.b32.xlu1 %v5066_v25, %s9786_s7 }
0x3b15   : > { %5120 = vrot.lane.b32.xlu0 %v5066_v25, %s9787_s20 }
0x3b18   : > { %5218 = vrot.lane.b32.xlu1 %v5065_v22, %s9788_s14 }
0x3b19   : > { %5170 = vrot.lane.b32.xlu0 %v5066_v25, %s9774_s13 }
0x3b1d   : > { %5168 = vrot.lane.b32.xlu0 %v5065_v22, %s9775_s11 }
0x3b82   : > { %v5119_v28 = vpop.permute.xlu1 %5118 }
0x3b83   : > { %v5070_v26 = vpop.permute.xlu0 %5069 }
0x3b84   : > { %v5075_v27 = vsel %vm422_vm2, %v5070_v26, 0 }
0x3b85   : > { %7607 = vmatpush3.bf16.xpose.msra.mxu1 %v5075_v27 }
0x3b86   : > { %7618 = vmatprep.subr.bf16.mxu1 %v8319_v23  ;;  %v5221_v0 = vpop.permute.xlu1 %5220 }
0x3b87   : > { %v5121_v30 = vpop.permute.xlu0 %5120  ;;  %v5226_v34 = vsel %vm422_vm2, %v5221_v0, 0 }
0x3b88   : > { %v5126_v31 = vsel %vm422_vm2, %v5121_v30, 0 }
0x3b89   : > { %7613 = vmatpush3.bf16.xpose.msra.mxu0 %v5126_v31 }
0x3b8a   : > { %7624 = vmatprep.subr.bf16.mxu0 %v8319_v23  ;;  %v5219_v3 = vpop.permute.xlu1 %5218 }
0x3b8b   : > { %v5171_v32 = vpop.permute.xlu0 %5170 }
0x3b8c   : > { %v5176_v33 = vsel %vm422_vm2, %v5171_v32, 0  ;;  %7609 = vmatmul.mubr.msk.bf16.vlgmr.msra.gmra.mrb[148].mxu1 %vm422_vm2, %v5065_v22 }
0x3b8d   : > { %7619 = vmatpush3.bf16.xpose.msra.mxu1 %v5176_v33  ;;  %7620 = vmatprep.mubr.msk.bf16.mxu1 %vm8320_vm1, %v8319_v23 }
0x3b8e   : > { %7630 = vmatprep.subr.bf16.mxu1 %v8319_v23 }
0x3b8f   : > { %v5169_v35 = vpop.permute.xlu0 %5168 }
0x3b90   : > { %7615 = vmatmul.mubr.msk.bf16.vlgmr.msra.gmra.mrb[144].mxu0 %vm422_vm2, %v5119_v28 }
0x3b91   : > { %7625 = vmatpush3.bf16.xpose.msra.mxu0 %v5226_v34  ;;  %7626 = vmatprep.mubr.msk.bf16.mxu0 %vm8320_vm1, %v8319_v23 }
0x3b92   : > { %7636 = vmatprep.subr.bf16.mxu0 %v8319_v23 }
0x3b94   : > { %7621 = vmatmul.mubr.msk.bf16.vlgmr.msra.gmra.mrb[152].mxu1 %vm422_vm2, %v5169_v35 }
0x3b95   : > { %7632 = vmatprep.mubr.msk.bf16.mxu1 %vm8320_vm1, %v8319_v23 }
0x3b98   : > { %7627 = vmatmul.mubr.msk.bf16.vlgmr.msra.gmra.mrb[148].mxu0 %vm422_vm2, %v5219_v3 }
0x3b99   : > { %7638 = vmatprep.mubr.msk.bf16.mxu0 %vm8320_vm1, %v8319_v23 }
0x3c5f   : > { %v5111_v36 = vpop.f32.mrb[148].mxu1 }
0x3c60   : > { %v7610_v39 = vpop.f32.mrb[149].mxu1  ;;  %v5268_v37 = vsel %vm422_vm2, %v5111_v36, -inf }
0x3c61   : > { %5269 = vmax.xlane.f32.xlu0 %v5268_v37  ;;  %v5114_v40 = vpop.f32.mrb[150].mxu1 }
0x3c62   : > { %v7611_v41 = vpop.f32.mrb[151].mxu1 }
0x3c63   : > { %v5162_v42 = vpop.f32.mrb[144].mxu0 }
0x3c64   : > { %v7616_v43 = vpop.f32.mrb[145].mxu0  ;;  %v5271_v44 = vsel %vm422_vm2, %v5162_v42, -inf }
0x3c65   : > { %5272 = vmax.xlane.f32.xlu1 %v5271_v44  ;;  %v5165_v45 = vpop.f32.mrb[146].mxu0 }
0x3c66   : > { %v7617_v46 = vpop.f32.mrb[147].mxu0  ;;  %v7935_v45 = vld [vmem:[%s9707_s3 + $0x60] sm:$0xff]  }
0x3c67   : > { %v5212_v47 = vpop.f32.mrb[152].mxu1  ;;  %v7936_v46 = vld [vmem:[%s9707_s3 + $0x68] sm:$0xff]  }
0x3c68   : > { %v7622_v48 = vpop.f32.mrb[153].mxu1  ;;  %v5274_v14 = vsel %vm422_vm2, %v5212_v47, -inf }
0x3c69   : > { %5275 = vmax.xlane.f32.xlu0 %v5274_v14  ;;  %v5215_v49 = vpop.f32.mrb[154].mxu1 }
0x3c6a   : > { %v7623_v50 = vpop.f32.mrb[155].mxu1 }
0x3c6b   : > { %v5262_v52 = vpop.f32.mrb[148].mxu0 }
0x3c6c   : > { %v7628_v53 = vpop.f32.mrb[149].mxu0  ;;  %v5277_v55 = vsel %vm422_vm2, %v5262_v52, -inf }
0x3c6d   : > { %v5265_v56 = vpop.f32.mrb[150].mxu0  ;;  %5278 = vmax.xlane.f32.xlu0 %v5277_v55 }
0x3c6e   : > { %v7629_v57 = vpop.f32.mrb[151].mxu0 }
0x3c76   : > { %5315 = vrot.lane.b32.xlu1 %v5067_v58, %s9777_s12 }
0x3cee   : > { %v5270_v29 = vpop.xlane.xlu0 %5269 }
0x3cef   : > { %v5280_v59 = vsub.f32 %v5111_v36, %v5270_v29 }
0x3cf1   : > { %v5284_v61 = vmul.f32 1.442695, %v5280_v59 }
0x3cf2   : > { %v5273_v60 = vpop.xlane.xlu1 %5272 }
0x3cf3   : > { %8103 = vpow2.f32 %v5284_v61  ;;  %v5281_v62 = vsub.f32 %v5162_v42, %v5273_v60 }
0x3cf5   : > { %v5286_v63 = vmul.f32 1.442695, %v5281_v62 }
0x3cf6   : > { %v5316_v1 = vpop.permute.xlu1 %5315  ;;  %v5276_v2 = vpop.xlane.xlu0 %5275 }
0x3cf7   : > { %8105 = vpow2.f32 %v5286_v63  ;;  %v5321_v4 = vsel %vm672_vm3, %v5316_v1, 0  ;;  %v5282_v5 = vsub.f32 %v5212_v47, %v5276_v2 }
0x3cf8   : > { %7631 = vmatpush3.bf16.msra.mxu1 %v5321_v4 }
0x3cf9   : > { %v5288_v6 = vmul.f32 1.442695, %v5282_v5  ;;  %7642 = vmatprep.subr.bf16.mxu1 %v8319_v23 }
0x3cfa   : > { %v5279_v9 = vpop.xlane.xlu0 %5278 }
0x3cfb   : > { %8107 = vpow2.f32 %v5288_v6  ;;  %v5283_v38 = vsub.f32 %v5262_v52, %v5279_v9 }
0x3cfd   : > { %v8104_v10 = vpop.eup %8103  ;;  %v5290_v11 = vmul.f32 1.442695, %v5283_v38 }
0x3cfe   : > { %v5292_v12 = vsel %vm422_vm2, %v8104_v10, 0.0 }
0x3cff   : > { %8109 = vpow2.f32 %v5290_v11  ;;  %5293 = vadd.xlane.f32.xlu1 %v5292_v12 }
0x3d01   : > { %v8106_v13 = vpop.eup %8105 }
0x3d02   : > { %v5295_v17 = vsel %vm422_vm2, %v8106_v13, 0.0 }
0x3d03   : > { %5296 = vadd.xlane.f32.xlu0 %v5295_v17 }
0x3d05   : > { %v8108_v18 = vpop.eup %8107 }
0x3d06   : > { %v5298_v19 = vsel %vm422_vm2, %v8108_v18, 0.0 }
0x3d07   : > { %5299 = vadd.xlane.f32.xlu1 %v5298_v19  ;;  %v7937_v19 = vld [vmem:[#allocation7 + $0x60] sm:$0xff]  }
0x3d09   : > { %v8110_v51 = vpop.eup %8109 }
0x3d0a   : > { %v5301_v20 = vsel %vm422_vm2, %v8110_v51, 0.0 }
0x3d0b   : > { %5302 = vadd.xlane.f32.xlu0 %v5301_v20 }
0x3d18   : > { %5413 = vrot.lane.b32.xlu1 %v5067_v58, %s9778_s26 }
0x3d1c   : > { %5463 = vrot.lane.b32.xlu1 %v5067_v58, %s9779_s16 }
0x3d21   : > { %5365 = vrot.lane.b32.xlu0 %v5067_v58, %s9776_s29 }
0x3d8c   : > { %v5294_v8 = vpop.xlane.xlu1 %5293 }
0x3d8d   : > { %8111 = vrcp.f32 %v5294_v8 }
0x3d90   : > { %v5297_v22 = vpop.xlane.xlu0 %5296 }
0x3d91   : > { %8113 = vrcp.f32 %v5297_v22 }
0x3d94   : > { %v5300_v25 = vpop.xlane.xlu1 %5299 }
0x3d95   : > { %8115 = vrcp.f32 %v5300_v25 }
0x3d97   : > { %v8112_v27 = vpop.eup %8111 }
0x3d98   : > { %v5303_v26 = vpop.xlane.xlu0 %5302  ;;  %v5414_v28 = vpop.permute.xlu1 %5413  ;;  %v5308_v31 = vmul.f32 %v8112_v27, %v8104_v10  ;;  %v7939_v27 = vld [vmem:[%s9709_s5 + $0xc0] sm:$0xff]  }
0x3d99   : > { %8117 = vrcp.f32 %v5303_v26  ;;  %v5419_v3 = vsel %vm672_vm3, %v5414_v28, 0  ;;  %v7940_v28 = vld [vmem:[%s9709_s5 + $0xc8] sm:$0xff]  }
0x3d9b   : > { %v8114_v30 = vpop.eup %8113 }
0x3d9c   : > { %v5309_v32 = vmul.f32 %v8114_v30, %v8106_v13  ;;  %v5366_v33 = vpop.permute.xlu0 %5365  ;;  %v5464_v35 = vpop.permute.xlu1 %5463  ;;  %v7941_v30 = vld [vmem:[%s9709_s5 + $0xd0] sm:$0xff]  }
0x3d9d   : > { %v5371_v0 = vsel %vm672_vm3, %v5366_v33, 0  ;;  %v5469_v37 = vsel %vm672_vm3, %v5464_v35, 0 }
0x3d9e   : > { %7637 = vmatpush3.bf16.msra.mxu0 %v5371_v0  ;;  %v5312_v34 = vpack.c.bf16 %v5309_v32, %v5308_v31 }
0x3d9f   : > { %7648 = vmatprep.subr.bf16.mxu0 %v8319_v23  ;;  %v8116_v39 = vpop.eup %8115 }
0x3da0   : > { %7633 = vmatmul.mubr.msk.bf16.vlgmr.msra.gmra.mrb[156].mxu1 %vm422_vm2, %v5312_v34  ;;  %v5364_v36 = vrot.slane %v5312_v34, 4  ;;  %v5310_v41 = vmul.f32 %v8116_v39, %v8108_v18 }
0x3da1   : > { %7643 = vmatpush3.bf16.msra.mxu1 %v5419_v3  ;;  %7644 = vmatprep.mubr.msk.bf16.mxu1 %vm8320_vm1, %v8319_v23 }
0x3da2   : > { %7639 = vmatmul.mubr.msk.bf16.vlgmr.msra.gmra.mrb[152].mxu0 %vm422_vm2, %v5364_v36  ;;  %7654 = vmatprep.subr.bf16.mxu1 %v8319_v23 }
0x3da3   : > { %v8118_v40 = vpop.eup %8117  ;;  %7649 = vmatpush3.bf16.msra.mxu0 %v5469_v37  ;;  %7650 = vmatprep.mubr.msk.bf16.mxu0 %vm8320_vm1, %v8319_v23 }
0x3da4   : > { %v5311_v42 = vmul.f32 %v8118_v40, %v8110_v51  ;;  %7662 = vmatprep.subr.bf16.mxu0 %v8319_v23  ;;  %v7938_v51 = vld [vmem:[#allocation7 + $0x68] sm:$0xff]  }
0x3da6   : > { %v5313_v43 = vpack.c.bf16 %v5311_v42, %v5310_v41 }
0x3da8   : > { %7645 = vmatmul.mubr.msk.bf16.vlgmr.msra.gmra.mrb[160].mxu1 %vm422_vm2, %v5313_v43  ;;  %v5462_v44 = vrot.slane %v5313_v43, 4 }
0x3da9   : > { %7658 = vmatprep.mubr.msk.bf16.mxu1 %vm8320_vm1, %v8319_v23  ;;  %7655 = vmatpush3.bf16.msra.mxu1 %v7935_v45 }
0x3daa   : > { %7651 = vmatmul.mubr.msk.bf16.vlgmr.msra.gmra.mrb[156].mxu0 %vm422_vm2, %v5462_v44  ;;  %7656 = vmatprep.subr.bf16.mxu1 %v8319_v23 }
0x3dab   : > { %7666 = vmatprep.mubr.msk.bf16.mxu0 %vm8320_vm1, %v8319_v23  ;;  %7663 = vmatpush3.bf16.msra.mxu0 %v7937_v19 }
0x3dac   : > { %7664 = vmatprep.subr.bf16.mxu0 %v8319_v23 }
0x3dad   : > { %7657 = vmatpush3.bf16.msra.mxu1 %v7936_v46 }
0x3dae   : > { %7670 = vmatprep.subr.bf16.mxu1 %v8319_v23 }
0x3daf   : > { %7665 = vmatpush3.bf16.msra.mxu0 %v7938_v51 }
0x3e73   : > { %v5357_v47 = vpop.f32.mrb[156].mxu1 }
0x3e74   : > { %v7634_v48 = vpop.f32.mrb[157].mxu1 }
0x3e75   : > { %v5360_v14 = vpop.f32.mrb[158].mxu1  ;;  %v5407_v49 = vpop.f32.mrb[152].mxu0 }
0x3e76   : > { %5512 = vrot.lane.b32.xlu0 %v5407_v49, %s9780_s27  ;;  %v7635_v50 = vpop.f32.mrb[159].mxu1  ;;  %v7640_v52 = vpop.f32.mrb[153].mxu0  ;;  %v7943_v14 = vld [vmem:[%s9706_s2 + $0xe0] ss:$8 sps:$4 sm:$0xff]   ;;  %v7945_v49 = vld [vmem:[%s9706_s2 + $0xe4] ss:$8 sps:$4 sm:$0xff]  }
0x3e77   : > { %v5410_v53 = vpop.f32.mrb[154].mxu0  ;;  %v7948_v50 = vld [vmem:[%s9706_s2 + $0xf4] ss:$8 sps:$4 sm:$0xff]   ;;  %5784 = vmatprep.subr.bf16.mxu0 %v7945_v49  ;;  %v7946_v52 = vld [vmem:[%s9706_s2 + $0xf0] ss:$8 sps:$4 sm:$0xff]  }
0x3e78   : > { %v7641_v55 = vpop.f32.mrb[155].mxu0 }
0x3e7b   : > { %v5455_v56 = vpop.f32.mrb[160].mxu1 }
0x3e7c   : > { %5516 = vrot.lane.b32.xlu1 %v5455_v56, %s9781_s10  ;;  %v7646_v57 = vpop.f32.mrb[161].mxu1 }
0x3e7d   : > { %v5458_v58 = vpop.f32.mrb[162].mxu1  ;;  %v5505_v29 = vpop.f32.mrb[156].mxu0 }
0x3e7e   : > { %5520 = vrot.lane.b32.xlu0 %v5505_v29, %s9782_s9  ;;  %v7647_v59 = vpop.f32.mrb[163].mxu1  ;;  %v7652_v61 = vpop.f32.mrb[157].mxu0 }
0x3e7f   : > { %v5508_v60 = vpop.f32.mrb[158].mxu0 }
0x3e80   : > { %v7653_v62 = vpop.f32.mrb[159].mxu0 }
0x3ee8   : > { %v5513_v63 = vpop.permute.xlu0 %5512 }
0x3ee9   : > { %v5523_v1 = vsel %vm422_vm2, %v5357_v47, %v5513_v63 }
0x3eee   : > { %v5517_v2 = vpop.permute.xlu1 %5516 }
0x3eef   : > { %v5524_v4 = vsel %vm877_vm4, %v5523_v1, %v5517_v2 }
0x3ef0   : > { %v5521_v5 = vpop.permute.xlu0 %5520 }
0x3ef1   : > { %v5525_v6 = vsel %vm879_vm5, %v5524_v4, %v5521_v5 }
0x3ef2   : > { %v5526_v9 = vpack.c.bf16 %v5525_v6, %v5525_v6 }
0x3ef4   : > { %7659 = vmatmul.mubr.msk.bf16.vlgmr.msra.gmra.mrb[164].mxu1 %vm318_vm0, %v5526_v9 }
0x3ef5   : > { %7678 = vmatprep.mubr.msk.bf16.mxu1 %vm8320_vm1, %v8319_v23  ;;  %7671 = vmatpush3.bf16.msra.mxu1 %v7939_v27 }
0x3ef6   : > { %7672 = vmatprep.subr.bf16.mxu1 %v8319_v23 }
0x3ef9   : > { %7673 = vmatpush3.bf16.msra.mxu1 %v7940_v28 }
0x3efa   : > { %7674 = vmatprep.subr.bf16.mxu1 %v8319_v23 }
0x3efd   : > { %7675 = vmatpush3.bf16.msra.mxu1 %v7941_v30 }
0x3efe   : > { %7676 = vmatprep.subr.bf16.mxu1 %v8319_v23 }
0x3fc7   : > { %v5576_v38 = vpop.f32.mrb[164].mxu1 }
0x3fc8   : > { %v5582_v10 = vadd.f32 %v5576_v38, %v9383_v54  ;;  %v7660_v11 = vpop.f32.mrb[165].mxu1 }
0x3fc9   : > { %v5579_v12 = vpop.f32.mrb[166].mxu1 }
0x3fca   : > { %v7661_v13 = vpop.f32.mrb[167].mxu1  ;;  %v5583_v17 = vmul.f32 %v5582_v10, %v5582_v10 }
0x3fcc   : > { %v5584_v18 = vsel %vm318_vm0, %v5583_v17, 0.0 }
0x3fcd   : > { %5585 = vadd.xlane.f32.xlu1 %v5584_v18 }
0x405a   : > { %v5586_v20 = vpop.xlane.xlu1 %5585 }
0x405b   : > { %v5587_v8 = vmul.f32 0.03125, %v5586_v20 }
0x405d   : > { %v5588_v22 = vadd.f32 1e-06, %v5587_v8 }
0x405f   : > { %8119 = vrsqrt.f32 %v5588_v22 }
0x4069   : > { %v8120_v25 = vpop.eup %8119 }
0x406a   : > { %v5590_v26 = vmul.f32 %v8120_v25, %v5582_v10 }
0x406c   : > { %v5591_v54 = vpack.c.bf16 %v5590_v26, %v5590_v26 }
0x406e   : > { %7667 = vmatmul.mubr.msk.bf16.vlgmr.msra.gmra.mrb[160].mxu0 %vm318_vm0, %v5591_v54 }
0x406f   : > { %5816 = vmatprep.mubr.bf16.mxu0 %v8315_v7  ;;  %v7942_v7 = vld [vmem:[%s9709_s5 + $0xd8] sm:$0xff]   ;;  %5785 = vmatpush1.bf16.msra.mxu0 %v7943_v14 }
0x4070   : > { %7677 = vmatpush3.bf16.msra.mxu1 %v7942_v7  ;;  %5786 = vmatprep.subr.bf16.mxu0 %v7948_v50 }
0x4071   : > { %7688 = vmatprep.subr.bf16.mxu1 %v8319_v23 }
0x4073   : > { %5787 = vmatpush1.bf16.msra.mxu0 %v7946_v52 }
0x4074   : > { %7682 = vmatprep.subr.bf16.mxu0 %v8319_v23 }
0x4141   : > { %v5641_v31 = vpop.f32.mrb[160].mxu0 }
0x4142   : > { %5655 = vrot.lane.b32.xlu0 %v5641_v31, %s9777_s12  ;;  %v7668_v32 = vpop.f32.mrb[161].mxu0  ;;  %v6883_v34 = vmul.f32 -1.442695, %v5641_v31 }
0x4143   : > { %v5644_v33 = vpop.f32.mrb[162].mxu0 }
0x4144   : > { %v7669_v0 = vpop.f32.mrb[163].mxu0  ;;  %8121 = vpow2.f32 %v6883_v34 }
0x414e   : > { %v8122_v35 = vpop.eup %8121 }
0x414f   : > { %v5650_v3 = vadd.f32 1.0, %v8122_v35 }
0x4151   : > { %8123 = vrcp.f32 %v5650_v3 }
0x415b   : > { %v8124_v36 = vpop.eup %8123 }
0x415c   : > { %v5653_v39 = vmul.f32 %v8124_v36, %v5641_v31 }
0x41b4   : > { %v5656_v37 = vpop.permute.xlu0 %5655 }
0x41b5   : > { %v5658_v40 = vmul.f32 %v5656_v37, %v5653_v39 }
0x41b7   : > { %v5659_v41 = vpack.c.bf16 %v5658_v40, %v5658_v40 }
0x41b9   : > { %7679 = vmatmul.mubr.msk.bf16.vlgmr.msra.gmra.mrb[168].mxu1 %vm1039_vm6, %v5659_v41 }
0x41ba   : > { %7690 = vmatprep.mubr.msk.bf16.mxu1 %vm8320_vm1, %v8319_v23 }
0x428c   : > { %v5721_v42 = vpop.f32.mrb[168].mxu1 }
0x428d   : > { %v9521_v43 = vadd.f32 %v5721_v42, %v5582_v10  ;;  %v7680_v44 = vpop.f32.mrb[169].mxu1 }
0x428e   : > { %v5724_v45 = vpop.f32.mrb[170].mxu1 }
0x428f   : > { %v7681_v46 = vpop.f32.mrb[171].mxu1  ;;  %v5752_v47 = vmul.f32 %v9521_v43, %v9521_v43 }
0x4291   : > { %v5753_v48 = vsel %vm318_vm0, %v5752_v47, 0.0 }
0x4292   : > { %5754 = vadd.xlane.f32.xlu0 %v5753_v48 }
0x431f   : > { %v5755_v53 = vpop.xlane.xlu0 %5754 }
0x4320   : > { %v5756_v55 = vmul.f32 0.03125, %v5755_v53 }
0x4322   : > { %v5757_v56 = vadd.f32 1e-06, %v5756_v55 }
0x4324   : > { %8125 = vrsqrt.f32 %v5757_v56 }
0x432e   : > { %v8126_v57 = vpop.eup %8125 }
0x432f   : > { %v5759_v58 = vmul.f32 %v8126_v57, %v9521_v43 }
0x4331   : > { %v5760_v29 = vpack.c.bf16 %v5759_v58, %v5759_v58 }
0x4333   : > { %6909 = vmatmul.mubr.msk.bf16.vlgmr.msra.gmra.mrb[164].mxu0 %vm318_vm0, %v5760_v29 }
0x4334   : > { %7684 = vmatprep.mubr.msk.bf16.mxu0 %vm8320_vm1, %v8319_v23 }
0x4406   : > { %v9543_v59 = vpop.f32.mrb[164].mxu0 }
0x4407   : > { %v5826_v61 = vmul.f32 %v9543_v59, %v8579_v21  ;;  %v5820_v60 = vpop.f32.mrb[165].mxu0  ;;  %v5825_v2 = vmul.f32 %v9412_v16, %v9543_v59  ;;  %v5832_v5 = vmul.f32 %v9543_v59, %v8586_v24  ;;  %v5841_v41 = vpack.c.bf16 %v9543_v59, %v9543_v59 }
0x4408   : > { %v5833_v62 = vmul.f32 %v5820_v60, %v8573_v15  ;;  %v5822_v63 = vpop.f32.mrb[166].mxu0 }
0x4409   : > { %5828 = vrot.lane.b32.xlu0 %v5826_v61, %s9783_s4  ;;  %v5823_v1 = vpop.f32.mrb[167].mxu0 }
0x440a   : > { %5835 = vrot.lane.b32.xlu1 %v5833_v62, %s9783_s4 }
0x447b   : > { %v5829_v4 = vpop.permute.xlu0 %5828 }
0x447c   : > { %v5831_v6 = vadd.f32 %v5829_v4, %v5825_v2  ;;  %v5836_v9 = vpop.permute.xlu1 %5835 }
0x447d   : > { %v5838_v38 = vadd.f32 %v5836_v9, %v5832_v5 }
0x447e   : > { %v5839_v21 = vpack.c.bf16 %v5831_v6, %v5831_v6 }
0x447f   : > { %v5840_v10 = vpack.c.bf16 %v5838_v38, %v5838_v38 }
0x4480   : > { %5892 = vrot.lane.b32.xlu0 %v5839_v21, %s9784_s0 }
0x4481   : > { %5843 = vrot.lane.b32.xlu1 %v5840_v10, %s9785_s1 }
0x4484   : > { %5994 = vrot.lane.b32.xlu0 %v5840_v10, %s9786_s7 }
0x4485   : > { %5894 = vrot.lane.b32.xlu1 %v5840_v10, %s9787_s20  ;;  %s6931_s20 = sshll.u32 %s8390_s25, 7  ;;  %s6504_s25 = scalar_lea.sflag [#allocation4], %s8531_s18 }
0x4486   : > { %s9659_s19 = scalar_lea.hbm %s9710_s6, %s6931_s20 }
0x4488   : > { %5992 = vrot.lane.b32.xlu0 %v5839_v21, %s9788_s14 }
0x4489   : > { %5944 = vrot.lane.b32.xlu1 %v5840_v10, %s9774_s13 }
0x448d   : > { %5942 = vrot.lane.b32.xlu1 %v5839_v21, %s9775_s11 }
0x44f2   : > { %v5893_v16 = vpop.permute.xlu0 %5892 }
0x44f3   : > { %v5844_v15 = vpop.permute.xlu1 %5843 }
0x44f4   : > { %v5849_v24 = vsel %vm422_vm2, %v5844_v15, 0 }
0x44f5   : > { %7683 = vmatpush3.bf16.xpose.msra.mxu0 %v5849_v24 }
0x44f6   : > { %7694 = vmatprep.subr.bf16.mxu0 %v8319_v23  ;;  %v5995_v18 = vpop.permute.xlu0 %5994 }
0x44f7   : > { %v5895_v11 = vpop.permute.xlu1 %5894  ;;  %v6000_v19 = vsel %vm422_vm2, %v5995_v18, 0 }
0x44f8   : > { %v5900_v12 = vsel %vm422_vm2, %v5895_v11, 0 }
0x44f9   : > { %7689 = vmatpush3.bf16.xpose.msra.mxu1 %v5900_v12 }
0x44fa   : > { %7700 = vmatprep.subr.bf16.mxu1 %v8319_v23  ;;  %v5993_v20 = vpop.permute.xlu0 %5992 }
0x44fb   : > { %v5945_v13 = vpop.permute.xlu1 %5944 }
0x44fc   : > { %v5950_v17 = vsel %vm422_vm2, %v5945_v13, 0  ;;  %7685 = vmatmul.mubr.msk.bf16.vlgmr.msra.gmra.mrb[168].mxu0 %vm422_vm2, %v5839_v21 }
0x44fd   : > { %7695 = vmatpush3.bf16.xpose.msra.mxu0 %v5950_v17  ;;  %7696 = vmatprep.mubr.msk.bf16.mxu0 %vm8320_vm1, %v8319_v23 }
0x44fe   : > { %7706 = vmatprep.subr.bf16.mxu0 %v8319_v23 }
0x44ff   : > { %v5943_v51 = vpop.permute.xlu1 %5942 }
0x4500   : > { %7691 = vmatmul.mubr.msk.bf16.vlgmr.msra.gmra.mrb[172].mxu1 %vm422_vm2, %v5893_v16 }
0x4501   : > { %7701 = vmatpush3.bf16.xpose.msra.mxu1 %v6000_v19  ;;  %7702 = vmatprep.mubr.msk.bf16.mxu1 %vm8320_vm1, %v8319_v23 }
0x4502   : > { %7712 = vmatprep.subr.bf16.mxu1 %v8319_v23 }
0x4504   : > { %7697 = vmatmul.mubr.msk.bf16.vlgmr.msra.gmra.mrb[172].mxu0 %vm422_vm2, %v5943_v51 }
0x4505   : > { %7708 = vmatprep.mubr.msk.bf16.mxu0 %vm8320_vm1, %v8319_v23 }
0x4508   : > { %7703 = vmatmul.mubr.msk.bf16.vlgmr.msra.gmra.mrb[176].mxu1 %vm422_vm2, %v5993_v20 }
0x4509   : > { %7714 = vmatprep.mubr.msk.bf16.mxu1 %vm8320_vm1, %v8319_v23 }
0x45cf   : > { %v5885_v8 = vpop.f32.mrb[168].mxu0 }
0x45d0   : > { %v7686_v22 = vpop.f32.mrb[169].mxu0  ;;  %v6042_v25 = vsel %vm422_vm2, %v5885_v8, -inf }
0x45d1   : > { %6043 = vmax.xlane.f32.xlu1 %v6042_v25  ;;  %v5888_v26 = vpop.f32.mrb[170].mxu0 }
0x45d2   : > { %v7687_v54 = vpop.f32.mrb[171].mxu0  ;;  %v7949_v26 = vld [vmem:[%s9707_s3 + $0x70] sm:$0xff]  }
0x45d3   : > { %v5936_v27 = vpop.f32.mrb[172].mxu1  ;;  %v7950_v54 = vld [vmem:[%s9707_s3 + $0x78] sm:$0xff]  }
0x45d4   : > { %v7692_v28 = vpop.f32.mrb[173].mxu1  ;;  %v6045_v30 = vsel %vm422_vm2, %v5936_v27, -inf }
0x45d5   : > { %6046 = vmax.xlane.f32.xlu0 %v6045_v30  ;;  %v5939_v7 = vpop.f32.mrb[174].mxu1 }
0x45d6   : > { %v7693_v31 = vpop.f32.mrb[175].mxu1 }
0x45d7   : > { %v5986_v32 = vpop.f32.mrb[172].mxu0 }
0x45d8   : > { %v7698_v33 = vpop.f32.mrb[173].mxu0  ;;  %v6048_v0 = vsel %vm422_vm2, %v5986_v32, -inf }
0x45d9   : > { %v5989_v34 = vpop.f32.mrb[174].mxu0  ;;  %6049 = vmax.xlane.f32.xlu0 %v6048_v0 }
0x45da   : > { %v7699_v35 = vpop.f32.mrb[175].mxu0 }
0x45db   : > { %v6036_v3 = vpop.f32.mrb[176].mxu1 }
0x45dc   : > { %v7704_v36 = vpop.f32.mrb[177].mxu1  ;;  %v6051_v39 = vsel %vm422_vm2, %v6036_v3, -inf }
0x45dd   : > { %6052 = vmax.xlane.f32.xlu1 %v6051_v39  ;;  %v6039_v37 = vpop.f32.mrb[178].mxu1 }
0x45de   : > { %v7705_v40 = vpop.f32.mrb[179].mxu1 }
0x45ee   : > { %6139 = vrot.lane.b32.xlu1 %v5841_v41, %s9776_s29 }
0x45ef   : > { %6089 = vrot.lane.b32.xlu0 %v5841_v41, %s9777_s12 }
0x465e   : > { %v6044_v42 = vpop.xlane.xlu1 %6043 }
0x465f   : > { %v6054_v44 = vsub.f32 %v5885_v8, %v6044_v42 }
0x4661   : > { %v6058_v45 = vmul.f32 1.442695, %v6054_v44 }
0x4662   : > { %v6047_v46 = vpop.xlane.xlu0 %6046 }
0x4663   : > { %8127 = vpow2.f32 %v6058_v45  ;;  %v6055_v47 = vsub.f32 %v5936_v27, %v6047_v46 }
0x4665   : > { %v6060_v48 = vmul.f32 1.442695, %v6055_v47 }
0x4666   : > { %v6050_v14 = vpop.xlane.xlu0 %6049 }
0x4667   : > { %8129 = vpow2.f32 %v6060_v48  ;;  %v6056_v49 = vsub.f32 %v5986_v32, %v6050_v14 }
0x4669   : > { %v6062_v50 = vmul.f32 1.442695, %v6056_v49 }
0x466a   : > { %v6090_v52 = vpop.permute.xlu0 %6089  ;;  %v6053_v53 = vpop.xlane.xlu1 %6052 }
0x466b   : > { %8131 = vpow2.f32 %v6062_v50  ;;  %v6095_v55 = vsel %vm672_vm3, %v6090_v52, 0  ;;  %v6057_v56 = vsub.f32 %v6036_v3, %v6053_v53 }
0x466c   : > { %7707 = vmatpush3.bf16.msra.mxu0 %v6095_v55 }
0x466d   : > { %v8128_v57 = vpop.eup %8127  ;;  %v6064_v58 = vmul.f32 1.442695, %v6057_v56  ;;  %7718 = vmatprep.subr.bf16.mxu0 %v8319_v23 }
0x466e   : > { %v6140_v29 = vpop.permute.xlu1 %6139  ;;  %v6066_v59 = vsel %vm422_vm2, %v8128_v57, 0.0 }
0x466f   : > { %8133 = vpow2.f32 %v6064_v58  ;;  %v6145_v61 = vsel %vm672_vm3, %v6140_v29, 0  ;;  %6067 = vadd.xlane.f32.xlu0 %v6066_v59  ;;  %v7951_v58 = vld [vmem:[#allocation7 + $0x70] sm:$0xff]   ;;  %v7952_v29 = vld [vmem:[#allocation7 + $0x78] sm:$0xff]  }
0x4670   : > { %7713 = vmatpush3.bf16.msra.mxu1 %v6145_v61 }
0x4671   : > { %v8130_v60 = vpop.eup %8129  ;;  %7724 = vmatprep.subr.bf16.mxu1 %v8319_v23 }
0x4672   : > { %v6069_v62 = vsel %vm422_vm2, %v8130_v60, 0.0 }
0x4673   : > { %6070 = vadd.xlane.f32.xlu1 %v6069_v62 }
0x4675   : > { %v8132_v63 = vpop.eup %8131 }
0x4676   : > { %v6072_v1 = vsel %vm422_vm2, %v8132_v63, 0.0 }
0x4677   : > { %6073 = vadd.xlane.f32.xlu0 %v6072_v1  ;;  %v7953_v1 = vld [vmem:[%s9709_s5 + $0xe0] sm:$0xff]  }
0x4679   : > { %v8134_v2 = vpop.eup %8133 }
0x467a   : > { %v6075_v4 = vsel %vm422_vm2, %v8134_v2, 0.0 }
0x467b   : > { %6076 = vadd.xlane.f32.xlu1 %v6075_v4  ;;  %v7955_v4 = vld [vmem:[%s9709_s5 + $0xf0] sm:$0xff]  }
0x468c   : > { %6187 = vrot.lane.b32.xlu1 %v5841_v41, %s9778_s26 }
0x468d   : > { %6237 = vrot.lane.b32.xlu0 %v5841_v41, %s9779_s16 }
0x46fc   : > { %v6068_v5 = vpop.xlane.xlu0 %6067 }
0x46fd   : > { %8135 = vrcp.f32 %v6068_v5  ;;  %v7956_v5 = vld [vmem:[%s9709_s5 + $0xf8] sm:$0xff]  }
0x4700   : > { %v6071_v6 = vpop.xlane.xlu1 %6070 }
0x4701   : > { %8137 = vrcp.f32 %v6071_v6 }
0x4704   : > { %v6074_v9 = vpop.xlane.xlu0 %6073 }
0x4705   : > { %8139 = vrcp.f32 %v6074_v9 }
0x4707   : > { %v8136_v21 = vpop.eup %8135 }
0x4708   : > { %v6077_v38 = vpop.xlane.xlu1 %6076  ;;  %v6082_v15 = vmul.f32 %v8136_v21, %v8128_v57  ;;  %v6238_v12 = vpop.permute.xlu0 %6237 }
0x4709   : > { %8141 = vrcp.f32 %v6077_v38  ;;  %v6243_v19 = vsel %vm672_vm3, %v6238_v12, 0 }
0x470b   : > { %v8138_v10 = vpop.eup %8137 }
0x470c   : > { %v6083_v24 = vmul.f32 %v8138_v10, %v8130_v60  ;;  %v6188_v16 = vpop.permute.xlu1 %6187 }
0x470d   : > { %v6193_v13 = vsel %vm672_vm3, %v6188_v16, 0 }
0x470e   : > { %v6086_v11 = vpack.c.bf16 %v6083_v24, %v6082_v15 }
0x470f   : > { %v8140_v18 = vpop.eup %8139 }
0x4710   : > { %7709 = vmatmul.mubr.msk.bf16.vlgmr.msra.gmra.mrb[176].mxu0 %vm422_vm2, %v6086_v11  ;;  %v6138_v17 = vrot.slane %v6086_v11, 4  ;;  %v6084_v20 = vmul.f32 %v8140_v18, %v8132_v63 }
0x4711   : > { %7719 = vmatpush3.bf16.msra.mxu0 %v6193_v13  ;;  %7720 = vmatprep.mubr.msk.bf16.mxu0 %vm8320_vm1, %v8319_v23 }
0x4712   : > { %7715 = vmatmul.mubr.msk.bf16.vlgmr.msra.gmra.mrb[180].mxu1 %vm422_vm2, %v6138_v17  ;;  %7730 = vmatprep.subr.bf16.mxu0 %v8319_v23 }
0x4713   : > { %v8142_v51 = vpop.eup %8141  ;;  %7725 = vmatpush3.bf16.msra.mxu1 %v6243_v19  ;;  %7726 = vmatprep.mubr.msk.bf16.mxu1 %vm8320_vm1, %v8319_v23 }
0x4714   : > { %v6085_v8 = vmul.f32 %v8142_v51, %v8134_v2  ;;  %7738 = vmatprep.subr.bf16.mxu1 %v8319_v23  ;;  %v7954_v2 = vld [vmem:[%s9709_s5 + $0xe8] sm:$0xff]  }
0x4716   : > { %v6087_v22 = vpack.c.bf16 %v6085_v8, %v6084_v20 }
0x4718   : > { %7721 = vmatmul.mubr.msk.bf16.vlgmr.msra.gmra.mrb[180].mxu0 %vm422_vm2, %v6087_v22  ;;  %v6236_v25 = vrot.slane %v6087_v22, 4 }
0x4719   : > { %7734 = vmatprep.mubr.msk.bf16.mxu0 %vm8320_vm1, %v8319_v23  ;;  %7731 = vmatpush3.bf16.msra.mxu0 %v7949_v26 }
0x471a   : > { %7727 = vmatmul.mubr.msk.bf16.vlgmr.msra.gmra.mrb[184].mxu1 %vm422_vm2, %v6236_v25  ;;  %7732 = vmatprep.subr.bf16.mxu0 %v8319_v23 }
0x471b   : > { %7742 = vmatprep.mubr.msk.bf16.mxu1 %vm8320_vm1, %v8319_v23  ;;  %7739 = vmatpush3.bf16.msra.mxu1 %v7951_v58 }
0x471c   : > { %7740 = vmatprep.subr.bf16.mxu1 %v8319_v23 }
0x471d   : > { %7733 = vmatpush3.bf16.msra.mxu0 %v7950_v54 }
0x471e   : > { %7746 = vmatprep.subr.bf16.mxu0 %v8319_v23 }
0x471f   : > { %7741 = vmatpush3.bf16.msra.mxu1 %v7952_v29 }
0x47e3   : > { %v6131_v27 = vpop.f32.mrb[176].mxu0 }
0x47e4   : > { %v7710_v28 = vpop.f32.mrb[177].mxu0 }
0x47e5   : > { %v6134_v30 = vpop.f32.mrb[178].mxu0  ;;  %v6181_v7 = vpop.f32.mrb[180].mxu1 }
0x47e6   : > { %v7711_v31 = vpop.f32.mrb[179].mxu0  ;;  %6286 = vrot.lane.b32.xlu1 %v6181_v7, %s9780_s27  ;;  %v7716_v32 = vpop.f32.mrb[181].mxu1 }
0x47e7   : > { %v6184_v33 = vpop.f32.mrb[182].mxu1 }
0x47e8   : > { %v7717_v0 = vpop.f32.mrb[183].mxu1 }
0x47eb   : > { %v6229_v34 = vpop.f32.mrb[180].mxu0 }
0x47ec   : > { %6290 = vrot.lane.b32.xlu0 %v6229_v34, %s9781_s10  ;;  %v7722_v35 = vpop.f32.mrb[181].mxu0 }
0x47ed   : > { %v6232_v3 = vpop.f32.mrb[182].mxu0  ;;  %v6279_v36 = vpop.f32.mrb[184].mxu1 }
0x47ee   : > { %v7723_v39 = vpop.f32.mrb[183].mxu0  ;;  %6294 = vrot.lane.b32.xlu1 %v6279_v36, %s9782_s9  ;;  %v7728_v37 = vpop.f32.mrb[185].mxu1 }
0x47ef   : > { %v6282_v40 = vpop.f32.mrb[186].mxu1 }
0x47f0   : > { %v7729_v41 = vpop.f32.mrb[187].mxu1 }
0x4858   : > { %v6287_v42 = vpop.permute.xlu1 %6286 }
0x4859   : > { %v6297_v44 = vsel %vm422_vm2, %v6131_v27, %v6287_v42 }
0x485e   : > { %v6291_v45 = vpop.permute.xlu0 %6290 }
0x485f   : > { %v6298_v46 = vsel %vm877_vm4, %v6297_v44, %v6291_v45 }
0x4860   : > { %v6295_v47 = vpop.permute.xlu1 %6294 }
0x4861   : > { %v6299_v48 = vsel %vm879_vm5, %v6298_v46, %v6295_v47 }
0x4862   : > { %v6300_v14 = vpack.c.bf16 %v6299_v48, %v6299_v48 }
0x4864   : > { %7735 = vmatmul.mubr.msk.bf16.vlgmr.msra.gmra.mrb[184].mxu0 %vm318_vm0, %v6300_v14 }
0x4865   : > { %7754 = vmatprep.mubr.msk.bf16.mxu0 %vm8320_vm1, %v8319_v23  ;;  %7747 = vmatpush3.bf16.msra.mxu0 %v7953_v1 }
0x4866   : > { %7748 = vmatprep.subr.bf16.mxu0 %v8319_v23 }
0x4869   : > { %7749 = vmatpush3.bf16.msra.mxu0 %v7954_v2 }
0x486a   : > { %7750 = vmatprep.subr.bf16.mxu0 %v8319_v23 }
0x486d   : > { %7751 = vmatpush3.bf16.msra.mxu0 %v7955_v4 }
0x486e   : > { %7752 = vmatprep.subr.bf16.mxu0 %v8319_v23 }
0x4871   : > { %7753 = vmatpush3.bf16.msra.mxu0 %v7956_v5 }
0x4937   : > { %v6350_v49 = vpop.f32.mrb[184].mxu0 }
0x4938   : > { %v6356_v50 = vadd.f32 %v6350_v49, %v9521_v43  ;;  %v7736_v52 = vpop.f32.mrb[185].mxu0 }
0x4939   : > { %v6353_v53 = vpop.f32.mrb[186].mxu0 }
0x493a   : > { %v7737_v55 = vpop.f32.mrb[187].mxu0  ;;  %v6357_v56 = vmul.f32 %v6356_v50, %v6356_v50 }
0x493c   : > { %v6358_v57 = vsel %vm318_vm0, %v6357_v56, 0.0 }
0x493d   : > { %6359 = vadd.xlane.f32.xlu0 %v6358_v57 }
0x49ca   : > { %v6360_v59 = vpop.xlane.xlu0 %6359 }
0x49cb   : > { %v6361_v61 = vmul.f32 0.03125, %v6360_v59 }
0x49cd   : > { %v6362_v60 = vadd.f32 1e-06, %v6361_v61 }
0x49cf   : > { %8143 = vrsqrt.f32 %v6362_v60 }
0x49d9   : > { %v8144_v62 = vpop.eup %8143 }
0x49da   : > { %v6364_v63 = vmul.f32 %v8144_v62, %v6356_v50 }
0x49dc   : > { %v6365_v43 = vpack.c.bf16 %v6364_v63, %v6364_v63 }
0x49de   : > { %7743 = vmatmul.mubr.msk.bf16.vlgmr.msra.gmra.mrb[188].mxu1 %vm318_vm0, %v6365_v43 }
0x4ab1   : > { %v6415_v6 = vpop.f32.mrb[188].mxu1 }
0x4ab2   : > { %6429 = vrot.lane.b32.xlu1 %v6415_v6, %s9777_s12  ;;  %v7744_v9 = vpop.f32.mrb[189].mxu1  ;;  %v6924_v10 = vmul.f32 -1.442695, %v6415_v6  ;;  %s9789_s12 = sshll.u32 %s8531_s18, 3 }
0x4ab3   : > { %v6418_v38 = vpop.f32.mrb[190].mxu1  ;;  %s293_s14 = scalar_lea.vmem [#allocation8], %s9789_s12 }
0x4ab4   : > { %v7745_v21 = vpop.f32.mrb[191].mxu1  ;;  %8145 = vpow2.f32 %v6924_v10  ;;  %s6517_s28 = sshll.u32 %s293_s14, 4  ;;  %s9661_s28 = int_to_ptr.vmem [resolvable:$true] %s6517_s28 }
0x4ab5   : > { %s8238_s8 = scalar_lea.vmem %s9661_s28, 128  ;;  %p8245_p8 = scmp.lt.s32.totalorder %s9661_s28, %s8243_s15 }
0x4ab6   : > { %p8239_p2 = scmp.ne.s32.totalorder %s9661_s28, %s8238_s8  ;;  %p8246_p12 = scmp.lt.s32.totalorder %s8244_s23, %s8238_s8 }
0x4ab8   : > { %p8240_p1 = pnand %p8239_p2, %p8482_p4  ;;  %p8247_p3 = por %p8246_p12, %p8245_p8 }
0x4aba   : > { %p8241_p6 = pneg %p8240_p1 }
0x4abc   : > { %p8248_p7 = pnand %p8247_p3, %p8241_p6 }
0x4abe   : > { %v8146_v15 = vpop.eup %8145 }
0x4abf   : > { %v6424_v24 = vadd.f32 1.0, %v8146_v15 }
0x4ac1   : > { %8147 = vrcp.f32 %v6424_v24 }
0x4acb   : > { %v8148_v16 = vpop.eup %8147 }
0x4acc   : > { %v6427_v23 = vmul.f32 %v8148_v16, %v6415_v6 }
0x4b24   : > { %v6430_v11 = vpop.permute.xlu1 %6429 }
0x4b25   : > { %v6432_v12 = vmul.f32 %v6430_v11, %v6427_v23 }
0x4b27   : > { %v6433_v13 = vpack.c.bf16 %v6432_v12, %v6432_v12 }
0x4b29   : > { %7755 = vmatmul.mubr.msk.bf16.vlgmr.msra.gmra.mrb[188].mxu0 %vm1039_vm6, %v6433_v13 }
0x4bfc   : > { %v6495_v17 = vpop.f32.mrb[188].mxu0 }
0x4bfd   : > { %v6501_v18 = vadd.f32 %v6495_v17, %v6356_v50  ;;  %v7756_v19 = vpop.f32.mrb[189].mxu0 }
0x4bfe   : > { %v6498_v51 = vpop.f32.mrb[190].mxu0 }
0x4bff   : > { %v7757_v20 = vpop.f32.mrb[191].mxu0  ;;  %6502 = vst.msk [vmem:[%s293_s14] sm:$0xff] %vm318_vm0, %v6501_v18 }
0x4c00   : > { %8251 = shalt.err (!%p8248_p7)
}
0x4c01   : > { %s8252_s18 = scalar_lea.hbm %s9659_s19, 128  ;;  %s8256_s29 = scalar_lea.hbm %s9710_s6, 256 }
0x4c02   : > { %p8253_p10 = scmp.ne.s32.totalorder %s9659_s19, %s8252_s18  ;;  %p8257_p0 = scmp.lt.u32.totalorder %s9659_s19, %s9710_s6 }
0x4c03   : > { %p8258_p11 = scmp.lt.u32.totalorder %s8256_s29, %s8252_s18  ;;  %p8260_p2 = scmp.lt.u32.totalorder %s8252_s18, %s9659_s19 }
0x4c04   : > { %p8254_p13 = pnand %p8253_p10, %p8482_p4 }
0x4c05   : > { %p8259_p9 = por %p8258_p11, %p8257_p0 }
0x4c06   : > { %p8255_p5 = pneg %p8254_p13 }
0x4c07   : > { %p8261_p1 = por %p8260_p2, %p8259_p9 }
0x4c09   : > { %p8262_p6 = pnand %p8261_p1, %p8255_p5 }
0x4c0b   : > { %8265 = shalt.err (!%p8262_p6)
}
0x4c0c   : > { %7768 = dma.vmem_to_hbm [thread:$0]  (%p8482_p4), %s9661_s28, 128, %s9659_s19, %s6504_s25  }
0x4c0d PF: > { %s9790_s16 = sld [smem:[#allocation15_spill]]  ;;  %s9791_s10 = sld [smem:[#allocation14_spill]] }
0x4c0e   : > { %s6529_s9 = sand.u32 1, %s8296_s21  }
0x4c0f   : > { %s6530_s4 = scalar_lea.sflag [#allocation4], %s6529_s9 }
0x4c13   : > { %p9792_p8 = scmp.ne.s32.totalorder %s9790_s16, 0  ;;  %p9793_p12 = scmp.ge.s32.totalorder %s9791_s10, 2 }
0x4c15   : > { %p7782_p3 = pnand %p9793_p12, %p9792_p8 }
0x4c17   : > { %8291 = dma.done.wait (!%p7782_p3), %s6530_s4, 128  }
0x4c18   : > { %8293 = vsyncadd (!%p7782_p3), %s6530_s4, 4294967168  ;;  %s9794_s24 = sld [smem:[#allocation16_spill]]  ;;  %s9795_s21 = sld [smem:[#allocation12_spill]] }
0x4c19   : > { %s9796_s22 = sld [smem:[#allocation13_spill]]  ;;  %s9797_s23 = sld [smem:[#allocation17_spill]] }
0x4c1e   : > { %p20_p7 = scmp.ge.s32.totalorder %s9794_s24, 4  }
0x4c20   :  { %22 = sbr.rel (!%p20_p7) target bundleno = 10 (0xa), region = 125 }
0x4c27   :  { %6535 = vsyncpa [#allocation3], 1 }
0x4c28   :  { %6537 = vsyncpa [#allocation3 + $0x1], 1 }
0x4c29   :  { %6538 = vsyncpa [#allocation6], 1 }
0x4c2a   :  { %6539 = vsyncpa [#allocation4], 1 }
0x4c2b   :  { %6541 = vsyncpa [#allocation4 + $0x1], 1 }

</bundles_post_ra>
